<compile_context>
chip_gen: v6e
topology: v6e:2x2x1
jax: 0.10.0
libtpu: 0.0.40
codegen_flags: <defaults>
</compile_context>

<pallas_src>
import functools

import jax
import jax.numpy as jnp
from jax import lax
from jax.experimental import pallas as pl
from jax.experimental.pallas import tpu as pltpu

TM = 512  # max M-tile for the fused conv matmul kernel


def _round_up(x, m):
    return (x + m - 1) // m * m


# ----------------------------------------------------------------------------
# Pallas kernels
# ----------------------------------------------------------------------------
def _conv_mm_kernel(p_ref, w_ref, scale_ref, shift_ref, o_ref, *, apply_act):
    """(bm, K) @ (K, N) with folded-BN epilogue and optional LeakyReLU(0.2)."""
    acc = jnp.dot(p_ref[...], w_ref[...], preferred_element_type=jnp.float32)
    acc = acc * scale_ref[...] + shift_ref[...]
    if apply_act:
        acc = jnp.where(acc >= 0, acc, 0.2 * acc)
    o_ref[...] = acc.astype(o_ref.dtype)


def _conv_mm_mse_kernel(p_ref, w_ref, scale_ref, shift_ref, tgt_ref,
                        o_ref, sq_ref, *, apply_act, m_valid):
    """Same as _conv_mm_kernel, plus accumulates sum((out - target)^2) per lane
    into a resident (1, N) accumulator output."""
    i = pl.program_id(0)
    acc = jnp.dot(p_ref[...], w_ref[...], preferred_element_type=jnp.float32)
    acc = acc * scale_ref[...] + shift_ref[...]
    if apply_act:
        acc = jnp.where(acc >= 0, acc, 0.2 * acc)
    o_ref[...] = acc.astype(o_ref.dtype)

    d = acc - tgt_ref[...]
    bm = d.shape[0]
    if m_valid % bm != 0:                       # mask rows added by M padding
        row = i * bm + lax.broadcasted_iota(jnp.int32, d.shape, 0)
        d = jnp.where(row < m_valid, d, 0.0)

    @pl.when(i == 0)
    def _():
        sq_ref[...] = jnp.zeros_like(sq_ref)

    sq_ref[...] += jnp.sum(d * d, axis=0, keepdims=True)


def _vq_kernel(z_ref, e_ref, esq_ref, q_ref, cnt_ref, sq_ref, *, m_valid):
    """Vector-quantize z (bm, D) against codebook e (K, D); also accumulates
    per-code counts and the e-latent sum-of-squares."""
    i = pl.program_id(0)
    z = z_ref[...]                        # (bm, D) f32
    e = e_ref[...]                        # (K, D) f32
    n_emb = e.shape[0]
    # distances up to the (argmin-irrelevant) ||z||^2 term:
    dist = esq_ref[...] - 2.0 * lax.dot_general(
        z, e, (((1,), (1,)), ((), ())), preferred_element_type=jnp.float32)
    min_d = jnp.min(dist, axis=-1, keepdims=True)
    iota = lax.broadcasted_iota(jnp.int32, dist.shape, 1)
    # first index attaining the min (PyTorch argmin tie-breaking)
    idx = jnp.min(jnp.where(dist <= min_d, iota, n_emb), axis=-1, keepdims=True)
    onehot = (iota == idx).astype(jnp.float32)                 # (bm, K)
    q = jnp.dot(onehot, e, preferred_element_type=jnp.float32)  # (bm, D)
    q_ref[...] = q

    d = z - q
    oh = onehot
    bm = z.shape[0]
    if m_valid % bm != 0:                       # mask rows added by M padding
        row = i * bm + lax.broadcasted_iota(jnp.int32, (bm, 1), 0)
        valid = (row < m_valid).astype(jnp.float32)
        d = d * valid
        oh = oh * valid

    @pl.when(i == 0)
    def _():
        cnt_ref[...] = jnp.zeros_like(cnt_ref)
        sq_ref[...] = jnp.zeros_like(sq_ref)

    cnt_ref[...] += jnp.sum(oh, axis=0, keepdims=True)     # (1, K)
    sq_ref[...] += jnp.sum(d * d, axis=0, keepdims=True)   # (1, D)


# ----------------------------------------------------------------------------
# Pallas wrappers
# ----------------------------------------------------------------------------
def conv_matmul(patches, w_mat, scale, shift, apply_act, mse_target=None):
    """patches (M, K) @ w_mat (K, N) with fused scale/shift (+LeakyReLU).

    bf16 MXU operands, f32 epilogue, lane-dense (N padded to 128) output,
    per-layer M block.  If mse_target is given, also returns the fused
    sum((out - target)^2) scalar."""
    M, K = patches.shape
    N = w_mat.shape[1]
    Kp = _round_up(K, 16)                      # sublane-friendly K (bf16)
    Np = _round_up(N, 128)                     # lane-dense output
    bm = min(TM, _round_up(M, 8))              # per-layer M block
    Mp = _round_up(M, bm)

    p = patches.astype(jnp.bfloat16)
    if Mp != M or Kp != K:
        p = jnp.pad(p, ((0, Mp - M), (0, Kp - K)))
    w = w_mat.astype(jnp.bfloat16)
    if Kp != K or Np != N:
        w = jnp.pad(w, ((0, Kp - K), (0, Np - N)))
    sc = scale.astype(jnp.float32)
    sh = shift.astype(jnp.float32)
    if Np != N:
        sc = jnp.pad(sc, (0, Np - N), constant_values=1.0)
        sh = jnp.pad(sh, (0, Np - N))
    sc = sc.reshape(1, Np)
    sh = sh.reshape(1, Np)

    grid = (Mp // bm,)
    in_specs = [
        pl.BlockSpec((bm, Kp), lambda i: (i, 0)),
        pl.BlockSpec((Kp, Np), lambda i: (0, 0)),
        pl.BlockSpec((1, Np), lambda i: (0, 0)),
        pl.BlockSpec((1, Np), lambda i: (0, 0)),
    ]

    if mse_target is None:
        out = pl.pallas_call(
            functools.partial(_conv_mm_kernel, apply_act=apply_act),
            out_shape=jax.ShapeDtypeStruct((Mp, Np), jnp.float32),
            grid=grid,
            in_specs=in_specs,
            out_specs=pl.BlockSpec((bm, Np), lambda i: (i, 0)),
            compiler_params=pltpu.CompilerParams(
                dimension_semantics=("parallel",)),
        )(p, w, sc, sh)
        return out[:M, :N]

    tgt = mse_target.astype(jnp.float32)
    if Mp != M or Np != N:
        tgt = jnp.pad(tgt, ((0, Mp - M), (0, Np - N)))
    out, sq = pl.pallas_call(
        functools.partial(_conv_mm_mse_kernel, apply_act=apply_act, m_valid=M),
        out_shape=(jax.ShapeDtypeStruct((Mp, Np), jnp.float32),
                   jax.ShapeDtypeStruct((1, Np), jnp.float32)),
        grid=grid,
        in_specs=in_specs + [pl.BlockSpec((bm, Np), lambda i: (i, 0))],
        out_specs=(pl.BlockSpec((bm, Np), lambda i: (i, 0)),
                   pl.BlockSpec((1, Np), lambda i: (0, 0))),
        compiler_params=pltpu.CompilerParams(
            dimension_semantics=("arbitrary",)),   # resident SSD accumulator
    )(p, w, sc, sh, tgt)
    return out[:M, :N], jnp.sum(sq)


def vq_quantize(z_flat, codebook):
    """Returns (quantized (M, D), per-code counts (K,), sum((z - q)^2))."""
    M, D = z_flat.shape
    K = codebook.shape[0]
    bm = min(TM, _round_up(M, 8))
    Mp = _round_up(M, bm)
    z = z_flat if Mp == M else jnp.pad(z_flat, ((0, Mp - M), (0, 0)))
    esq = jnp.sum(codebook * codebook, axis=1).reshape(1, K)

    q, cnt, sq = pl.pallas_call(
        functools.partial(_vq_kernel, m_valid=M),
        out_shape=(jax.ShapeDtypeStruct((Mp, D), jnp.float32),
                   jax.ShapeDtypeStruct((1, K), jnp.float32),
                   jax.ShapeDtypeStruct((1, D), jnp.float32)),
        grid=(Mp // bm,),
        in_specs=[pl.BlockSpec((bm, D), lambda i: (i, 0)),
                  pl.BlockSpec((K, D), lambda i: (0, 0)),
                  pl.BlockSpec((1, K), lambda i: (0, 0))],
        out_specs=(pl.BlockSpec((bm, D), lambda i: (i, 0)),
                   pl.BlockSpec((1, K), lambda i: (0, 0)),
                   pl.BlockSpec((1, D), lambda i: (0, 0))),
        compiler_params=pltpu.CompilerParams(
            dimension_semantics=("arbitrary",)),   # resident accumulators
    )(z, codebook, esq)
    return q[:M], cnt[0], jnp.sum(sq)


# ----------------------------------------------------------------------------
# Conv / deconv lowering glue (pure JAX: pads / slices / concat / transposes)
# ----------------------------------------------------------------------------
def _fold_bn(b, bn, cout, apply_bn):
    if apply_bn:
        gamma, beta, mean, var = bn
        s = gamma / jnp.sqrt(var + 1e-5)
        return s, (b - mean) * s + beta
    return jnp.ones((cout,), jnp.float32), b


def _im2col_stride2(x):
    """3x3 conv, stride 2, pad 1, NHWC -> (B*Ho*Wo, 9*C) bf16 patches."""
    B, H, W, C = x.shape
    Ho, Wo = H // 2, W // 2
    xp = jnp.pad(x.astype(jnp.bfloat16), ((0, 0), (1, 1), (1, 1), (0, 0)))
    cols = [xp[:, kh:kh + 2 * Ho:2, kw:kw + 2 * Wo:2, :]
            for kh in range(3) for kw in range(3)]
    patches = jnp.concatenate(cols, axis=-1)
    return patches.reshape(B * Ho * Wo, 9 * C), B, Ho, Wo


def conv_bn_lrelu(x, w, b, bn):
    """Conv2d(k=3, s=2, p=1) + BN + LeakyReLU(0.2).  w: (Cout, Cin, 3, 3)."""
    cout = w.shape[0]
    patches, B, Ho, Wo = _im2col_stride2(x)
    w_mat = jnp.transpose(w, (2, 3, 1, 0)).reshape(-1, cout)
    scale, shift = _fold_bn(b, bn, cout, True)
    out = conv_matmul(patches, w_mat, scale, shift, apply_act=True)
    return out.reshape(B, Ho, Wo, cout)


def _deconv_phase_weight(w):
    """ConvTranspose2d(3, s=2, p=1, op=1) weight (Cin, Cout, 3, 3) -> (4*Cin, 4*Cout)
    for the 4-phase (sub-pixel) decomposition.  Row blocks: input taps (ty, tx);
    column blocks: output phases (dy, dx)."""
    cin, cout = w.shape[0], w.shape[1]
    zeros = jnp.zeros((cin, cout), w.dtype)

    def tap_k(d, t):                # kernel index for output phase d / tap offset t
        if d == 0:
            return 1 if t == 0 else None
        return 2 if t == 0 else 0

    rows = []
    for ty in range(2):
        for tx in range(2):
            cols = []
            for dy in range(2):
                for dx in range(2):
                    ky, kx = tap_k(dy, ty), tap_k(dx, tx)
                    cols.append(zeros if ky is None or kx is None
                                else w[:, :, ky, kx])
            rows.append(jnp.concatenate(cols, axis=1))
    return jnp.concatenate(rows, axis=0)        # (4*Cin, 4*Cout)


def _phase_target(x, C):
    """NHWC (B, 2H, 2W, C) -> (B*H*W, 4*C) in the same 4-phase column layout."""
    B, H2, W2, _ = x.shape
    H, W = H2 // 2, W2 // 2
    return (x.reshape(B, H, 2, W, 2, C)
             .transpose(0, 1, 3, 2, 4, 5)
             .reshape(B * H * W, 4 * C))


def deconv_bn_lrelu(x, w, b, bn, apply_bn, apply_act, mse_target_nhwc=None):
    """ConvTranspose2d(3, s=2, p=1, op=1) [+ BN + LeakyReLU] via 4-phase matmul.
    w: (Cin, Cout, 3, 3).  Optionally fuses sum((out - target)^2)."""
    cin, cout = w.shape[0], w.shape[1]
    B, H, W, _ = x.shape
    xp = jnp.pad(x.astype(jnp.bfloat16), ((0, 0), (0, 1), (0, 1), (0, 0)))
    cols = [xp[:, ty:ty + H, tx:tx + W, :] for ty in range(2) for tx in range(2)]
    patches = jnp.concatenate(cols, axis=-1).reshape(B * H * W, 4 * cin)
    w_mat = _deconv_phase_weight(w)
    scale, shift = _fold_bn(b, bn, cout, apply_bn)
    scale4, shift4 = jnp.tile(scale, 4), jnp.tile(shift, 4)

    ssd = None
    if mse_target_nhwc is None:
        out = conv_matmul(patches, w_mat, scale4, shift4, apply_act)
    else:
        tgt = _phase_target(mse_target_nhwc, cout)
        out, ssd = conv_matmul(patches, w_mat, scale4, shift4, apply_act,
                               mse_target=tgt)
    out = (out.reshape(B, H, W, 2, 2, cout)     # pixel shuffle to (B, 2H, 2W, C)
              .transpose(0, 1, 3, 2, 4, 5)
              .reshape(B, 2 * H, 2 * W, cout))
    return out, ssd


# ----------------------------------------------------------------------------
# Model
# ----------------------------------------------------------------------------
def init_params(key, chnum_in, feature_num, feature_num_2, mem_dim, n_embeddings):
    fnx2 = 2 * feature_num
    assert mem_dim == fnx2, "mem_dim must equal feature_num * 2 (encoder output channels)"
    enc_ch = [(chnum_in, feature_num_2), (feature_num_2, feature_num),
              (feature_num, fnx2), (fnx2, fnx2)]
    dec_ch = [(fnx2, fnx2), (fnx2, feature_num),
              (feature_num, feature_num_2), (feature_num_2, chnum_in)]
    keys = iter(jax.random.split(key, 2 * (len(enc_ch) + len(dec_ch)) + 1))
    enc, dec = [], []
    for cin, cout in enc_ch:
        bound = 1.0 / (cin * 9) ** 0.5
        enc.append({
            "w": jax.random.uniform(next(keys), (cout, cin, 3, 3), jnp.float32, -bound, bound),
            "b": jax.random.uniform(next(keys), (cout,), jnp.float32, -bound, bound),
            "bn": (jnp.ones(cout), jnp.zeros(cout), jnp.zeros(cout), jnp.ones(cout)),
        })
    for cin, cout in dec_ch:
        bound = 1.0 / (cin * 9) ** 0.5
        dec.append({
            "w": jax.random.uniform(next(keys), (cin, cout, 3, 3), jnp.float32, -bound, bound),
            "b": jax.random.uniform(next(keys), (cout,), jnp.float32, -bound, bound),
            "bn": (jnp.ones(cout), jnp.zeros(cout), jnp.zeros(cout), jnp.ones(cout)),
        })
    codebook = jax.random.uniform(next(keys), (n_embeddings, mem_dim), jnp.float32,
                                  -1.0 / n_embeddings, 1.0 / n_embeddings)
    return {"enc": enc, "dec": dec, "codebook": codebook}


def vqvae_forward(x_nchw, params, commitment_cost=0.25, return_loss=True):
    x = jnp.transpose(x_nchw, (0, 2, 3, 1)).astype(jnp.float32)   # NCHW -> NHWC

    # --- encoder ---
    f = x
    for layer in params["enc"]:
        f = conv_bn_lrelu(f, layer["w"], layer["b"], layer["bn"])

    # --- VQ embedding (EMA update is training-only; forward semantics only) ---
    B, Hf, Wf, D = f.shape
    z_flat = f.reshape(-1, D)
    q_flat, counts, e_ssd = vq_quantize(z_flat, params["codebook"])
    e_latent_loss = e_ssd / z_flat.size           # F.mse_loss(x, quantized.detach())
    commitment_loss = commitment_cost * e_latent_loss
    codebook_loss = e_latent_loss                 # same value in forward (detach only)
    avg_probs = counts / z_flat.shape[0]
    perplexity = jnp.exp(-jnp.sum(avg_probs * jnp.log(avg_probs + 1e-10)))
    zq = q_flat.reshape(B, Hf, Wf, D)             # straight-through: value == quantized

    # --- decoder ---
    h = zq
    dec = params["dec"]
    for layer in dec[:-1]:
        h, _ = deconv_bn_lrelu(h, layer["w"], layer["b"], layer["bn"],
                               apply_bn=True, apply_act=True)
    last = dec[-1]

    if return_loss:
        _, recon_ssd = deconv_bn_lrelu(h, last["w"], last["b"], last["bn"],
                                       apply_bn=False, apply_act=False,
                                       mse_target_nhwc=x)
        recon_loss = recon_ssd / x.size
        total_loss = recon_loss + commitment_loss + codebook_loss
        return {"total_loss": total_loss, "recon_loss": recon_loss,
                "commitment_loss": commitment_loss, "codebook_loss": codebook_loss,
                "perplexity_loss": perplexity}

    x_hat, _ = deconv_bn_lrelu(h, last["w"], last["b"], last["bn"],
                               apply_bn=False, apply_act=False)
    return {"recon_result": jnp.transpose(x_hat, (0, 3, 1, 2))}


if __name__ == "__main__":
    chnum_in = 3
    feature_num = 32
    feature_num_2 = 16
    mem_dim = 2 * feature_num      # must match encoder output channels
    n_embeddings = 128

    key = jax.random.PRNGKey(0)
    kx, kp = jax.random.split(key)
    x = jax.random.normal(kx, (2, chnum_in, 32, 32), jnp.float32)   # NCHW input
    params = init_params(kp, chnum_in, feature_num, feature_num_2, mem_dim, n_embeddings)

    fwd_loss = jax.jit(lambda inp: vqvae_forward(inp, params, return_loss=True))
    out = jax.block_until_ready(fwd_loss(x))
    ok = all(bool(jnp.isfinite(v).all()) for v in out.values())
    assert ok, "non-finite loss output"

    fwd_rec = jax.jit(lambda inp: vqvae_forward(inp, params, return_loss=False))
    rec = jax.block_until_ready(fwd_rec(x))
    assert rec["recon_result"].shape == x.shape
    assert bool(jnp.isfinite(rec["recon_result"]).all()), "non-finite reconstruction"

    print("KERNEL_OK")
</pallas_src>

<mosaic_0001>
module attributes {stable_mosaic.version = 11 : i64} {
  func.func @_conv_mm_kernel(%arg0: i32, %arg1: memref<512x32xbf16, #tpu.memory_space<vmem>>, %arg2: memref<32x128xbf16, #tpu.memory_space<vmem>>, %arg3: memref<1x128xf32, #tpu.memory_space<vmem>>, %arg4: memref<1x128xf32, #tpu.memory_space<vmem>>, %arg5: memref<512x128xf32, #tpu.memory_space<vmem>>) attributes {dimension_semantics = [#tpu.dimension_semantics<parallel>], iteration_bounds = array<i64: 1>, scalar_prefetch = 0 : i64, scratch_operands = 0 : i64, tpu.core_type = #tpu.core_type<tc>, window_params = [{transform_indices = @transform_0, window_bounds = array<i64: 512, 32>}, {pipeline_mode = #tpu.pipeline_mode<synchronous>, transform_indices = @transform_1, window_bounds = array<i64: 32, 128>}, {pipeline_mode = #tpu.pipeline_mode<synchronous>, transform_indices = @transform_2, window_bounds = array<i64: 1, 128>}, {pipeline_mode = #tpu.pipeline_mode<synchronous>, transform_indices = @transform_3, window_bounds = array<i64: 1, 128>}, {transform_indices = @transform_4, window_bounds = array<i64: 512, 128>}]} {
    %c0 = arith.constant 0 : index
    %c0_0 = arith.constant 0 : index
    %0 = vector.load %arg1[%c0, %c0_0] : memref<512x32xbf16, #tpu.memory_space<vmem>>, vector<512x32xbf16>
    %c0_1 = arith.constant 0 : index
    %c0_2 = arith.constant 0 : index
    %1 = vector.load %arg2[%c0_1, %c0_2] : memref<32x128xbf16, #tpu.memory_space<vmem>>, vector<32x128xbf16>
    %cst = arith.constant dense<0.000000e+00> : vector<512x128xf32>
    %2 = tpu.matmul %0, %1, %cst {dimension_numbers = #tpu.dot_dimension_numbers<[1], [0], [0], [1], [0, 0, 1, 1], [], []>} : vector<512x32xbf16>, vector<32x128xbf16>, vector<512x128xf32> -> vector<512x128xf32>
    %c0_3 = arith.constant 0 : index
    %c0_4 = arith.constant 0 : index
    %3 = vector.load %arg3[%c0_3, %c0_4] : memref<1x128xf32, #tpu.memory_space<vmem>>, vector<1x128xf32>
    %4 = vector.broadcast %3 : vector<1x128xf32> to vector<512x128xf32>
    %5 = arith.mulf %2, %4 : vector<512x128xf32>
    %c0_5 = arith.constant 0 : index
    %c0_6 = arith.constant 0 : index
    %6 = vector.load %arg4[%c0_5, %c0_6] : memref<1x128xf32, #tpu.memory_space<vmem>>, vector<1x128xf32>
    %7 = vector.broadcast %6 : vector<1x128xf32> to vector<512x128xf32>
    %8 = arith.addf %5, %7 : vector<512x128xf32>
    %cst_7 = arith.constant 0.000000e+00 : f32
    %9 = vector.broadcast %cst_7 : f32 to vector<512x128xf32>
    %10 = arith.cmpf oge, %8, %9 : vector<512x128xf32>
    %cst_8 = arith.constant 2.000000e-01 : f32
    %11 = vector.broadcast %cst_8 : f32 to vector<512x128xf32>
    %12 = arith.mulf %11, %8 : vector<512x128xf32>
    %13 = arith.select %10, %8, %12 : vector<512x128xi1>, vector<512x128xf32>
    %c0_9 = arith.constant 0 : index
    %c0_10 = arith.constant 0 : index
    %14 = vector.load %arg5[%c0_9, %c0_10] : memref<512x128xf32, #tpu.memory_space<vmem>>, vector<512x128xf32>
    tpu.vector_store %arg5[%c0_9, %c0_10], %13 {strides = array<i32>} : memref<512x128xf32, #tpu.memory_space<vmem>>, vector<512x128xf32>,
    return
  }
  func.func @transform_0(%arg0: i32) -> (i32, i32) {
    %c0_i32 = arith.constant 0 : i32
    %c0_i32_0 = arith.constant 0 : i32
    return %arg0, %c0_i32 : i32, i32
  }
  func.func @transform_1(%arg0: i32) -> (i32, i32) {
    %c0_i32 = arith.constant 0 : i32
    %c0_i32_0 = arith.constant 0 : i32
    %c0_i32_1 = arith.constant 0 : i32
    return %c0_i32, %c0_i32_0 : i32, i32
  }
  func.func @transform_2(%arg0: i32) -> (i32, i32) {
    %c0_i32 = arith.constant 0 : i32
    %c0_i32_0 = arith.constant 0 : i32
    %c0_i32_1 = arith.constant 0 : i32
    return %c0_i32, %c0_i32_0 : i32, i32
  }
  func.func @transform_3(%arg0: i32) -> (i32, i32) {
    %c0_i32 = arith.constant 0 : i32
    %c0_i32_0 = arith.constant 0 : i32
    %c0_i32_1 = arith.constant 0 : i32
    return %c0_i32, %c0_i32_0 : i32, i32
  }
  func.func @transform_4(%arg0: i32) -> (i32, i32) {
    %c0_i32 = arith.constant 0 : i32
    %c0_i32_0 = arith.constant 0 : i32
    return %arg0, %c0_i32 : i32, i32
  }
}

module attributes {stable_mosaic.version = 11 : i64} {
  func.func @_conv_mm_kernel(%arg0: i32, %arg1: memref<128x144xbf16, #tpu.memory_space<vmem>>, %arg2: memref<144x128xbf16, #tpu.memory_space<vmem>>, %arg3: memref<1x128xf32, #tpu.memory_space<vmem>>, %arg4: memref<1x128xf32, #tpu.memory_space<vmem>>, %arg5: memref<128x128xf32, #tpu.memory_space<vmem>>) attributes {dimension_semantics = [#tpu.dimension_semantics<parallel>], iteration_bounds = array<i64: 1>, scalar_prefetch = 0 : i64, scratch_operands = 0 : i64, tpu.core_type = #tpu.core_type<tc>, window_params = [{transform_indices = @transform_0, window_bounds = array<i64: 128, 144>}, {pipeline_mode = #tpu.pipeline_mode<synchronous>, transform_indices = @transform_1, window_bounds = array<i64: 144, 128>}, {pipeline_mode = #tpu.pipeline_mode<synchronous>, transform_indices = @transform_2, window_bounds = array<i64: 1, 128>}, {pipeline_mode = #tpu.pipeline_mode<synchronous>, transform_indices = @transform_3, window_bounds = array<i64: 1, 128>}, {transform_indices = @transform_4, window_bounds = array<i64: 128, 128>}]} {
    %c0 = arith.constant 0 : index
    %c0_0 = arith.constant 0 : index
    %0 = vector.load %arg1[%c0, %c0_0] : memref<128x144xbf16, #tpu.memory_space<vmem>>, vector<128x144xbf16>
    %c0_1 = arith.constant 0 : index
    %c0_2 = arith.constant 0 : index
    %1 = vector.load %arg2[%c0_1, %c0_2] : memref<144x128xbf16, #tpu.memory_space<vmem>>, vector<144x128xbf16>
    %cst = arith.constant dense<0.000000e+00> : vector<128x128xf32>
    %2 = tpu.matmul %0, %1, %cst {dimension_numbers = #tpu.dot_dimension_numbers<[1], [0], [0], [1], [0, 0, 1, 1], [], []>} : vector<128x144xbf16>, vector<144x128xbf16>, vector<128x128xf32> -> vector<128x128xf32>
    %c0_3 = arith.constant 0 : index
    %c0_4 = arith.constant 0 : index
    %3 = vector.load %arg3[%c0_3, %c0_4] : memref<1x128xf32, #tpu.memory_space<vmem>>, vector<1x128xf32>
    %4 = vector.broadcast %3 : vector<1x128xf32> to vector<128x128xf32>
    %5 = arith.mulf %2, %4 : vector<128x128xf32>
    %c0_5 = arith.constant 0 : index
    %c0_6 = arith.constant 0 : index
    %6 = vector.load %arg4[%c0_5, %c0_6] : memref<1x128xf32, #tpu.memory_space<vmem>>, vector<1x128xf32>
    %7 = vector.broadcast %6 : vector<1x128xf32> to vector<128x128xf32>
    %8 = arith.addf %5, %7 : vector<128x128xf32>
    %cst_7 = arith.constant 0.000000e+00 : f32
    %9 = vector.broadcast %cst_7 : f32 to vector<128x128xf32>
    %10 = arith.cmpf oge, %8, %9 : vector<128x128xf32>
    %cst_8 = arith.constant 2.000000e-01 : f32
    %11 = vector.broadcast %cst_8 : f32 to vector<128x128xf32>
    %12 = arith.mulf %11, %8 : vector<128x128xf32>
    %13 = arith.select %10, %8, %12 : vector<128x128xi1>, vector<128x128xf32>
    %c0_9 = arith.constant 0 : index
    %c0_10 = arith.constant 0 : index
    %14 = vector.load %arg5[%c0_9, %c0_10] : memref<128x128xf32, #tpu.memory_space<vmem>>, vector<128x128xf32>
    tpu.vector_store %arg5[%c0_9, %c0_10], %13 {strides = array<i32>} : memref<128x128xf32, #tpu.memory_space<vmem>>, vector<128x128xf32>,
    return
  }
  func.func @transform_0(%arg0: i32) -> (i32, i32) {
    %c0_i32 = arith.constant 0 : i32
    %c0_i32_0 = arith.constant 0 : i32
    return %arg0, %c0_i32 : i32, i32
  }
  func.func @transform_1(%arg0: i32) -> (i32, i32) {
    %c0_i32 = arith.constant 0 : i32
    %c0_i32_0 = arith.constant 0 : i32
    %c0_i32_1 = arith.constant 0 : i32
    return %c0_i32, %c0_i32_0 : i32, i32
  }
  func.func @transform_2(%arg0: i32) -> (i32, i32) {
    %c0_i32 = arith.constant 0 : i32
    %c0_i32_0 = arith.constant 0 : i32
    %c0_i32_1 = arith.constant 0 : i32
    return %c0_i32, %c0_i32_0 : i32, i32
  }
  func.func @transform_3(%arg0: i32) -> (i32, i32) {
    %c0_i32 = arith.constant 0 : i32
    %c0_i32_0 = arith.constant 0 : i32
    %c0_i32_1 = arith.constant 0 : i32
    return %c0_i32, %c0_i32_0 : i32, i32
  }
  func.func @transform_4(%arg0: i32) -> (i32, i32) {
    %c0_i32 = arith.constant 0 : i32
    %c0_i32_0 = arith.constant 0 : i32
    return %arg0, %c0_i32 : i32, i32
  }
}

module attributes {stable_mosaic.version = 11 : i64} {
  func.func @_conv_mm_kernel(%arg0: i32, %arg1: memref<32x288xbf16, #tpu.memory_space<vmem>>, %arg2: memref<288x128xbf16, #tpu.memory_space<vmem>>, %arg3: memref<1x128xf32, #tpu.memory_space<vmem>>, %arg4: memref<1x128xf32, #tpu.memory_space<vmem>>, %arg5: memref<32x128xf32, #tpu.memory_space<vmem>>) attributes {dimension_semantics = [#tpu.dimension_semantics<parallel>], iteration_bounds = array<i64: 1>, scalar_prefetch = 0 : i64, scratch_operands = 0 : i64, tpu.core_type = #tpu.core_type<tc>, window_params = [{transform_indices = @transform_0, window_bounds = array<i64: 32, 288>}, {pipeline_mode = #tpu.pipeline_mode<synchronous>, transform_indices = @transform_1, window_bounds = array<i64: 288, 128>}, {pipeline_mode = #tpu.pipeline_mode<synchronous>, transform_indices = @transform_2, window_bounds = array<i64: 1, 128>}, {pipeline_mode = #tpu.pipeline_mode<synchronous>, transform_indices = @transform_3, window_bounds = array<i64: 1, 128>}, {transform_indices = @transform_4, window_bounds = array<i64: 32, 128>}]} {
    %c0 = arith.constant 0 : index
    %c0_0 = arith.constant 0 : index
    %0 = vector.load %arg1[%c0, %c0_0] : memref<32x288xbf16, #tpu.memory_space<vmem>>, vector<32x288xbf16>
    %c0_1 = arith.constant 0 : index
    %c0_2 = arith.constant 0 : index
    %1 = vector.load %arg2[%c0_1, %c0_2] : memref<288x128xbf16, #tpu.memory_space<vmem>>, vector<288x128xbf16>
    %cst = arith.constant dense<0.000000e+00> : vector<32x128xf32>
    %2 = tpu.matmul %0, %1, %cst {dimension_numbers = #tpu.dot_dimension_numbers<[1], [0], [0], [1], [0, 0, 1, 1], [], []>} : vector<32x288xbf16>, vector<288x128xbf16>, vector<32x128xf32> -> vector<32x128xf32>
    %c0_3 = arith.constant 0 : index
    %c0_4 = arith.constant 0 : index
    %3 = vector.load %arg3[%c0_3, %c0_4] : memref<1x128xf32, #tpu.memory_space<vmem>>, vector<1x128xf32>
    %4 = vector.broadcast %3 : vector<1x128xf32> to vector<32x128xf32>
    %5 = arith.mulf %2, %4 : vector<32x128xf32>
    %c0_5 = arith.constant 0 : index
    %c0_6 = arith.constant 0 : index
    %6 = vector.load %arg4[%c0_5, %c0_6] : memref<1x128xf32, #tpu.memory_space<vmem>>, vector<1x128xf32>
    %7 = vector.broadcast %6 : vector<1x128xf32> to vector<32x128xf32>
    %8 = arith.addf %5, %7 : vector<32x128xf32>
    %cst_7 = arith.constant 0.000000e+00 : f32
    %9 = vector.broadcast %cst_7 : f32 to vector<32x128xf32>
    %10 = arith.cmpf oge, %8, %9 : vector<32x128xf32>
    %cst_8 = arith.constant 2.000000e-01 : f32
    %11 = vector.broadcast %cst_8 : f32 to vector<32x128xf32>
    %12 = arith.mulf %11, %8 : vector<32x128xf32>
    %13 = arith.select %10, %8, %12 : vector<32x128xi1>, vector<32x128xf32>
    %c0_9 = arith.constant 0 : index
    %c0_10 = arith.constant 0 : index
    %14 = vector.load %arg5[%c0_9, %c0_10] : memref<32x128xf32, #tpu.memory_space<vmem>>, vector<32x128xf32>
    tpu.vector_store %arg5[%c0_9, %c0_10], %13 {strides = array<i32>} : memref<32x128xf32, #tpu.memory_space<vmem>>, vector<32x128xf32>,
    return
  }
  func.func @transform_0(%arg0: i32) -> (i32, i32) {
    %c0_i32 = arith.constant 0 : i32
    %c0_i32_0 = arith.constant 0 : i32
    return %arg0, %c0_i32 : i32, i32
  }
  func.func @transform_1(%arg0: i32) -> (i32, i32) {
    %c0_i32 = arith.constant 0 : i32
    %c0_i32_0 = arith.constant 0 : i32
    %c0_i32_1 = arith.constant 0 : i32
    return %c0_i32, %c0_i32_0 : i32, i32
  }
  func.func @transform_2(%arg0: i32) -> (i32, i32) {
    %c0_i32 = arith.constant 0 : i32
    %c0_i32_0 = arith.constant 0 : i32
    %c0_i32_1 = arith.constant 0 : i32
    return %c0_i32, %c0_i32_0 : i32, i32
  }
  func.func @transform_3(%arg0: i32) -> (i32, i32) {
    %c0_i32 = arith.constant 0 : i32
    %c0_i32_0 = arith.constant 0 : i32
    %c0_i32_1 = arith.constant 0 : i32
    return %c0_i32, %c0_i32_0 : i32, i32
  }
  func.func @transform_4(%arg0: i32) -> (i32, i32) {
    %c0_i32 = arith.constant 0 : i32
    %c0_i32_0 = arith.constant 0 : i32
    return %arg0, %c0_i32 : i32, i32
  }
}

module attributes {stable_mosaic.version = 11 : i64} {
  func.func @_vq_kernel(%arg0: i32, %arg1: memref<8x64xf32, #tpu.memory_space<vmem>>, %arg2: memref<128x64xf32, #tpu.memory_space<vmem>>, %arg3: memref<1x128xf32, #tpu.memory_space<vmem>>, %arg4: memref<8x64xf32, #tpu.memory_space<vmem>>, %arg5: memref<1x128xf32, #tpu.memory_space<vmem>>, %arg6: memref<1x64xf32, #tpu.memory_space<vmem>>) attributes {dimension_semantics = [#tpu.dimension_semantics<arbitrary>], iteration_bounds = array<i64: 1>, scalar_prefetch = 0 : i64, scratch_operands = 0 : i64, tpu.core_type = #tpu.core_type<tc>, window_params = [{transform_indices = @transform_0, window_bounds = array<i64: 8, 64>}, {pipeline_mode = #tpu.pipeline_mode<synchronous>, transform_indices = @transform_1, window_bounds = array<i64: 128, 64>}, {pipeline_mode = #tpu.pipeline_mode<synchronous>, transform_indices = @transform_2, window_bounds = array<i64: 1, 128>}, {transform_indices = @transform_3, window_bounds = array<i64: 8, 64>}, {pipeline_mode = #tpu.pipeline_mode<synchronous>, transform_indices = @transform_4, window_bounds = array<i64: 1, 128>}, {pipeline_mode = #tpu.pipeline_mode<synchronous>, transform_indices = @transform_5, window_bounds = array<i64: 1, 64>}]} {
    %c0 = arith.constant 0 : index
    %c0_0 = arith.constant 0 : index
    %0 = vector.load %arg1[%c0, %c0_0] : memref<8x64xf32, #tpu.memory_space<vmem>>, vector<8x64xf32>
    %c0_1 = arith.constant 0 : index
    %c0_2 = arith.constant 0 : index
    %1 = vector.load %arg2[%c0_1, %c0_2] : memref<128x64xf32, #tpu.memory_space<vmem>>, vector<128x64xf32>
    %c0_3 = arith.constant 0 : index
    %c0_4 = arith.constant 0 : index
    %2 = vector.load %arg3[%c0_3, %c0_4] : memref<1x128xf32, #tpu.memory_space<vmem>>, vector<1x128xf32>
    %cst = arith.constant dense<0.000000e+00> : vector<8x128xf32>
    %3 = tpu.matmul %0, %1, %cst {dimension_numbers = #tpu.dot_dimension_numbers<[1], [1], [0], [0], [0, 0, 1, 0], [], []>} : vector<8x64xf32>, vector<128x64xf32>, vector<8x128xf32> -> vector<8x128xf32>
    %cst_5 = arith.constant 2.000000e+00 : f32
    %4 = vector.broadcast %cst_5 : f32 to vector<8x128xf32>
    %5 = arith.mulf %4, %3 : vector<8x128xf32>
    %6 = vector.broadcast %2 : vector<1x128xf32> to vector<8x128xf32>
    %7 = arith.subf %6, %5 : vector<8x128xf32>
    %cst_6 = arith.constant dense<0x7F800000> : vector<8xf32>
    %8 = vector.multi_reduction <minimumf>, %7, %cst_6 [1] : vector<8x128xf32> to vector<8xf32>
    %9 = vector.shape_cast %8 : vector<8xf32> to vector<8x1xf32>
    %10 = tpu.iota {dimensions = array<i32: 1>} : vector<8x128xi32>
    %11 = vector.broadcast %9 : vector<8x1xf32> to vector<8x128xf32>
    %12 = arith.cmpf ole, %7, %11 : vector<8x128xf32>
    %c128_i32 = arith.constant 128 : i32
    %13 = vector.broadcast %c128_i32 : i32 to vector<8x128xi32>
    %14 = arith.select %12, %10, %13 : vector<8x128xi1>, vector<8x128xi32>
    %cst_7 = arith.constant dense<2147483647> : vector<8xi32>
    %15 = vector.multi_reduction <minsi>, %14, %cst_7 [1] : vector<8x128xi32> to vector<8xi32>
    %16 = vector.shape_cast %15 : vector<8xi32> to vector<8x1xi32>
    %17 = vector.broadcast %16 : vector<8x1xi32> to vector<8x128xi32>
    %18 = arith.cmpi eq, %10, %17 : vector<8x128xi32>
    %19 = arith.extui %18 : vector<8x128xi1> to vector<8x128xi32>
    %20 = arith.sitofp %19 : vector<8x128xi32> to vector<8x128xf32>
    %cst_8 = arith.constant dense<0.000000e+00> : vector<8x64xf32>
    %21 = tpu.matmul %20, %1, %cst_8 {dimension_numbers = #tpu.dot_dimension_numbers<[1], [0], [0], [1], [0, 0, 1, 1], [], []>} : vector<8x128xf32>, vector<128x64xf32>, vector<8x64xf32> -> vector<8x64xf32>
    %c0_9 = arith.constant 0 : index
    %c0_10 = arith.constant 0 : index
    %22 = vector.load %arg4[%c0_9, %c0_10] : memref<8x64xf32, #tpu.memory_space<vmem>>, vector<8x64xf32>
    tpu.vector_store %arg4[%c0_9, %c0_10], %21 {strides = array<i32>} : memref<8x64xf32, #tpu.memory_space<vmem>>, vector<8x64xf32>,
    %23 = arith.subf %0, %21 : vector<8x64xf32>
    %c0_i32 = arith.constant 0 : i32
    %24 = arith.cmpi eq, %arg0, %c0_i32 : i32
    %25 = arith.extui %24 : i1 to i32
    %c0_i32_11 = arith.constant 0 : i32
    %26 = arith.cmpi ne, %25, %c0_i32_11 : i32
    scf.if %26 {
      %cst_22 = arith.constant 0.000000e+00 : f32
      %38 = vector.broadcast %cst_22 : f32 to vector<1x128xf32>
      %c0_23 = arith.constant 0 : index
      %c0_24 = arith.constant 0 : index
      %39 = vector.load %arg5[%c0_23, %c0_24] : memref<1x128xf32, #tpu.memory_space<vmem>>, vector<1x128xf32>
      tpu.vector_store %arg5[%c0_23, %c0_24], %38 {strides = array<i32>} : memref<1x128xf32, #tpu.memory_space<vmem>>, vector<1x128xf32>,
      %cst_25 = arith.constant 0.000000e+00 : f32
      %40 = vector.broadcast %cst_25 : f32 to vector<1x64xf32>
      %c0_26 = arith.constant 0 : index
      %c0_27 = arith.constant 0 : index
      %41 = vector.load %arg6[%c0_26, %c0_27] : memref<1x64xf32, #tpu.memory_space<vmem>>, vector<1x64xf32>
      tpu.vector_store %arg6[%c0_26, %c0_27], %40 {strides = array<i32>} : memref<1x64xf32, #tpu.memory_space<vmem>>, vector<1x64xf32>,
    } else {
    }
    %c0_12 = arith.constant 0 : index
    %c0_13 = arith.constant 0 : index
    %27 = vector.load %arg5[%c0_12, %c0_13] : memref<1x128xf32, #tpu.memory_space<vmem>>, vector<1x128xf32>
    %cst_14 = arith.constant dense<0.000000e+00> : vector<128xf32>
    %28 = vector.multi_reduction <add>, %20, %cst_14 [0] : vector<8x128xf32> to vector<128xf32>
    %29 = vector.shape_cast %28 : vector<128xf32> to vector<1x128xf32>
    %30 = arith.addf %27, %29 : vector<1x128xf32>
    %c0_15 = arith.constant 0 : index
    %c0_16 = arith.constant 0 : index
    %31 = vector.load %arg5[%c0_15, %c0_16] : memref<1x128xf32, #tpu.memory_space<vmem>>, vector<1x128xf32>
    tpu.vector_store %arg5[%c0_15, %c0_16], %30 {strides = array<i32>} : memref<1x128xf32, #tpu.memory_space<vmem>>, vector<1x128xf32>,
    %c0_17 = arith.constant 0 : index
    %c0_18 = arith.constant 0 : index
    %32 = vector.load %arg6[%c0_17, %c0_18] : memref<1x64xf32, #tpu.memory_space<vmem>>, vector<1x64xf32>
    %33 = arith.mulf %23, %23 : vector<8x64xf32>
    %cst_19 = arith.constant dense<0.000000e+00> : vector<64xf32>
    %34 = vector.multi_reduction <add>, %33, %cst_19 [0] : vector<8x64xf32> to vector<64xf32>
    %35 = vector.shape_cast %34 : vector<64xf32> to vector<1x64xf32>
    %36 = arith.addf %32, %35 : vector<1x64xf32>
    %c0_20 = arith.constant 0 : index
    %c0_21 = arith.constant 0 : index
    %37 = vector.load %arg6[%c0_20, %c0_21] : memref<1x64xf32, #tpu.memory_space<vmem>>, vector<1x64xf32>
    tpu.vector_store %arg6[%c0_20, %c0_21], %36 {strides = array<i32>} : memref<1x64xf32, #tpu.memory_space<vmem>>, vector<1x64xf32>,
    return
  }
  func.func @transform_0(%arg0: i32) -> (i32, i32) {
    %c0_i32 = arith.constant 0 : i32
    %c0_i32_0 = arith.constant 0 : i32
    return %arg0, %c0_i32 : i32, i32
  }
  func.func @transform_1(%arg0: i32) -> (i32, i32) {
    %c0_i32 = arith.constant 0 : i32
    %c0_i32_0 = arith.constant 0 : i32
    %c0_i32_1 = arith.constant 0 : i32
    return %c0_i32, %c0_i32_0 : i32, i32
  }
  func.func @transform_2(%arg0: i32) -> (i32, i32) {
    %c0_i32 = arith.constant 0 : i32
    %c0_i32_0 = arith.constant 0 : i32
    %c0_i32_1 = arith.constant 0 : i32
    return %c0_i32, %c0_i32_0 : i32, i32
  }
  func.func @transform_3(%arg0: i32) -> (i32, i32) {
    %c0_i32 = arith.constant 0 : i32
    %c0_i32_0 = arith.constant 0 : i32
    return %arg0, %c0_i32 : i32, i32
  }
  func.func @transform_4(%arg0: i32) -> (i32, i32) {
    %c0_i32 = arith.constant 0 : i32
    %c0_i32_0 = arith.constant 0 : i32
    %c0_i32_1 = arith.constant 0 : i32
    return %c0_i32, %c0_i32_0 : i32, i32
  }
  func.func @transform_5(%arg0: i32) -> (i32, i32) {
    %c0_i32 = arith.constant 0 : i32
    %c0_i32_0 = arith.constant 0 : i32
    %c0_i32_1 = arith.constant 0 : i32
    return %c0_i32, %c0_i32_0 : i32, i32
  }
}

module attributes {stable_mosaic.version = 11 : i64} {
  func.func @_conv_mm_kernel(%arg0: i32, %arg1: memref<8x576xbf16, #tpu.memory_space<vmem>>, %arg2: memref<576x128xbf16, #tpu.memory_space<vmem>>, %arg3: memref<1x128xf32, #tpu.memory_space<vmem>>, %arg4: memref<1x128xf32, #tpu.memory_space<vmem>>, %arg5: memref<8x128xf32, #tpu.memory_space<vmem>>) attributes {dimension_semantics = [#tpu.dimension_semantics<parallel>], iteration_bounds = array<i64: 1>, scalar_prefetch = 0 : i64, scratch_operands = 0 : i64, tpu.core_type = #tpu.core_type<tc>, window_params = [{transform_indices = @transform_0, window_bounds = array<i64: 8, 576>}, {pipeline_mode = #tpu.pipeline_mode<synchronous>, transform_indices = @transform_1, window_bounds = array<i64: 576, 128>}, {pipeline_mode = #tpu.pipeline_mode<synchronous>, transform_indices = @transform_2, window_bounds = array<i64: 1, 128>}, {pipeline_mode = #tpu.pipeline_mode<synchronous>, transform_indices = @transform_3, window_bounds = array<i64: 1, 128>}, {transform_indices = @transform_4, window_bounds = array<i64: 8, 128>}]} {
    %c0 = arith.constant 0 : index
    %c0_0 = arith.constant 0 : index
    %0 = vector.load %arg1[%c0, %c0_0] : memref<8x576xbf16, #tpu.memory_space<vmem>>, vector<8x576xbf16>
    %c0_1 = arith.constant 0 : index
    %c0_2 = arith.constant 0 : index
    %1 = vector.load %arg2[%c0_1, %c0_2] : memref<576x128xbf16, #tpu.memory_space<vmem>>, vector<576x128xbf16>
    %cst = arith.constant dense<0.000000e+00> : vector<8x128xf32>
    %2 = tpu.matmul %0, %1, %cst {dimension_numbers = #tpu.dot_dimension_numbers<[1], [0], [0], [1], [0, 0, 1, 1], [], []>} : vector<8x576xbf16>, vector<576x128xbf16>, vector<8x128xf32> -> vector<8x128xf32>
    %c0_3 = arith.constant 0 : index
    %c0_4 = arith.constant 0 : index
    %3 = vector.load %arg3[%c0_3, %c0_4] : memref<1x128xf32, #tpu.memory_space<vmem>>, vector<1x128xf32>
    %4 = vector.broadcast %3 : vector<1x128xf32> to vector<8x128xf32>
    %5 = arith.mulf %2, %4 : vector<8x128xf32>
    %c0_5 = arith.constant 0 : index
    %c0_6 = arith.constant 0 : index
    %6 = vector.load %arg4[%c0_5, %c0_6] : memref<1x128xf32, #tpu.memory_space<vmem>>, vector<1x128xf32>
    %7 = vector.broadcast %6 : vector<1x128xf32> to vector<8x128xf32>
    %8 = arith.addf %5, %7 : vector<8x128xf32>
    %cst_7 = arith.constant 0.000000e+00 : f32
    %9 = vector.broadcast %cst_7 : f32 to vector<8x128xf32>
    %10 = arith.cmpf oge, %8, %9 : vector<8x128xf32>
    %cst_8 = arith.constant 2.000000e-01 : f32
    %11 = vector.broadcast %cst_8 : f32 to vector<8x128xf32>
    %12 = arith.mulf %11, %8 : vector<8x128xf32>
    %13 = arith.select %10, %8, %12 : vector<8x128xi1>, vector<8x128xf32>
    %c0_9 = arith.constant 0 : index
    %c0_10 = arith.constant 0 : index
    %14 = vector.load %arg5[%c0_9, %c0_10] : memref<8x128xf32, #tpu.memory_space<vmem>>, vector<8x128xf32>
    tpu.vector_store %arg5[%c0_9, %c0_10], %13 {strides = array<i32>} : memref<8x128xf32, #tpu.memory_space<vmem>>, vector<8x128xf32>,
    return
  }
  func.func @transform_0(%arg0: i32) -> (i32, i32) {
    %c0_i32 = arith.constant 0 : i32
    %c0_i32_0 = arith.constant 0 : i32
    return %arg0, %c0_i32 : i32, i32
  }
  func.func @transform_1(%arg0: i32) -> (i32, i32) {
    %c0_i32 = arith.constant 0 : i32
    %c0_i32_0 = arith.constant 0 : i32
    %c0_i32_1 = arith.constant 0 : i32
    return %c0_i32, %c0_i32_0 : i32, i32
  }
  func.func @transform_2(%arg0: i32) -> (i32, i32) {
    %c0_i32 = arith.constant 0 : i32
    %c0_i32_0 = arith.constant 0 : i32
    %c0_i32_1 = arith.constant 0 : i32
    return %c0_i32, %c0_i32_0 : i32, i32
  }
  func.func @transform_3(%arg0: i32) -> (i32, i32) {
    %c0_i32 = arith.constant 0 : i32
    %c0_i32_0 = arith.constant 0 : i32
    %c0_i32_1 = arith.constant 0 : i32
    return %c0_i32, %c0_i32_0 : i32, i32
  }
  func.func @transform_4(%arg0: i32) -> (i32, i32) {
    %c0_i32 = arith.constant 0 : i32
    %c0_i32_0 = arith.constant 0 : i32
    return %arg0, %c0_i32 : i32, i32
  }
}

module attributes {stable_mosaic.version = 11 : i64} {
  func.func @_conv_mm_kernel(%arg0: i32, %arg1: memref<8x256xbf16, #tpu.memory_space<vmem>>, %arg2: memref<256x256xbf16, #tpu.memory_space<vmem>>, %arg3: memref<1x256xf32, #tpu.memory_space<vmem>>, %arg4: memref<1x256xf32, #tpu.memory_space<vmem>>, %arg5: memref<8x256xf32, #tpu.memory_space<vmem>>) attributes {dimension_semantics = [#tpu.dimension_semantics<parallel>], iteration_bounds = array<i64: 1>, scalar_prefetch = 0 : i64, scratch_operands = 0 : i64, tpu.core_type = #tpu.core_type<tc>, window_params = [{transform_indices = @transform_0, window_bounds = array<i64: 8, 256>}, {pipeline_mode = #tpu.pipeline_mode<synchronous>, transform_indices = @transform_1, window_bounds = array<i64: 256, 256>}, {pipeline_mode = #tpu.pipeline_mode<synchronous>, transform_indices = @transform_2, window_bounds = array<i64: 1, 256>}, {pipeline_mode = #tpu.pipeline_mode<synchronous>, transform_indices = @transform_3, window_bounds = array<i64: 1, 256>}, {transform_indices = @transform_4, window_bounds = array<i64: 8, 256>}]} {
    %c0 = arith.constant 0 : index
    %c0_0 = arith.constant 0 : index
    %0 = vector.load %arg1[%c0, %c0_0] : memref<8x256xbf16, #tpu.memory_space<vmem>>, vector<8x256xbf16>
    %c0_1 = arith.constant 0 : index
    %c0_2 = arith.constant 0 : index
    %1 = vector.load %arg2[%c0_1, %c0_2] : memref<256x256xbf16, #tpu.memory_space<vmem>>, vector<256x256xbf16>
    %cst = arith.constant dense<0.000000e+00> : vector<8x256xf32>
    %2 = tpu.matmul %0, %1, %cst {dimension_numbers = #tpu.dot_dimension_numbers<[1], [0], [0], [1], [0, 0, 1, 1], [], []>} : vector<8x256xbf16>, vector<256x256xbf16>, vector<8x256xf32> -> vector<8x256xf32>
    %c0_3 = arith.constant 0 : index
    %c0_4 = arith.constant 0 : index
    %3 = vector.load %arg3[%c0_3, %c0_4] : memref<1x256xf32, #tpu.memory_space<vmem>>, vector<1x256xf32>
    %4 = vector.broadcast %3 : vector<1x256xf32> to vector<8x256xf32>
    %5 = arith.mulf %2, %4 : vector<8x256xf32>
    %c0_5 = arith.constant 0 : index
    %c0_6 = arith.constant 0 : index
    %6 = vector.load %arg4[%c0_5, %c0_6] : memref<1x256xf32, #tpu.memory_space<vmem>>, vector<1x256xf32>
    %7 = vector.broadcast %6 : vector<1x256xf32> to vector<8x256xf32>
    %8 = arith.addf %5, %7 : vector<8x256xf32>
    %cst_7 = arith.constant 0.000000e+00 : f32
    %9 = vector.broadcast %cst_7 : f32 to vector<8x256xf32>
    %10 = arith.cmpf oge, %8, %9 : vector<8x256xf32>
    %cst_8 = arith.constant 2.000000e-01 : f32
    %11 = vector.broadcast %cst_8 : f32 to vector<8x256xf32>
    %12 = arith.mulf %11, %8 : vector<8x256xf32>
    %13 = arith.select %10, %8, %12 : vector<8x256xi1>, vector<8x256xf32>
    %c0_9 = arith.constant 0 : index
    %c0_10 = arith.constant 0 : index
    %14 = vector.load %arg5[%c0_9, %c0_10] : memref<8x256xf32, #tpu.memory_space<vmem>>, vector<8x256xf32>
    tpu.vector_store %arg5[%c0_9, %c0_10], %13 {strides = array<i32>} : memref<8x256xf32, #tpu.memory_space<vmem>>, vector<8x256xf32>,
    return
  }
  func.func @transform_0(%arg0: i32) -> (i32, i32) {
    %c0_i32 = arith.constant 0 : i32
    %c0_i32_0 = arith.constant 0 : i32
    return %arg0, %c0_i32 : i32, i32
  }
  func.func @transform_1(%arg0: i32) -> (i32, i32) {
    %c0_i32 = arith.constant 0 : i32
    %c0_i32_0 = arith.constant 0 : i32
    %c0_i32_1 = arith.constant 0 : i32
    return %c0_i32, %c0_i32_0 : i32, i32
  }
  func.func @transform_2(%arg0: i32) -> (i32, i32) {
    %c0_i32 = arith.constant 0 : i32
    %c0_i32_0 = arith.constant 0 : i32
    %c0_i32_1 = arith.constant 0 : i32
    return %c0_i32, %c0_i32_0 : i32, i32
  }
  func.func @transform_3(%arg0: i32) -> (i32, i32) {
    %c0_i32 = arith.constant 0 : i32
    %c0_i32_0 = arith.constant 0 : i32
    %c0_i32_1 = arith.constant 0 : i32
    return %c0_i32, %c0_i32_0 : i32, i32
  }
  func.func @transform_4(%arg0: i32) -> (i32, i32) {
    %c0_i32 = arith.constant 0 : i32
    %c0_i32_0 = arith.constant 0 : i32
    return %arg0, %c0_i32 : i32, i32
  }
}

module attributes {stable_mosaic.version = 11 : i64} {
  func.func @_conv_mm_kernel(%arg0: i32, %arg1: memref<32x256xbf16, #tpu.memory_space<vmem>>, %arg2: memref<256x128xbf16, #tpu.memory_space<vmem>>, %arg3: memref<1x128xf32, #tpu.memory_space<vmem>>, %arg4: memref<1x128xf32, #tpu.memory_space<vmem>>, %arg5: memref<32x128xf32, #tpu.memory_space<vmem>>) attributes {dimension_semantics = [#tpu.dimension_semantics<parallel>], iteration_bounds = array<i64: 1>, scalar_prefetch = 0 : i64, scratch_operands = 0 : i64, tpu.core_type = #tpu.core_type<tc>, window_params = [{transform_indices = @transform_0, window_bounds = array<i64: 32, 256>}, {pipeline_mode = #tpu.pipeline_mode<synchronous>, transform_indices = @transform_1, window_bounds = array<i64: 256, 128>}, {pipeline_mode = #tpu.pipeline_mode<synchronous>, transform_indices = @transform_2, window_bounds = array<i64: 1, 128>}, {pipeline_mode = #tpu.pipeline_mode<synchronous>, transform_indices = @transform_3, window_bounds = array<i64: 1, 128>}, {transform_indices = @transform_4, window_bounds = array<i64: 32, 128>}]} {
    %c0 = arith.constant 0 : index
    %c0_0 = arith.constant 0 : index
    %0 = vector.load %arg1[%c0, %c0_0] : memref<32x256xbf16, #tpu.memory_space<vmem>>, vector<32x256xbf16>
    %c0_1 = arith.constant 0 : index
    %c0_2 = arith.constant 0 : index
    %1 = vector.load %arg2[%c0_1, %c0_2] : memref<256x128xbf16, #tpu.memory_space<vmem>>, vector<256x128xbf16>
    %cst = arith.constant dense<0.000000e+00> : vector<32x128xf32>
    %2 = tpu.matmul %0, %1, %cst {dimension_numbers = #tpu.dot_dimension_numbers<[1], [0], [0], [1], [0, 0, 1, 1], [], []>} : vector<32x256xbf16>, vector<256x128xbf16>, vector<32x128xf32> -> vector<32x128xf32>
    %c0_3 = arith.constant 0 : index
    %c0_4 = arith.constant 0 : index
    %3 = vector.load %arg3[%c0_3, %c0_4] : memref<1x128xf32, #tpu.memory_space<vmem>>, vector<1x128xf32>
    %4 = vector.broadcast %3 : vector<1x128xf32> to vector<32x128xf32>
    %5 = arith.mulf %2, %4 : vector<32x128xf32>
    %c0_5 = arith.constant 0 : index
    %c0_6 = arith.constant 0 : index
    %6 = vector.load %arg4[%c0_5, %c0_6] : memref<1x128xf32, #tpu.memory_space<vmem>>, vector<1x128xf32>
    %7 = vector.broadcast %6 : vector<1x128xf32> to vector<32x128xf32>
    %8 = arith.addf %5, %7 : vector<32x128xf32>
    %cst_7 = arith.constant 0.000000e+00 : f32
    %9 = vector.broadcast %cst_7 : f32 to vector<32x128xf32>
    %10 = arith.cmpf oge, %8, %9 : vector<32x128xf32>
    %cst_8 = arith.constant 2.000000e-01 : f32
    %11 = vector.broadcast %cst_8 : f32 to vector<32x128xf32>
    %12 = arith.mulf %11, %8 : vector<32x128xf32>
    %13 = arith.select %10, %8, %12 : vector<32x128xi1>, vector<32x128xf32>
    %c0_9 = arith.constant 0 : index
    %c0_10 = arith.constant 0 : index
    %14 = vector.load %arg5[%c0_9, %c0_10] : memref<32x128xf32, #tpu.memory_space<vmem>>, vector<32x128xf32>
    tpu.vector_store %arg5[%c0_9, %c0_10], %13 {strides = array<i32>} : memref<32x128xf32, #tpu.memory_space<vmem>>, vector<32x128xf32>,
    return
  }
  func.func @transform_0(%arg0: i32) -> (i32, i32) {
    %c0_i32 = arith.constant 0 : i32
    %c0_i32_0 = arith.constant 0 : i32
    return %arg0, %c0_i32 : i32, i32
  }
  func.func @transform_1(%arg0: i32) -> (i32, i32) {
    %c0_i32 = arith.constant 0 : i32
    %c0_i32_0 = arith.constant 0 : i32
    %c0_i32_1 = arith.constant 0 : i32
    return %c0_i32, %c0_i32_0 : i32, i32
  }
  func.func @transform_2(%arg0: i32) -> (i32, i32) {
    %c0_i32 = arith.constant 0 : i32
    %c0_i32_0 = arith.constant 0 : i32
    %c0_i32_1 = arith.constant 0 : i32
    return %c0_i32, %c0_i32_0 : i32, i32
  }
  func.func @transform_3(%arg0: i32) -> (i32, i32) {
    %c0_i32 = arith.constant 0 : i32
    %c0_i32_0 = arith.constant 0 : i32
    %c0_i32_1 = arith.constant 0 : i32
    return %c0_i32, %c0_i32_0 : i32, i32
  }
  func.func @transform_4(%arg0: i32) -> (i32, i32) {
    %c0_i32 = arith.constant 0 : i32
    %c0_i32_0 = arith.constant 0 : i32
    return %arg0, %c0_i32 : i32, i32
  }
}

module attributes {stable_mosaic.version = 11 : i64} {
  func.func @_conv_mm_kernel(%arg0: i32, %arg1: memref<128x128xbf16, #tpu.memory_space<vmem>>, %arg2: memref<128x128xbf16, #tpu.memory_space<vmem>>, %arg3: memref<1x128xf32, #tpu.memory_space<vmem>>, %arg4: memref<1x128xf32, #tpu.memory_space<vmem>>, %arg5: memref<128x128xf32, #tpu.memory_space<vmem>>) attributes {dimension_semantics = [#tpu.dimension_semantics<parallel>], iteration_bounds = array<i64: 1>, scalar_prefetch = 0 : i64, scratch_operands = 0 : i64, tpu.core_type = #tpu.core_type<tc>, window_params = [{transform_indices = @transform_0, window_bounds = array<i64: 128, 128>}, {pipeline_mode = #tpu.pipeline_mode<synchronous>, transform_indices = @transform_1, window_bounds = array<i64: 128, 128>}, {pipeline_mode = #tpu.pipeline_mode<synchronous>, transform_indices = @transform_2, window_bounds = array<i64: 1, 128>}, {pipeline_mode = #tpu.pipeline_mode<synchronous>, transform_indices = @transform_3, window_bounds = array<i64: 1, 128>}, {transform_indices = @transform_4, window_bounds = array<i64: 128, 128>}]} {
    %c0 = arith.constant 0 : index
    %c0_0 = arith.constant 0 : index
    %0 = vector.load %arg1[%c0, %c0_0] : memref<128x128xbf16, #tpu.memory_space<vmem>>, vector<128x128xbf16>
    %c0_1 = arith.constant 0 : index
    %c0_2 = arith.constant 0 : index
    %1 = vector.load %arg2[%c0_1, %c0_2] : memref<128x128xbf16, #tpu.memory_space<vmem>>, vector<128x128xbf16>
    %cst = arith.constant dense<0.000000e+00> : vector<128x128xf32>
    %2 = tpu.matmul %0, %1, %cst {dimension_numbers = #tpu.dot_dimension_numbers<[1], [0], [0], [1], [0, 0, 1, 1], [], []>} : vector<128x128xbf16>, vector<128x128xbf16>, vector<128x128xf32> -> vector<128x128xf32>
    %c0_3 = arith.constant 0 : index
    %c0_4 = arith.constant 0 : index
    %3 = vector.load %arg3[%c0_3, %c0_4] : memref<1x128xf32, #tpu.memory_space<vmem>>, vector<1x128xf32>
    %4 = vector.broadcast %3 : vector<1x128xf32> to vector<128x128xf32>
    %5 = arith.mulf %2, %4 : vector<128x128xf32>
    %c0_5 = arith.constant 0 : index
    %c0_6 = arith.constant 0 : index
    %6 = vector.load %arg4[%c0_5, %c0_6] : memref<1x128xf32, #tpu.memory_space<vmem>>, vector<1x128xf32>
    %7 = vector.broadcast %6 : vector<1x128xf32> to vector<128x128xf32>
    %8 = arith.addf %5, %7 : vector<128x128xf32>
    %cst_7 = arith.constant 0.000000e+00 : f32
    %9 = vector.broadcast %cst_7 : f32 to vector<128x128xf32>
    %10 = arith.cmpf oge, %8, %9 : vector<128x128xf32>
    %cst_8 = arith.constant 2.000000e-01 : f32
    %11 = vector.broadcast %cst_8 : f32 to vector<128x128xf32>
    %12 = arith.mulf %11, %8 : vector<128x128xf32>
    %13 = arith.select %10, %8, %12 : vector<128x128xi1>, vector<128x128xf32>
    %c0_9 = arith.constant 0 : index
    %c0_10 = arith.constant 0 : index
    %14 = vector.load %arg5[%c0_9, %c0_10] : memref<128x128xf32, #tpu.memory_space<vmem>>, vector<128x128xf32>
    tpu.vector_store %arg5[%c0_9, %c0_10], %13 {strides = array<i32>} : memref<128x128xf32, #tpu.memory_space<vmem>>, vector<128x128xf32>,
    return
  }
  func.func @transform_0(%arg0: i32) -> (i32, i32) {
    %c0_i32 = arith.constant 0 : i32
    %c0_i32_0 = arith.constant 0 : i32
    return %arg0, %c0_i32 : i32, i32
  }
  func.func @transform_1(%arg0: i32) -> (i32, i32) {
    %c0_i32 = arith.constant 0 : i32
    %c0_i32_0 = arith.constant 0 : i32
    %c0_i32_1 = arith.constant 0 : i32
    return %c0_i32, %c0_i32_0 : i32, i32
  }
  func.func @transform_2(%arg0: i32) -> (i32, i32) {
    %c0_i32 = arith.constant 0 : i32
    %c0_i32_0 = arith.constant 0 : i32
    %c0_i32_1 = arith.constant 0 : i32
    return %c0_i32, %c0_i32_0 : i32, i32
  }
  func.func @transform_3(%arg0: i32) -> (i32, i32) {
    %c0_i32 = arith.constant 0 : i32
    %c0_i32_0 = arith.constant 0 : i32
    %c0_i32_1 = arith.constant 0 : i32
    return %c0_i32, %c0_i32_0 : i32, i32
  }
  func.func @transform_4(%arg0: i32) -> (i32, i32) {
    %c0_i32 = arith.constant 0 : i32
    %c0_i32_0 = arith.constant 0 : i32
    return %arg0, %c0_i32 : i32, i32
  }
}

module attributes {stable_mosaic.version = 11 : i64} {
  func.func @_conv_mm_mse_kernel(%arg0: i32, %arg1: memref<512x64xbf16, #tpu.memory_space<vmem>>, %arg2: memref<64x128xbf16, #tpu.memory_space<vmem>>, %arg3: memref<1x128xf32, #tpu.memory_space<vmem>>, %arg4: memref<1x128xf32, #tpu.memory_space<vmem>>, %arg5: memref<512x128xf32, #tpu.memory_space<vmem>>, %arg6: memref<512x128xf32, #tpu.memory_space<vmem>>, %arg7: memref<1x128xf32, #tpu.memory_space<vmem>>) attributes {dimension_semantics = [#tpu.dimension_semantics<arbitrary>], iteration_bounds = array<i64: 1>, scalar_prefetch = 0 : i64, scratch_operands = 0 : i64, tpu.core_type = #tpu.core_type<tc>, window_params = [{transform_indices = @transform_0, window_bounds = array<i64: 512, 64>}, {pipeline_mode = #tpu.pipeline_mode<synchronous>, transform_indices = @transform_1, window_bounds = array<i64: 64, 128>}, {pipeline_mode = #tpu.pipeline_mode<synchronous>, transform_indices = @transform_2, window_bounds = array<i64: 1, 128>}, {pipeline_mode = #tpu.pipeline_mode<synchronous>, transform_indices = @transform_3, window_bounds = array<i64: 1, 128>}, {transform_indices = @transform_4, window_bounds = array<i64: 512, 128>}, {transform_indices = @transform_5, window_bounds = array<i64: 512, 128>}, {pipeline_mode = #tpu.pipeline_mode<synchronous>, transform_indices = @transform_6, window_bounds = array<i64: 1, 128>}]} {
    %c0 = arith.constant 0 : index
    %c0_0 = arith.constant 0 : index
    %0 = vector.load %arg1[%c0, %c0_0] : memref<512x64xbf16, #tpu.memory_space<vmem>>, vector<512x64xbf16>
    %c0_1 = arith.constant 0 : index
    %c0_2 = arith.constant 0 : index
    %1 = vector.load %arg2[%c0_1, %c0_2] : memref<64x128xbf16, #tpu.memory_space<vmem>>, vector<64x128xbf16>
    %cst = arith.constant dense<0.000000e+00> : vector<512x128xf32>
    %2 = tpu.matmul %0, %1, %cst {dimension_numbers = #tpu.dot_dimension_numbers<[1], [0], [0], [1], [0, 0, 1, 1], [], []>} : vector<512x64xbf16>, vector<64x128xbf16>, vector<512x128xf32> -> vector<512x128xf32>
    %c0_3 = arith.constant 0 : index
    %c0_4 = arith.constant 0 : index
    %3 = vector.load %arg3[%c0_3, %c0_4] : memref<1x128xf32, #tpu.memory_space<vmem>>, vector<1x128xf32>
    %4 = vector.broadcast %3 : vector<1x128xf32> to vector<512x128xf32>
    %5 = arith.mulf %2, %4 : vector<512x128xf32>
    %c0_5 = arith.constant 0 : index
    %c0_6 = arith.constant 0 : index
    %6 = vector.load %arg4[%c0_5, %c0_6] : memref<1x128xf32, #tpu.memory_space<vmem>>, vector<1x128xf32>
    %7 = vector.broadcast %6 : vector<1x128xf32> to vector<512x128xf32>
    %8 = arith.addf %5, %7 : vector<512x128xf32>
    %c0_7 = arith.constant 0 : index
    %c0_8 = arith.constant 0 : index
    %9 = vector.load %arg6[%c0_7, %c0_8] : memref<512x128xf32, #tpu.memory_space<vmem>>, vector<512x128xf32>
    tpu.vector_store %arg6[%c0_7, %c0_8], %8 {strides = array<i32>} : memref<512x128xf32, #tpu.memory_space<vmem>>, vector<512x128xf32>,
    %c0_9 = arith.constant 0 : index
    %c0_10 = arith.constant 0 : index
    %10 = vector.load %arg5[%c0_9, %c0_10] : memref<512x128xf32, #tpu.memory_space<vmem>>, vector<512x128xf32>
    %11 = arith.subf %8, %10 : vector<512x128xf32>
    %c0_i32 = arith.constant 0 : i32
    %12 = arith.cmpi eq, %arg0, %c0_i32 : i32
    %13 = arith.extui %12 : i1 to i32
    %c0_i32_11 = arith.constant 0 : i32
    %14 = arith.cmpi ne, %13, %c0_i32_11 : i32
    scf.if %14 {
      %cst_17 = arith.constant 0.000000e+00 : f32
      %21 = vector.broadcast %cst_17 : f32 to vector<1x128xf32>
      %c0_18 = arith.constant 0 : index
      %c0_19 = arith.constant 0 : index
      %22 = vector.load %arg7[%c0_18, %c0_19] : memref<1x128xf32, #tpu.memory_space<vmem>>, vector<1x128xf32>
      tpu.vector_store %arg7[%c0_18, %c0_19], %21 {strides = array<i32>} : memref<1x128xf32, #tpu.memory_space<vmem>>, vector<1x128xf32>,
    } else {
    }
    %c0_12 = arith.constant 0 : index
    %c0_13 = arith.constant 0 : index
    %15 = vector.load %arg7[%c0_12, %c0_13] : memref<1x128xf32, #tpu.memory_space<vmem>>, vector<1x128xf32>
    %16 = arith.mulf %11, %11 : vector<512x128xf32>
    %cst_14 = arith.constant dense<0.000000e+00> : vector<128xf32>
    %17 = vector.multi_reduction <add>, %16, %cst_14 [0] : vector<512x128xf32> to vector<128xf32>
    %18 = vector.shape_cast %17 : vector<128xf32> to vector<1x128xf32>
    %19 = arith.addf %15, %18 : vector<1x128xf32>
    %c0_15 = arith.constant 0 : index
    %c0_16 = arith.constant 0 : index
    %20 = vector.load %arg7[%c0_15, %c0_16] : memref<1x128xf32, #tpu.memory_space<vmem>>, vector<1x128xf32>
    tpu.vector_store %arg7[%c0_15, %c0_16], %19 {strides = array<i32>} : memref<1x128xf32, #tpu.memory_space<vmem>>, vector<1x128xf32>,
    return
  }
  func.func @transform_0(%arg0: i32) -> (i32, i32) {
    %c0_i32 = arith.constant 0 : i32
    %c0_i32_0 = arith.constant 0 : i32
    return %arg0, %c0_i32 : i32, i32
  }
  func.func @transform_1(%arg0: i32) -> (i32, i32) {
    %c0_i32 = arith.constant 0 : i32
    %c0_i32_0 = arith.constant 0 : i32
    %c0_i32_1 = arith.constant 0 : i32
    return %c0_i32, %c0_i32_0 : i32, i32
  }
  func.func @transform_2(%arg0: i32) -> (i32, i32) {
    %c0_i32 = arith.constant 0 : i32
    %c0_i32_0 = arith.constant 0 : i32
    %c0_i32_1 = arith.constant 0 : i32
    return %c0_i32, %c0_i32_0 : i32, i32
  }
  func.func @transform_3(%arg0: i32) -> (i32, i32) {
    %c0_i32 = arith.constant 0 : i32
    %c0_i32_0 = arith.constant 0 : i32
    %c0_i32_1 = arith.constant 0 : i32
    return %c0_i32, %c0_i32_0 : i32, i32
  }
  func.func @transform_4(%arg0: i32) -> (i32, i32) {
    %c0_i32 = arith.constant 0 : i32
    %c0_i32_0 = arith.constant 0 : i32
    return %arg0, %c0_i32 : i32, i32
  }
  func.func @transform_5(%arg0: i32) -> (i32, i32) {
    %c0_i32 = arith.constant 0 : i32
    %c0_i32_0 = arith.constant 0 : i32
    return %arg0, %c0_i32 : i32, i32
  }
  func.func @transform_6(%arg0: i32) -> (i32, i32) {
    %c0_i32 = arith.constant 0 : i32
    %c0_i32_0 = arith.constant 0 : i32
    %c0_i32_1 = arith.constant 0 : i32
    return %c0_i32, %c0_i32_0 : i32, i32
  }
}

</mosaic_0001>

<bundles_post_ra>
// kernel: div.6
= control target key start
LH: loop header
LB: loop body
LE: loop exit
PB: predicated region body
PF: predicated region fallthrough
CT: control target
= control target key end

     0   :  { %s20_s0 = inlined_call_operand.<no memory space> [shape: f32[], index: 0, kind: input, shape index: {}]   ;;  %s21_s1 = inlined_call_operand.vmem [shape: f32[32], index: 1, kind: output, shape index: {}]  }
   0x1   :  { %v2_v0 = vstv %s20_s0 }
   0x2   :  { %3 = vst [vmem:[%s21_s1] sm:$0x1] %v2_v0 }

// kernel: _lambda_.9
= control target key start
LH: loop header
LB: loop body
LE: loop exit
PB: predicated region body
PF: predicated region fallthrough
CT: control target
= control target key end

     0   :  { %vm258_vm0 = vcmask 261120   ;;  %s1764_s1 = inlined_call_operand.vmem [shape: bf16[32,128], index: 1, kind: input, shape index: {}]   ;;  %s1765_s0 = inlined_call_operand.vmem [shape: bf16[512,32], index: 0, kind: input, shape index: {}]   ;;  %s1766_s2 = inlined_call_operand.vmem [shape: f32[1,128], index: 2, kind: input, shape index: {}]   ;;  %s1767_s3 = inlined_call_operand.vmem [shape: f32[1,128], index: 3, kind: input, shape index: {}]   ;;  %s1768_s4 = inlined_call_operand.vmem [shape: f32[512,128], index: 4, kind: output, shape index: {}]  }
   0x1   :  { %v1220_v0 = vld [vmem:[%s1764_s1 + $0x8] sm:$0xff]   ;;  %v1221_v1 = vld [vmem:[%s1764_s1] sm:$0xff]   ;;  %v1226_v6 = vld [vmem:[%s1765_s0 + $0x10] sm:$0xff]  }
   0x2   :  { %1148 = vmatprep.subr.bf16.mxu0 %v1220_v0  ;;  %1216 = vmatprep.subr.bf16.mxu1 %v1220_v0  ;;  %v1222_v2 = vld [vmem:[%s1765_s0] sm:$0xff]   ;;  %v1224_v4 = vld [vmem:[%s1765_s0 + $0x8] sm:$0xff]   ;;  %v1227_v7 = vld [vmem:[%s1765_s0 + $0x90] sm:$0xff]  }
   0x3   :  { %1149 = vmatpush3.bf16.msra.mxu0 %v1220_v0  ;;  %1218 = vmatpush3.bf16.msra.mxu1 %v1220_v0  ;;  %v1223_v3 = vld [vmem:[%s1765_s0 + $0x80] sm:$0xff]   ;;  %v1225_v5 = vld [vmem:[%s1765_s0 + $0x88] sm:$0xff]   ;;  %v1228_v8 = vld [vmem:[%s1765_s0 + $0x18] sm:$0xff]  }
   0x4   :  { %1150 = vmatprep.subr.bf16.mxu0 %v1221_v1  ;;  %1217 = vmatprep.subr.bf16.mxu1 %v1221_v1  ;;  %v1229_v9 = vld [vmem:[%s1765_s0 + $0x98] sm:$0xff]   ;;  %v1230_v10 = vld [vmem:[%s1765_s0 + $0x20] sm:$0xff]   ;;  %v1232_v12 = vld [vmem:[%s1765_s0 + $0x28] sm:$0xff]  }
   0x5   :  { %1152 = vmatprep.mubr.msk.bf16.mxu0 %vm258_vm0, %v1222_v2  ;;  %1184 = vmatprep.mubr.msk.bf16.mxu1 %vm258_vm0, %v1223_v3  ;;  %v1231_v11 = vld [vmem:[%s1765_s0 + $0xa0] sm:$0xff]   ;;  %v1233_v13 = vld [vmem:[%s1765_s0 + $0xa8] sm:$0xff]   ;;  %v1234_v14 = vld [vmem:[%s1765_s0 + $0x30] sm:$0xff]  }
   0x6   :  { %v1235_v15 = vld [vmem:[%s1765_s0 + $0xb0] sm:$0xff]   ;;  %v1236_v16 = vld [vmem:[%s1765_s0 + $0x38] sm:$0xff]   ;;  %v1238_v18 = vld [vmem:[%s1765_s0 + $0x40] sm:$0xff]  }
   0x7   :  { %1151 = vmatpush3.bf16.msra.mxu0 %v1221_v1  ;;  %1219 = vmatpush3.bf16.msra.mxu1 %v1221_v1  ;;  %v1237_v17 = vld [vmem:[%s1765_s0 + $0xb8] sm:$0xff]   ;;  %v1239_v19 = vld [vmem:[%s1765_s0 + $0xc0] sm:$0xff]   ;;  %v1240_v20 = vld [vmem:[%s1765_s0 + $0x48] sm:$0xff]  }
   0x8   :  { %v1241_v21 = vld [vmem:[%s1765_s0 + $0xc8] sm:$0xff]   ;;  %v1242_v22 = vld [vmem:[%s1765_s0 + $0x50] sm:$0xff]   ;;  %v1244_v24 = vld [vmem:[%s1765_s0 + $0x58] sm:$0xff]  }
   0x9   :  { %v1243_v23 = vld [vmem:[%s1765_s0 + $0xd0] sm:$0xff]   ;;  %v1245_v25 = vld [vmem:[%s1765_s0 + $0xd8] sm:$0xff]   ;;  %v1246_v26 = vld [vmem:[%s1765_s0 + $0x60] sm:$0xff]  }
   0xa   :  { %1153 = vmatmul.mubr.msk.bf16.vlgmr.msra.gmra.mxu0 %vm258_vm0, %v1224_v4  ;;  %1185 = vmatmul.mubr.msk.bf16.vlgmr.msra.gmra.mxu1 %vm258_vm0, %v1225_v5  ;;  %v1247_v27 = vld [vmem:[%s1765_s0 + $0xe0] sm:$0xff]   ;;  %v1248_v28 = vld [vmem:[%s1765_s0 + $0x68] sm:$0xff]   ;;  %v1250_v30 = vld [vmem:[%s1765_s0 + $0x70] sm:$0xff]  }
   0xb   :  { %1156 = vmatprep.mubr.msk.bf16.mxu0 %vm258_vm0, %v1226_v6  ;;  %1188 = vmatprep.mubr.msk.bf16.mxu1 %vm258_vm0, %v1227_v7  ;;  %v1249_v29 = vld [vmem:[%s1765_s0 + $0xe8] sm:$0xff]   ;;  %v1251_v31 = vld [vmem:[%s1765_s0 + $0xf0] sm:$0xff]   ;;  %v1252_v32 = vld [vmem:[%s1765_s0 + $0x78] sm:$0xff]  }
   0xc   :  { %v1253_v33 = vld [vmem:[%s1765_s0 + $0xf8] sm:$0xff]   ;;  %v1416_v34 = vld [vmem:[%s1766_s2] ss:$0 sm:$0xff] }
   0xd   :  { %v1421_v36 = vld [vmem:[%s1767_s3] ss:$0 sm:$0xff] }
  0x12   :  { %1157 = vmatmul.mubr.msk.bf16.gmra.mxu0 %vm258_vm0, %v1228_v8  ;;  %1189 = vmatmul.mubr.msk.bf16.gmra.mxu1 %vm258_vm0, %v1229_v9 }
  0x13   :  { %1160 = vmatprep.mubr.msk.bf16.mxu0 %vm258_vm0, %v1230_v10  ;;  %1192 = vmatprep.mubr.msk.bf16.mxu1 %vm258_vm0, %v1231_v11 }
  0x1a   :  { %1161 = vmatmul.mubr.msk.bf16.gmra.mxu0 %vm258_vm0, %v1232_v12  ;;  %1193 = vmatmul.mubr.msk.bf16.gmra.mxu1 %vm258_vm0, %v1233_v13 }
  0x1b   :  { %1164 = vmatprep.mubr.msk.bf16.mxu0 %vm258_vm0, %v1234_v14  ;;  %1196 = vmatprep.mubr.msk.bf16.mxu1 %vm258_vm0, %v1235_v15 }
  0x22   :  { %1165 = vmatmul.mubr.msk.bf16.gmra.mxu0 %vm258_vm0, %v1236_v16  ;;  %1197 = vmatmul.mubr.msk.bf16.gmra.mxu1 %vm258_vm0, %v1237_v17 }
  0x23   :  { %1168 = vmatprep.mubr.msk.bf16.mxu0 %vm258_vm0, %v1238_v18  ;;  %1200 = vmatprep.mubr.msk.bf16.mxu1 %vm258_vm0, %v1239_v19 }
  0x2a   :  { %1169 = vmatmul.mubr.msk.bf16.gmra.mxu0 %vm258_vm0, %v1240_v20  ;;  %1201 = vmatmul.mubr.msk.bf16.gmra.mxu1 %vm258_vm0, %v1241_v21 }
  0x2b   :  { %1172 = vmatprep.mubr.msk.bf16.mxu0 %vm258_vm0, %v1242_v22  ;;  %1204 = vmatprep.mubr.msk.bf16.mxu1 %vm258_vm0, %v1243_v23 }
  0x32   :  { %1173 = vmatmul.mubr.msk.bf16.gmra.mxu0 %vm258_vm0, %v1244_v24  ;;  %1205 = vmatmul.mubr.msk.bf16.gmra.mxu1 %vm258_vm0, %v1245_v25 }
  0x33   :  { %1176 = vmatprep.mubr.msk.bf16.mxu0 %vm258_vm0, %v1246_v26  ;;  %1208 = vmatprep.mubr.msk.bf16.mxu1 %vm258_vm0, %v1247_v27 }
  0x3a   :  { %1177 = vmatmul.mubr.msk.bf16.gmra.mxu0 %vm258_vm0, %v1248_v28  ;;  %1209 = vmatmul.mubr.msk.bf16.gmra.mxu1 %vm258_vm0, %v1249_v29 }
  0x3b   :  { %1180 = vmatprep.mubr.msk.bf16.mxu0 %vm258_vm0, %v1250_v30  ;;  %1212 = vmatprep.mubr.msk.bf16.mxu1 %vm258_vm0, %v1251_v31 }
  0x42   :  { %1181 = vmatmul.mubr.msk.bf16.gmra.mxu0 %vm258_vm0, %v1252_v32  ;;  %1213 = vmatmul.mubr.msk.bf16.gmra.mxu1 %vm258_vm0, %v1253_v33 }
  0xca   :  { %v1154_v35 = vpop.f32.mrf.mxu0  ;;  %v1186_v37 = vpop.f32.mrf.mxu1 }
  0xcb   :  { %v653_v38 = vmul.f32 %v1154_v35, %v1416_v34  ;;  %v685_v39 = vmul.f32 %v1186_v37, %v1416_v34 }
  0xcc   :  { %v389_v40 = vpop.f32.mrf.mxu0  ;;  %v517_v41 = vpop.f32.mrf.mxu1 }
  0xcd   :  { %v724_v42 = vadd.f32 %v1421_v36, %v653_v38  ;;  %v756_v43 = vadd.f32 %v1421_v36, %v685_v39  ;;  %v651_v44 = vmul.f32 %v1416_v34, %v389_v40  ;;  %v683_v45 = vmul.f32 %v1416_v34, %v517_v41 }
  0xce   :  { %v1155_v46 = vpop.f32.mrf.mxu0  ;;  %v1187_v47 = vpop.f32.mrf.mxu1 }
  0xcf   :  { %vm788_vm1 = vcmp.ge.f32.partialorder %v724_v42, 0.0  ;;  %v852_v48 = vmul.f32 0.2, %v724_v42  ;;  %vm820_vm2 = vcmp.ge.f32.partialorder %v756_v43, 0.0  ;;  %v884_v49 = vmul.f32 0.2, %v756_v43 }
  0xd0   :  { %v722_v50 = vadd.f32 %v1421_v36, %v651_v44  ;;  %v754_v51 = vadd.f32 %v1421_v36, %v683_v45  ;;  %v654_v52 = vmul.f32 %v1155_v46, %v1416_v34  ;;  %v686_v53 = vmul.f32 %v1187_v47, %v1416_v34  ;;  %v392_v54 = vpop.f32.mrf.mxu0  ;;  %v520_v55 = vpop.f32.mrf.mxu1 }
  0xd1   :  { %v916_v56 = vsel %vm788_vm1, %v724_v42, %v852_v48  ;;  %v948_v57 = vsel %vm820_vm2, %v756_v43, %v884_v49  ;;  %v652_v58 = vmul.f32 %v1416_v34, %v392_v54  ;;  %v684_v59 = vmul.f32 %v1416_v34, %v520_v55 }
  0xd2   :  { %980 = vst [vmem:[%s1768_s4 + $0x10] sm:$0xff] %v916_v56  ;;  %1012 = vst [vmem:[%s1768_s4 + $0x110] sm:$0xff] %v948_v57  ;;  %vm786_vm3 = vcmp.ge.f32.partialorder %v722_v50, 0.0  ;;  %v850_v60 = vmul.f32 0.2, %v722_v50  ;;  %vm818_vm4 = vcmp.ge.f32.partialorder %v754_v51, 0.0  ;;  %v1158_v62 = vpop.f32.mrf.mxu0  ;;  %v1190_v63 = vpop.f32.mrf.mxu1  ;;  %v725_v0 = vadd.f32 %v1421_v36, %v654_v52 }
  0xd3   :  { %v882_v61 = vmul.f32 0.2, %v754_v51  ;;  %v757_v1 = vadd.f32 %v1421_v36, %v686_v53  ;;  %v723_v2 = vadd.f32 %v1421_v36, %v652_v58  ;;  %v755_v3 = vadd.f32 %v1421_v36, %v684_v59 }
  0xd4   :  { %v914_v4 = vsel %vm786_vm3, %v722_v50, %v850_v60  ;;  %v657_v6 = vmul.f32 %v1158_v62, %v1416_v34  ;;  %v689_v7 = vmul.f32 %v1190_v63, %v1416_v34  ;;  %v405_v8 = vpop.f32.mrf.mxu0  ;;  %v533_v9 = vpop.f32.mrf.mxu1  ;;  %vm789_vm5 = vcmp.ge.f32.partialorder %v725_v0, 0.0 }
  0xd5   :  { %v946_v5 = vsel %vm818_vm4, %v754_v51, %v882_v61  ;;  %978 = vst [vmem:[%s1768_s4] sm:$0xff] %v914_v4  ;;  %v853_v10 = vmul.f32 0.2, %v725_v0  ;;  %vm821_vm6 = vcmp.ge.f32.partialorder %v757_v1, 0.0  ;;  %v885_v11 = vmul.f32 0.2, %v757_v1 }
  0xd6   :  { %1010 = vst [vmem:[%s1768_s4 + $0x100] sm:$0xff] %v946_v5  ;;  %vm787_vm7 = vcmp.ge.f32.partialorder %v723_v2, 0.0  ;;  %v851_v12 = vmul.f32 0.2, %v723_v2  ;;  %vm819_vm8 = vcmp.ge.f32.partialorder %v755_v3, 0.0  ;;  %v1159_v14 = vpop.f32.mrf.mxu0  ;;  %v1191_v15 = vpop.f32.mrf.mxu1  ;;  %v728_v18 = vadd.f32 %v1421_v36, %v657_v6 }
  0xd7   :  { %v883_v13 = vmul.f32 0.2, %v755_v3  ;;  %v917_v16 = vsel %vm789_vm5, %v725_v0, %v853_v10  ;;  %v949_v17 = vsel %vm821_vm6, %v757_v1, %v885_v11  ;;  %v760_v19 = vadd.f32 %v1421_v36, %v689_v7 }
  0xd8   :  { %981 = vst [vmem:[%s1768_s4 + $0x18] sm:$0xff] %v917_v16  ;;  %1013 = vst [vmem:[%s1768_s4 + $0x118] sm:$0xff] %v949_v17  ;;  %v915_v20 = vsel %vm787_vm7, %v723_v2, %v851_v12  ;;  %v655_v22 = vmul.f32 %v1416_v34, %v405_v8  ;;  %v687_v23 = vmul.f32 %v1416_v34, %v533_v9  ;;  %v408_v24 = vpop.f32.mrf.mxu0  ;;  %v536_v25 = vpop.f32.mrf.mxu1  ;;  %vm792_vm9 = vcmp.ge.f32.partialorder %v728_v18, 0.0 }
  0xd9   :  { %v947_v21 = vsel %vm819_vm8, %v755_v3, %v883_v13  ;;  %979 = vst [vmem:[%s1768_s4 + $0x8] sm:$0xff] %v915_v20  ;;  %v856_v26 = vmul.f32 0.2, %v728_v18  ;;  %vm824_vm10 = vcmp.ge.f32.partialorder %v760_v19, 0.0  ;;  %v888_v27 = vmul.f32 0.2, %v760_v19 }
  0xda   :  { %1011 = vst [vmem:[%s1768_s4 + $0x108] sm:$0xff] %v947_v21  ;;  %v726_v28 = vadd.f32 %v1421_v36, %v655_v22  ;;  %v758_v29 = vadd.f32 %v1421_v36, %v687_v23  ;;  %v658_v30 = vmul.f32 %v1159_v14, %v1416_v34  ;;  %v690_v31 = vmul.f32 %v1191_v15, %v1416_v34  ;;  %v1162_v32 = vpop.f32.mrf.mxu0  ;;  %v1194_v33 = vpop.f32.mrf.mxu1 }
  0xdb   :  { %v920_v35 = vsel %vm792_vm9, %v728_v18, %v856_v26  ;;  %v952_v37 = vsel %vm824_vm10, %v760_v19, %v888_v27  ;;  %v656_v38 = vmul.f32 %v1416_v34, %v408_v24  ;;  %v688_v39 = vmul.f32 %v1416_v34, %v536_v25 }
  0xdc   :  { %984 = vst [vmem:[%s1768_s4 + $0x30] sm:$0xff] %v920_v35  ;;  %1016 = vst [vmem:[%s1768_s4 + $0x130] sm:$0xff] %v952_v37  ;;  %vm790_vm11 = vcmp.ge.f32.partialorder %v726_v28, 0.0  ;;  %v854_v40 = vmul.f32 0.2, %v726_v28  ;;  %vm822_vm12 = vcmp.ge.f32.partialorder %v758_v29, 0.0  ;;  %v421_v42 = vpop.f32.mrf.mxu0  ;;  %v549_v43 = vpop.f32.mrf.mxu1  ;;  %v729_v44 = vadd.f32 %v1421_v36, %v658_v30 }
  0xdd   :  { %v886_v41 = vmul.f32 0.2, %v758_v29  ;;  %v761_v45 = vadd.f32 %v1421_v36, %v690_v31  ;;  %v727_v46 = vadd.f32 %v1421_v36, %v656_v38  ;;  %v759_v47 = vadd.f32 %v1421_v36, %v688_v39 }
  0xde   :  { %v918_v48 = vsel %vm790_vm11, %v726_v28, %v854_v40  ;;  %v661_v50 = vmul.f32 %v1162_v32, %v1416_v34  ;;  %v693_v51 = vmul.f32 %v1194_v33, %v1416_v34  ;;  %v1163_v52 = vpop.f32.mrf.mxu0  ;;  %v1195_v53 = vpop.f32.mrf.mxu1  ;;  %vm793_vm13 = vcmp.ge.f32.partialorder %v729_v44, 0.0 }
  0xdf   :  { %v950_v49 = vsel %vm822_vm12, %v758_v29, %v886_v41  ;;  %982 = vst [vmem:[%s1768_s4 + $0x20] sm:$0xff] %v918_v48  ;;  %v857_v54 = vmul.f32 0.2, %v729_v44  ;;  %vm825_vm14 = vcmp.ge.f32.partialorder %v761_v45, 0.0  ;;  %v889_v55 = vmul.f32 0.2, %v761_v45 }
  0xe0   :  { %1014 = vst [vmem:[%s1768_s4 + $0x120] sm:$0xff] %v950_v49  ;;  %vm791_vm15 = vcmp.ge.f32.partialorder %v727_v46, 0.0  ;;  %v855_v56 = vmul.f32 0.2, %v727_v46  ;;  %vm823_vm0 = vcmp.ge.f32.partialorder %v759_v47, 0.0  ;;  %v424_v58 = vpop.f32.mrf.mxu0  ;;  %v552_v59 = vpop.f32.mrf.mxu1  ;;  %v732_v62 = vadd.f32 %v1421_v36, %v661_v50 }
  0xe1   :  { %v887_v57 = vmul.f32 0.2, %v759_v47  ;;  %v921_v60 = vsel %vm793_vm13, %v729_v44, %v857_v54  ;;  %v953_v61 = vsel %vm825_vm14, %v761_v45, %v889_v55  ;;  %v764_v63 = vadd.f32 %v1421_v36, %v693_v51 }
  0xe2   :  { %985 = vst [vmem:[%s1768_s4 + $0x38] sm:$0xff] %v921_v60  ;;  %1017 = vst [vmem:[%s1768_s4 + $0x138] sm:$0xff] %v953_v61  ;;  %v919_v0 = vsel %vm791_vm15, %v727_v46, %v855_v56  ;;  %v659_v2 = vmul.f32 %v1416_v34, %v421_v42  ;;  %v691_v3 = vmul.f32 %v1416_v34, %v549_v43  ;;  %v1166_v4 = vpop.f32.mrf.mxu0  ;;  %v1198_v5 = vpop.f32.mrf.mxu1  ;;  %vm796_vm1 = vcmp.ge.f32.partialorder %v732_v62, 0.0 }
  0xe3   :  { %v951_v1 = vsel %vm823_vm0, %v759_v47, %v887_v57  ;;  %983 = vst [vmem:[%s1768_s4 + $0x28] sm:$0xff] %v919_v0  ;;  %v860_v6 = vmul.f32 0.2, %v732_v62  ;;  %vm828_vm2 = vcmp.ge.f32.partialorder %v764_v63, 0.0  ;;  %v892_v7 = vmul.f32 0.2, %v764_v63 }
  0xe4   :  { %1015 = vst [vmem:[%s1768_s4 + $0x128] sm:$0xff] %v951_v1  ;;  %v730_v8 = vadd.f32 %v1421_v36, %v659_v2  ;;  %v762_v9 = vadd.f32 %v1421_v36, %v691_v3  ;;  %v662_v10 = vmul.f32 %v1163_v52, %v1416_v34  ;;  %v694_v11 = vmul.f32 %v1195_v53, %v1416_v34  ;;  %v437_v12 = vpop.f32.mrf.mxu0  ;;  %v565_v13 = vpop.f32.mrf.mxu1 }
  0xe5   :  { %v924_v14 = vsel %vm796_vm1, %v732_v62, %v860_v6  ;;  %v956_v15 = vsel %vm828_vm2, %v764_v63, %v892_v7  ;;  %v660_v16 = vmul.f32 %v1416_v34, %v424_v58  ;;  %v692_v17 = vmul.f32 %v1416_v34, %v552_v59 }
  0xe6   :  { %988 = vst [vmem:[%s1768_s4 + $0x50] sm:$0xff] %v924_v14  ;;  %1020 = vst [vmem:[%s1768_s4 + $0x150] sm:$0xff] %v956_v15  ;;  %vm794_vm3 = vcmp.ge.f32.partialorder %v730_v8, 0.0  ;;  %v858_v18 = vmul.f32 0.2, %v730_v8  ;;  %vm826_vm4 = vcmp.ge.f32.partialorder %v762_v9, 0.0  ;;  %v1167_v20 = vpop.f32.mrf.mxu0  ;;  %v1199_v21 = vpop.f32.mrf.mxu1  ;;  %v733_v22 = vadd.f32 %v1421_v36, %v662_v10 }
  0xe7   :  { %v890_v19 = vmul.f32 0.2, %v762_v9  ;;  %v765_v23 = vadd.f32 %v1421_v36, %v694_v11  ;;  %v731_v24 = vadd.f32 %v1421_v36, %v660_v16  ;;  %v763_v25 = vadd.f32 %v1421_v36, %v692_v17 }
  0xe8   :  { %v922_v26 = vsel %vm794_vm3, %v730_v8, %v858_v18  ;;  %v665_v28 = vmul.f32 %v1166_v4, %v1416_v34  ;;  %v697_v29 = vmul.f32 %v1198_v5, %v1416_v34  ;;  %v440_v30 = vpop.f32.mrf.mxu0  ;;  %v568_v31 = vpop.f32.mrf.mxu1  ;;  %vm797_vm5 = vcmp.ge.f32.partialorder %v733_v22, 0.0 }
  0xe9   :  { %v954_v27 = vsel %vm826_vm4, %v762_v9, %v890_v19  ;;  %986 = vst [vmem:[%s1768_s4 + $0x40] sm:$0xff] %v922_v26  ;;  %v861_v32 = vmul.f32 0.2, %v733_v22  ;;  %vm829_vm6 = vcmp.ge.f32.partialorder %v765_v23, 0.0  ;;  %v893_v33 = vmul.f32 0.2, %v765_v23 }
  0xea   :  { %1018 = vst [vmem:[%s1768_s4 + $0x140] sm:$0xff] %v954_v27  ;;  %vm795_vm7 = vcmp.ge.f32.partialorder %v731_v24, 0.0  ;;  %v859_v35 = vmul.f32 0.2, %v731_v24  ;;  %vm827_vm8 = vcmp.ge.f32.partialorder %v763_v25, 0.0  ;;  %v1170_v38 = vpop.f32.mrf.mxu0  ;;  %v1202_v39 = vpop.f32.mrf.mxu1  ;;  %v736_v42 = vadd.f32 %v1421_v36, %v665_v28 }
  0xeb   :  { %v891_v37 = vmul.f32 0.2, %v763_v25  ;;  %v925_v40 = vsel %vm797_vm5, %v733_v22, %v861_v32  ;;  %v957_v41 = vsel %vm829_vm6, %v765_v23, %v893_v33  ;;  %v768_v43 = vadd.f32 %v1421_v36, %v697_v29 }
  0xec   :  { %989 = vst [vmem:[%s1768_s4 + $0x58] sm:$0xff] %v925_v40  ;;  %1021 = vst [vmem:[%s1768_s4 + $0x158] sm:$0xff] %v957_v41  ;;  %v923_v44 = vsel %vm795_vm7, %v731_v24, %v859_v35  ;;  %v663_v46 = vmul.f32 %v1416_v34, %v437_v12  ;;  %v695_v47 = vmul.f32 %v1416_v34, %v565_v13  ;;  %v453_v48 = vpop.f32.mrf.mxu0  ;;  %v581_v49 = vpop.f32.mrf.mxu1  ;;  %vm800_vm9 = vcmp.ge.f32.partialorder %v736_v42, 0.0 }
  0xed   :  { %v955_v45 = vsel %vm827_vm8, %v763_v25, %v891_v37  ;;  %987 = vst [vmem:[%s1768_s4 + $0x48] sm:$0xff] %v923_v44  ;;  %v864_v50 = vmul.f32 0.2, %v736_v42  ;;  %vm832_vm10 = vcmp.ge.f32.partialorder %v768_v43, 0.0  ;;  %v896_v51 = vmul.f32 0.2, %v768_v43 }
  0xee   :  { %1019 = vst [vmem:[%s1768_s4 + $0x148] sm:$0xff] %v955_v45  ;;  %v734_v52 = vadd.f32 %v1421_v36, %v663_v46  ;;  %v766_v53 = vadd.f32 %v1421_v36, %v695_v47  ;;  %v666_v54 = vmul.f32 %v1167_v20, %v1416_v34  ;;  %v698_v55 = vmul.f32 %v1199_v21, %v1416_v34  ;;  %v1171_v56 = vpop.f32.mrf.mxu0  ;;  %v1203_v57 = vpop.f32.mrf.mxu1 }
  0xef   :  { %v928_v58 = vsel %vm800_vm9, %v736_v42, %v864_v50  ;;  %v960_v59 = vsel %vm832_vm10, %v768_v43, %v896_v51  ;;  %v664_v60 = vmul.f32 %v1416_v34, %v440_v30  ;;  %v696_v61 = vmul.f32 %v1416_v34, %v568_v31 }
  0xf0   :  { %992 = vst [vmem:[%s1768_s4 + $0x70] sm:$0xff] %v928_v58  ;;  %1024 = vst [vmem:[%s1768_s4 + $0x170] sm:$0xff] %v960_v59  ;;  %vm798_vm11 = vcmp.ge.f32.partialorder %v734_v52, 0.0  ;;  %v862_v62 = vmul.f32 0.2, %v734_v52  ;;  %vm830_vm12 = vcmp.ge.f32.partialorder %v766_v53, 0.0  ;;  %v456_v0 = vpop.f32.mrf.mxu0  ;;  %v584_v1 = vpop.f32.mrf.mxu1  ;;  %v737_v2 = vadd.f32 %v1421_v36, %v666_v54 }
  0xf1   :  { %v894_v63 = vmul.f32 0.2, %v766_v53  ;;  %v769_v3 = vadd.f32 %v1421_v36, %v698_v55  ;;  %v735_v4 = vadd.f32 %v1421_v36, %v664_v60  ;;  %v767_v5 = vadd.f32 %v1421_v36, %v696_v61 }
  0xf2   :  { %v926_v6 = vsel %vm798_vm11, %v734_v52, %v862_v62  ;;  %v669_v8 = vmul.f32 %v1170_v38, %v1416_v34  ;;  %v701_v9 = vmul.f32 %v1202_v39, %v1416_v34  ;;  %v1174_v10 = vpop.f32.mrf.mxu0  ;;  %v1206_v11 = vpop.f32.mrf.mxu1  ;;  %vm801_vm13 = vcmp.ge.f32.partialorder %v737_v2, 0.0 }
  0xf3   :  { %v958_v7 = vsel %vm830_vm12, %v766_v53, %v894_v63  ;;  %990 = vst [vmem:[%s1768_s4 + $0x60] sm:$0xff] %v926_v6  ;;  %v865_v12 = vmul.f32 0.2, %v737_v2  ;;  %vm833_vm14 = vcmp.ge.f32.partialorder %v769_v3, 0.0  ;;  %v897_v13 = vmul.f32 0.2, %v769_v3 }
  0xf4   :  { %1022 = vst [vmem:[%s1768_s4 + $0x160] sm:$0xff] %v958_v7  ;;  %vm799_vm15 = vcmp.ge.f32.partialorder %v735_v4, 0.0  ;;  %v863_v14 = vmul.f32 0.2, %v735_v4  ;;  %vm831_vm0 = vcmp.ge.f32.partialorder %v767_v5, 0.0  ;;  %v1573_v16 = vpop.f32.mrf.mxu0  ;;  %v1575_v17 = vpop.f32.mrf.mxu1  ;;  %v740_v20 = vadd.f32 %v1421_v36, %v669_v8 }
  0xf5   :  { %v895_v15 = vmul.f32 0.2, %v767_v5  ;;  %v929_v18 = vsel %vm801_vm13, %v737_v2, %v865_v12  ;;  %v961_v19 = vsel %vm833_vm14, %v769_v3, %v897_v13  ;;  %v772_v21 = vadd.f32 %v1421_v36, %v701_v9 }
  0xf6   :  { %993 = vst [vmem:[%s1768_s4 + $0x78] sm:$0xff] %v929_v18  ;;  %1025 = vst [vmem:[%s1768_s4 + $0x178] sm:$0xff] %v961_v19  ;;  %v927_v22 = vsel %vm799_vm15, %v735_v4, %v863_v14  ;;  %v667_v24 = vmul.f32 %v1416_v34, %v453_v48  ;;  %v699_v25 = vmul.f32 %v1416_v34, %v581_v49  ;;  %v1587_v26 = vpop.f32.mrf.mxu0  ;;  %v1589_v27 = vpop.f32.mrf.mxu1  ;;  %vm804_vm1 = vcmp.ge.f32.partialorder %v740_v20, 0.0 }
  0xf7   :  { %v959_v23 = vsel %vm831_vm0, %v767_v5, %v895_v15  ;;  %991 = vst [vmem:[%s1768_s4 + $0x68] sm:$0xff] %v927_v22  ;;  %v868_v28 = vmul.f32 0.2, %v740_v20  ;;  %vm836_vm2 = vcmp.ge.f32.partialorder %v772_v21, 0.0  ;;  %v900_v29 = vmul.f32 0.2, %v772_v21 }
  0xf8   :  { %1023 = vst [vmem:[%s1768_s4 + $0x168] sm:$0xff] %v959_v23  ;;  %v738_v30 = vadd.f32 %v1421_v36, %v667_v24  ;;  %v770_v31 = vadd.f32 %v1421_v36, %v699_v25  ;;  %v670_v32 = vmul.f32 %v1171_v56, %v1416_v34  ;;  %v702_v33 = vmul.f32 %v1203_v57, %v1416_v34  ;;  %v472_v35 = vpop.f32.mrf.mxu0  ;;  %v600_v37 = vpop.f32.mrf.mxu1 }
  0xf9   :  { %v932_v38 = vsel %vm804_vm1, %v740_v20, %v868_v28  ;;  %v964_v39 = vsel %vm836_vm2, %v772_v21, %v900_v29  ;;  %v668_v40 = vmul.f32 %v1416_v34, %v456_v0  ;;  %v700_v41 = vmul.f32 %v1416_v34, %v584_v1 }
  0xfa   :  { %996 = vst [vmem:[%s1768_s4 + $0x90] sm:$0xff] %v932_v38  ;;  %1028 = vst [vmem:[%s1768_s4 + $0x190] sm:$0xff] %v964_v39  ;;  %vm802_vm3 = vcmp.ge.f32.partialorder %v738_v30, 0.0  ;;  %v866_v42 = vmul.f32 0.2, %v738_v30  ;;  %vm834_vm4 = vcmp.ge.f32.partialorder %v770_v31, 0.0  ;;  %v1609_v44 = vpop.f32.mrf.mxu0  ;;  %v1210_v45 = vpop.f32.mrf.mxu1  ;;  %v741_v46 = vadd.f32 %v1421_v36, %v670_v32 }
  0xfb   :  { %v898_v43 = vmul.f32 0.2, %v770_v31  ;;  %v773_v47 = vadd.f32 %v1421_v36, %v702_v33  ;;  %v739_v48 = vadd.f32 %v1421_v36, %v668_v40  ;;  %v771_v49 = vadd.f32 %v1421_v36, %v700_v41 }
  0xfc   :  { %v930_v50 = vsel %vm802_vm3, %v738_v30, %v866_v42  ;;  %v673_v52 = vmul.f32 %v1174_v10, %v1416_v34  ;;  %v705_v53 = vmul.f32 %v1206_v11, %v1416_v34  ;;  %v1617_v54 = vpop.f32.mrf.mxu0  ;;  %v1619_v55 = vpop.f32.mrf.mxu1  ;;  %vm805_vm5 = vcmp.ge.f32.partialorder %v741_v46, 0.0 }
  0xfd   :  { %v962_v51 = vsel %vm834_vm4, %v770_v31, %v898_v43  ;;  %994 = vst [vmem:[%s1768_s4 + $0x80] sm:$0xff] %v930_v50  ;;  %v869_v56 = vmul.f32 0.2, %v741_v46  ;;  %vm837_vm6 = vcmp.ge.f32.partialorder %v773_v47, 0.0  ;;  %v901_v57 = vmul.f32 0.2, %v773_v47 }
  0xfe   :  { %1026 = vst [vmem:[%s1768_s4 + $0x180] sm:$0xff] %v962_v51  ;;  %vm803_vm7 = vcmp.ge.f32.partialorder %v739_v48, 0.0  ;;  %v867_v58 = vmul.f32 0.2, %v739_v48  ;;  %vm835_vm8 = vcmp.ge.f32.partialorder %v771_v49, 0.0  ;;  %v744_v62 = vadd.f32 %v1421_v36, %v673_v52  ;;  %v1179_v4 = vpop.f32.mrf.mxu0  ;;  %v1211_v5 = vpop.f32.mrf.mxu1 }
  0xff   :  { %v899_v59 = vmul.f32 0.2, %v771_v49  ;;  %v933_v60 = vsel %vm805_vm5, %v741_v46, %v869_v56  ;;  %v965_v61 = vsel %vm837_vm6, %v773_v47, %v901_v57  ;;  %v776_v63 = vadd.f32 %v1421_v36, %v705_v53 }
 0x100   :  { %997 = vst [vmem:[%s1768_s4 + $0x98] sm:$0xff] %v933_v60  ;;  %1029 = vst [vmem:[%s1768_s4 + $0x198] sm:$0xff] %v965_v61  ;;  %v931_v0 = vsel %vm803_vm7, %v739_v48, %v867_v58  ;;  %v671_v2 = vmul.f32 %v1416_v34, %v1573_v16  ;;  %v703_v3 = vmul.f32 %v1416_v34, %v1575_v17  ;;  %vm808_vm9 = vcmp.ge.f32.partialorder %v744_v62, 0.0  ;;  %v488_v18 = vpop.f32.mrf.mxu0  ;;  %v616_v19 = vpop.f32.mrf.mxu1 }
 0x101   :  { %v963_v1 = vsel %vm835_vm8, %v771_v49, %v899_v59  ;;  %995 = vst [vmem:[%s1768_s4 + $0x88] sm:$0xff] %v931_v0  ;;  %v872_v6 = vmul.f32 0.2, %v744_v62  ;;  %vm840_vm10 = vcmp.ge.f32.partialorder %v776_v63, 0.0  ;;  %v904_v7 = vmul.f32 0.2, %v776_v63 }
 0x102   :  { %1027 = vst [vmem:[%s1768_s4 + $0x188] sm:$0xff] %v963_v1  ;;  %v742_v8 = vadd.f32 %v1421_v36, %v671_v2  ;;  %v774_v9 = vadd.f32 %v1421_v36, %v703_v3  ;;  %v674_v10 = vmul.f32 %v1587_v26, %v1416_v34  ;;  %v706_v11 = vmul.f32 %v1589_v27, %v1416_v34  ;;  %v1182_v32 = vpop.f32.mrf.mxu0  ;;  %v1214_v33 = vpop.f32.mrf.mxu1 }
 0x103   :  { %v936_v12 = vsel %vm808_vm9, %v744_v62, %v872_v6  ;;  %v968_v13 = vsel %vm840_vm10, %v776_v63, %v904_v7  ;;  %v672_v14 = vmul.f32 %v1416_v34, %v472_v35  ;;  %v704_v15 = vmul.f32 %v1416_v34, %v600_v37 }
 0x104   :  { %1000 = vst [vmem:[%s1768_s4 + $0xb0] sm:$0xff] %v936_v12  ;;  %1032 = vst [vmem:[%s1768_s4 + $0x1b0] sm:$0xff] %v968_v13  ;;  %vm806_vm11 = vcmp.ge.f32.partialorder %v742_v8, 0.0  ;;  %v870_v16 = vmul.f32 0.2, %v742_v8  ;;  %vm838_vm12 = vcmp.ge.f32.partialorder %v774_v9, 0.0  ;;  %v745_v20 = vadd.f32 %v1421_v36, %v674_v10  ;;  %v501_v50 = vpop.f32.mrf.mxu0  ;;  %v629_v51 = vpop.f32.mrf.mxu1 }
 0x105   :  { %v902_v17 = vmul.f32 0.2, %v774_v9  ;;  %v777_v21 = vadd.f32 %v1421_v36, %v706_v11  ;;  %v743_v22 = vadd.f32 %v1421_v36, %v672_v14  ;;  %v775_v23 = vadd.f32 %v1421_v36, %v704_v15 }
 0x106   :  { %v934_v24 = vsel %vm806_vm11, %v742_v8, %v870_v16  ;;  %v677_v26 = vmul.f32 %v1609_v44, %v1416_v34  ;;  %v709_v27 = vmul.f32 %v1210_v45, %v1416_v34  ;;  %vm809_vm13 = vcmp.ge.f32.partialorder %v745_v20, 0.0  ;;  %v1183_v2 = vpop.f32.mrf.mxu0  ;;  %v1215_v3 = vpop.f32.mrf.mxu1 }
 0x107   :  { %v966_v25 = vsel %vm838_vm12, %v774_v9, %v902_v17  ;;  %998 = vst [vmem:[%s1768_s4 + $0xa0] sm:$0xff] %v934_v24  ;;  %v873_v28 = vmul.f32 0.2, %v745_v20  ;;  %vm841_vm14 = vcmp.ge.f32.partialorder %v777_v21, 0.0  ;;  %v905_v29 = vmul.f32 0.2, %v777_v21 }
 0x108   :  { %1030 = vst [vmem:[%s1768_s4 + $0x1a0] sm:$0xff] %v966_v25  ;;  %vm807_vm15 = vcmp.ge.f32.partialorder %v743_v22, 0.0  ;;  %v871_v30 = vmul.f32 0.2, %v743_v22  ;;  %vm839_vm0 = vcmp.ge.f32.partialorder %v775_v23, 0.0  ;;  %v748_v38 = vadd.f32 %v1421_v36, %v677_v26  ;;  %v504_v16 = vpop.f32.mrf.mxu0  ;;  %v632_v17 = vpop.f32.mrf.mxu1 }
 0x109   :  { %v903_v31 = vmul.f32 0.2, %v775_v23  ;;  %v937_v35 = vsel %vm809_vm13, %v745_v20, %v873_v28  ;;  %v969_v37 = vsel %vm841_vm14, %v777_v21, %v905_v29  ;;  %v780_v39 = vadd.f32 %v1421_v36, %v709_v27 }
 0x10a   :  { %1001 = vst [vmem:[%s1768_s4 + $0xb8] sm:$0xff] %v937_v35  ;;  %1033 = vst [vmem:[%s1768_s4 + $0x1b8] sm:$0xff] %v969_v37  ;;  %v935_v40 = vsel %vm807_vm15, %v743_v22, %v871_v30  ;;  %v675_v42 = vmul.f32 %v1416_v34, %v1617_v54  ;;  %v707_v43 = vmul.f32 %v1416_v34, %v1619_v55  ;;  %vm812_vm1 = vcmp.ge.f32.partialorder %v748_v38, 0.0 }
 0x10b   :  { %v967_v41 = vsel %vm839_vm0, %v775_v23, %v903_v31  ;;  %999 = vst [vmem:[%s1768_s4 + $0xa8] sm:$0xff] %v935_v40  ;;  %v876_v44 = vmul.f32 0.2, %v748_v38  ;;  %vm844_vm2 = vcmp.ge.f32.partialorder %v780_v39, 0.0  ;;  %v908_v45 = vmul.f32 0.2, %v780_v39 }
 0x10c   :  { %1031 = vst [vmem:[%s1768_s4 + $0x1a8] sm:$0xff] %v967_v41  ;;  %v746_v46 = vadd.f32 %v1421_v36, %v675_v42  ;;  %v778_v47 = vadd.f32 %v1421_v36, %v707_v43  ;;  %v678_v48 = vmul.f32 %v1179_v4, %v1416_v34  ;;  %v710_v49 = vmul.f32 %v1211_v5, %v1416_v34 }
 0x10d   :  { %v940_v52 = vsel %vm812_vm1, %v748_v38, %v876_v44  ;;  %v972_v53 = vsel %vm844_vm2, %v780_v39, %v908_v45  ;;  %v676_v54 = vmul.f32 %v1416_v34, %v488_v18  ;;  %v708_v55 = vmul.f32 %v1416_v34, %v616_v19 }
 0x10e   :  { %1004 = vst [vmem:[%s1768_s4 + $0xd0] sm:$0xff] %v940_v52  ;;  %1036 = vst [vmem:[%s1768_s4 + $0x1d0] sm:$0xff] %v972_v53  ;;  %vm810_vm3 = vcmp.ge.f32.partialorder %v746_v46, 0.0  ;;  %v874_v56 = vmul.f32 0.2, %v746_v46  ;;  %vm842_vm4 = vcmp.ge.f32.partialorder %v778_v47, 0.0  ;;  %v749_v58 = vadd.f32 %v1421_v36, %v678_v48 }
 0x10f   :  { %v906_v57 = vmul.f32 0.2, %v778_v47  ;;  %v781_v59 = vadd.f32 %v1421_v36, %v710_v49  ;;  %v747_v60 = vadd.f32 %v1421_v36, %v676_v54  ;;  %v779_v61 = vadd.f32 %v1421_v36, %v708_v55 }
 0x110   :  { %v938_v62 = vsel %vm810_vm3, %v746_v46, %v874_v56  ;;  %v681_v0 = vmul.f32 %v1182_v32, %v1416_v34  ;;  %v713_v1 = vmul.f32 %v1214_v33, %v1416_v34  ;;  %vm813_vm5 = vcmp.ge.f32.partialorder %v749_v58, 0.0 }
 0x111   :  { %v970_v63 = vsel %vm842_vm4, %v778_v47, %v906_v57  ;;  %1002 = vst [vmem:[%s1768_s4 + $0xc0] sm:$0xff] %v938_v62  ;;  %v877_v4 = vmul.f32 0.2, %v749_v58  ;;  %vm845_vm6 = vcmp.ge.f32.partialorder %v781_v59, 0.0  ;;  %v909_v5 = vmul.f32 0.2, %v781_v59 }
 0x112   :  { %1034 = vst [vmem:[%s1768_s4 + $0x1c0] sm:$0xff] %v970_v63  ;;  %vm811_vm7 = vcmp.ge.f32.partialorder %v747_v60, 0.0  ;;  %v875_v6 = vmul.f32 0.2, %v747_v60  ;;  %vm843_vm8 = vcmp.ge.f32.partialorder %v779_v61, 0.0  ;;  %v752_v10 = vadd.f32 %v1421_v36, %v681_v0 }
 0x113   :  { %v907_v7 = vmul.f32 0.2, %v779_v61  ;;  %v941_v8 = vsel %vm813_vm5, %v749_v58, %v877_v4  ;;  %v973_v9 = vsel %vm845_vm6, %v781_v59, %v909_v5  ;;  %v784_v11 = vadd.f32 %v1421_v36, %v713_v1 }
 0x114   :  { %1005 = vst [vmem:[%s1768_s4 + $0xd8] sm:$0xff] %v941_v8  ;;  %1037 = vst [vmem:[%s1768_s4 + $0x1d8] sm:$0xff] %v973_v9  ;;  %v939_v12 = vsel %vm811_vm7, %v747_v60, %v875_v6  ;;  %v679_v14 = vmul.f32 %v1416_v34, %v501_v50  ;;  %v711_v15 = vmul.f32 %v1416_v34, %v629_v51  ;;  %vm816_vm9 = vcmp.ge.f32.partialorder %v752_v10, 0.0 }
 0x115   :  { %v971_v13 = vsel %vm843_vm8, %v779_v61, %v907_v7  ;;  %1003 = vst [vmem:[%s1768_s4 + $0xc8] sm:$0xff] %v939_v12  ;;  %v880_v18 = vmul.f32 0.2, %v752_v10  ;;  %vm848_vm10 = vcmp.ge.f32.partialorder %v784_v11, 0.0  ;;  %v912_v19 = vmul.f32 0.2, %v784_v11 }
 0x116   :  { %1035 = vst [vmem:[%s1768_s4 + $0x1c8] sm:$0xff] %v971_v13  ;;  %v750_v20 = vadd.f32 %v1421_v36, %v679_v14  ;;  %v782_v21 = vadd.f32 %v1421_v36, %v711_v15  ;;  %v682_v22 = vmul.f32 %v1183_v2, %v1416_v34  ;;  %v714_v23 = vmul.f32 %v1215_v3, %v1416_v34 }
 0x117   :  { %v944_v24 = vsel %vm816_vm9, %v752_v10, %v880_v18  ;;  %v976_v25 = vsel %vm848_vm10, %v784_v11, %v912_v19  ;;  %v680_v26 = vmul.f32 %v1416_v34, %v504_v16  ;;  %v712_v27 = vmul.f32 %v1416_v34, %v632_v17 }
 0x118   :  { %1008 = vst [vmem:[%s1768_s4 + $0xf0] sm:$0xff] %v944_v24  ;;  %1040 = vst [vmem:[%s1768_s4 + $0x1f0] sm:$0xff] %v976_v25  ;;  %vm814_vm11 = vcmp.ge.f32.partialorder %v750_v20, 0.0  ;;  %v878_v28 = vmul.f32 0.2, %v750_v20  ;;  %vm846_vm12 = vcmp.ge.f32.partialorder %v782_v21, 0.0  ;;  %v753_v30 = vadd.f32 %v1421_v36, %v682_v22 }
 0x119   :  { %v910_v29 = vmul.f32 0.2, %v782_v21  ;;  %v785_v31 = vadd.f32 %v1421_v36, %v714_v23  ;;  %v751_v32 = vadd.f32 %v1421_v36, %v680_v26  ;;  %v783_v34 = vadd.f32 %v1421_v36, %v712_v27 }
 0x11a   :  { %v942_v33 = vsel %vm814_vm11, %v750_v20, %v878_v28  ;;  %vm817_vm13 = vcmp.ge.f32.partialorder %v753_v30, 0.0  ;;  %v881_v37 = vmul.f32 0.2, %v753_v30 }
 0x11b   :  { %v974_v35 = vsel %vm846_vm12, %v782_v21, %v910_v29  ;;  %1006 = vst [vmem:[%s1768_s4 + $0xe0] sm:$0xff] %v942_v33  ;;  %vm849_vm14 = vcmp.ge.f32.partialorder %v785_v31, 0.0  ;;  %v913_v38 = vmul.f32 0.2, %v785_v31  ;;  %vm815_vm15 = vcmp.ge.f32.partialorder %v751_v32, 0.0 }
 0x11c   :  { %1038 = vst [vmem:[%s1768_s4 + $0x1e0] sm:$0xff] %v974_v35  ;;  %v879_v39 = vmul.f32 0.2, %v751_v32  ;;  %vm847_vm0 = vcmp.ge.f32.partialorder %v783_v34, 0.0  ;;  %v911_v40 = vmul.f32 0.2, %v783_v34  ;;  %v945_v41 = vsel %vm817_vm13, %v753_v30, %v881_v37 }
 0x11d   :  { %v977_v36 = vsel %vm849_vm14, %v785_v31, %v913_v38  ;;  %1009 = vst [vmem:[%s1768_s4 + $0xf8] sm:$0xff] %v945_v41 }
 0x11e   :  { %1041 = vst [vmem:[%s1768_s4 + $0x1f8] sm:$0xff] %v977_v36  ;;  %v943_v42 = vsel %vm815_vm15, %v751_v32, %v879_v39  ;;  %v975_v43 = vsel %vm847_vm0, %v783_v34, %v911_v40 }
 0x11f   :  { %1007 = vst [vmem:[%s1768_s4 + $0xe8] sm:$0xff] %v943_v42  ;;  %1039 = vst [vmem:[%s1768_s4 + $0x1e8] sm:$0xff] %v975_v43 }

// kernel: _lambda_.10
= control target key start
LH: loop header
LB: loop body
LE: loop exit
PB: predicated region body
PF: predicated region fallthrough
CT: control target
= control target key end

     0   :  { %v501_v0 = vmov 0   ;;  %vm178_vm0 = vcmask 130048   ;;  %s700_s1 = inlined_call_operand.vmem [shape: bf16[144,128], index: 1, kind: input, shape index: {}]   ;;  %s701_s0 = inlined_call_operand.vmem [shape: bf16[128,144], index: 0, kind: input, shape index: {}]   ;;  %s702_s2 = inlined_call_operand.vmem [shape: f32[1,128], index: 2, kind: input, shape index: {}]   ;;  %s703_s3 = inlined_call_operand.vmem [shape: f32[1,128], index: 3, kind: input, shape index: {}]   ;;  %s704_s4 = inlined_call_operand.vmem [shape: f32[128,128], index: 4, kind: output, shape index: {}]  }
   0x1   :  { %203 = vmatprep.subr.bf16.mxu0 %v501_v0  ;;  %449 = vmatprep.subr.bf16.mxu1 %v501_v0  ;;  %v468_v1 = vld [vmem:[%s700_s1 + $0x38] sm:$0xff]   ;;  %v469_v2 = vld [vmem:[%s700_s1 + $0x30] sm:$0xff]   ;;  %v470_v3 = vld [vmem:[%s700_s1 + $0x28] sm:$0xff]  }
   0x2   :  { %204 = vmatpush1.bf16.msra.mxu0 %v468_v1  ;;  %458 = vmatpush1.bf16.msra.mxu1 %v468_v1  ;;  %v471_v4 = vld [vmem:[%s700_s1 + $0x20] sm:$0xff]   ;;  %v472_v7 = vld [vmem:[%s700_s1 + $0x18] sm:$0xff]   ;;  %v473_v8 = vld [vmem:[%s700_s1 + $0x10] sm:$0xff]  }
   0x3   :  { %205 = vmatprep.subr.bf16.mxu0 %v501_v0  ;;  %450 = vmatprep.subr.bf16.mxu1 %v501_v0  ;;  %v479_v5 = vld [vmem:[%s701_s0 + $0x4] ss:$8 sps:$4 sm:$0xff]   ;;  %v477_v12 = vld [vmem:[%s701_s0] ss:$8 sps:$4 sm:$0xff]   ;;  %v483_v14 = vld [vmem:[%s701_s0 + $0x14] ss:$8 sps:$4 sm:$0xff]  }
   0x4   :  { %v482_v6 = vld [vmem:[%s701_s0 + $0x44] ss:$8 sps:$4 sm:$0xff]   ;;  %439 = vmatprep.mubr.msk.bf16.mxu0 %vm178_vm0, %v479_v5  ;;  %v480_v13 = vld [vmem:[%s701_s0 + $0x40] ss:$8 sps:$4 sm:$0xff]   ;;  %v485_v15 = vld [vmem:[%s701_s0 + $0x54] ss:$8 sps:$4 sm:$0xff]  }
   0x5   :  { %443 = vmatprep.mubr.msk.bf16.mxu1 %vm178_vm0, %v482_v6  ;;  %v474_v9 = vld [vmem:[%s700_s1 + $0x8] sm:$0xff]   ;;  %v475_v10 = vld [vmem:[%s700_s1] sm:$0xff]   ;;  %v487_v16 = vld [vmem:[%s701_s0 + $0x10] ss:$8 sps:$4 sm:$0xff]  }
   0x6   :  { %206 = vmatpush1.bf16.msra.mxu0 %v469_v2  ;;  %459 = vmatpush1.bf16.msra.mxu1 %v469_v2  ;;  %v476_v11 = vld [vmem:[%s700_s1 + $0x40] sm:$0xff]   ;;  %v488_v17 = vld [vmem:[%s701_s0 + $0x50] ss:$8 sps:$4 sm:$0xff]   ;;  %v495_v22 = vld [vmem:[%s701_s0 + $0x34] ss:$8 sps:$4 sm:$0xff]  }
   0x7   :  { %207 = vmatprep.subr.bf16.mxu0 %v501_v0  ;;  %451 = vmatprep.subr.bf16.mxu1 %v501_v0  ;;  %v489_v18 = vld [vmem:[%s701_s0 + $0x24] ss:$8 sps:$4 sm:$0xff]   ;;  %v493_v20 = vld [vmem:[%s701_s0 + $0x20] ss:$8 sps:$4 sm:$0xff]   ;;  %v497_v23 = vld [vmem:[%s701_s0 + $0x74] ss:$8 sps:$4 sm:$0xff]  }
   0x8   :  { %v491_v19 = vld [vmem:[%s701_s0 + $0x64] ss:$8 sps:$4 sm:$0xff]   ;;  %v494_v21 = vld [vmem:[%s701_s0 + $0x60] ss:$8 sps:$4 sm:$0xff]   ;;  %v499_v24 = vld [vmem:[%s701_s0 + $0x30] ss:$8 sps:$4 sm:$0xff]  }
   0x9   :  { %v500_v25 = vld [vmem:[%s701_s0 + $0x70] ss:$8 sps:$4 sm:$0xff]   ;;  %v613_v26 = vld [vmem:[%s702_s2] ss:$0 sm:$0xff] }
   0xa   :  { %208 = vmatpush1.bf16.msra.mxu0 %v470_v3  ;;  %460 = vmatpush1.bf16.msra.mxu1 %v470_v3  ;;  %v618_v28 = vld [vmem:[%s703_s3] ss:$0 sm:$0xff] }
   0xb   :  { %209 = vmatprep.subr.bf16.mxu0 %v501_v0  ;;  %452 = vmatprep.subr.bf16.mxu1 %v501_v0 }
   0xe   :  { %210 = vmatpush1.bf16.msra.mxu0 %v471_v4  ;;  %461 = vmatpush1.bf16.msra.mxu1 %v471_v4 }
   0xf   :  { %211 = vmatprep.subr.bf16.mxu0 %v501_v0  ;;  %453 = vmatprep.subr.bf16.mxu1 %v501_v0 }
  0x12   :  { %212 = vmatpush1.bf16.msra.mxu0 %v472_v7  ;;  %462 = vmatpush1.bf16.msra.mxu1 %v472_v7 }
  0x13   :  { %213 = vmatprep.subr.bf16.mxu0 %v501_v0  ;;  %454 = vmatprep.subr.bf16.mxu1 %v501_v0 }
  0x16   :  { %214 = vmatpush1.bf16.msra.mxu0 %v473_v8  ;;  %463 = vmatpush1.bf16.msra.mxu1 %v473_v8 }
  0x17   :  { %215 = vmatprep.subr.bf16.mxu0 %v501_v0  ;;  %455 = vmatprep.subr.bf16.mxu1 %v501_v0 }
  0x1a   :  { %216 = vmatpush1.bf16.msra.mxu0 %v474_v9  ;;  %464 = vmatpush1.bf16.msra.mxu1 %v474_v9 }
  0x1b   :  { %217 = vmatprep.subr.bf16.mxu0 %v501_v0  ;;  %456 = vmatprep.subr.bf16.mxu1 %v501_v0 }
  0x1e   :  { %218 = vmatpush1.bf16.msra.mxu0 %v475_v10  ;;  %465 = vmatpush1.bf16.msra.mxu1 %v475_v10 }
  0x1f   :  { %233 = vmatprep.subr.bf16.mxu0 %v501_v0  ;;  %457 = vmatprep.subr.bf16.mxu1 %v501_v0 }
  0x22   :  { %234 = vmatpush2.bf16.msra.mxu0 %v476_v11  ;;  %466 = vmatpush2.bf16.msra.mxu1 %v476_v11 }
  0x25   :  { %236 = vmatmul.mubr.bf16.vlgmr.msra.gmra.mxu0 %v477_v12  ;;  %268 = vmatmul.mubr.bf16.vlgmr.msra.gmra.mxu1 %v480_v13 }
  0x26   :  { %440 = vmatprep.mubr.msk.bf16.mxu0 %vm178_vm0, %v483_v14  ;;  %444 = vmatprep.mubr.msk.bf16.mxu1 %vm178_vm0, %v485_v15 }
  0x2d   :  { %244 = vmatmul.mubr.bf16.gmra.mxu0 %v487_v16  ;;  %276 = vmatmul.mubr.bf16.gmra.mxu1 %v488_v17 }
  0x2e   :  { %441 = vmatprep.mubr.msk.bf16.mxu0 %vm178_vm0, %v489_v18  ;;  %445 = vmatprep.mubr.msk.bf16.mxu1 %vm178_vm0, %v491_v19 }
  0x35   :  { %252 = vmatmul.mubr.bf16.gmra.mxu0 %v493_v20  ;;  %284 = vmatmul.mubr.bf16.gmra.mxu1 %v494_v21 }
  0x36   :  { %442 = vmatprep.mubr.msk.bf16.mxu0 %vm178_vm0, %v495_v22  ;;  %446 = vmatprep.mubr.msk.bf16.mxu1 %vm178_vm0, %v497_v23 }
  0x3d   :  { %260 = vmatmul.mubr.bf16.gmra.mxu0 %v499_v24  ;;  %292 = vmatmul.mubr.bf16.gmra.mxu1 %v500_v25 }
  0xe5   :  { %v237_v27 = vpop.f32.mrf.mxu0  ;;  %v269_v29 = vpop.f32.mrf.mxu1 }
  0xe6   :  { %v307_v30 = vmul.f32 %v613_v26, %v237_v27  ;;  %v315_v31 = vmul.f32 %v613_v26, %v269_v29 }
  0xe7   :  { %v239_v32 = vpop.f32.mrf.mxu0  ;;  %v271_v33 = vpop.f32.mrf.mxu1 }
  0xe8   :  { %v330_v34 = vadd.f32 %v618_v28, %v307_v30  ;;  %v338_v35 = vadd.f32 %v618_v28, %v315_v31 }
  0xe9   :  { %v240_v36 = vpop.f32.mrf.mxu0  ;;  %v272_v37 = vpop.f32.mrf.mxu1 }
  0xea   :  { %vm346_vm1 = vcmp.ge.f32.partialorder %v330_v34, 0.0  ;;  %v362_v38 = vmul.f32 0.2, %v330_v34  ;;  %vm354_vm2 = vcmp.ge.f32.partialorder %v338_v35, 0.0  ;;  %v370_v39 = vmul.f32 0.2, %v338_v35 }
  0xeb   :  { %v308_v40 = vmul.f32 %v613_v26, %v240_v36  ;;  %v316_v41 = vmul.f32 %v613_v26, %v272_v37  ;;  %v242_v42 = vpop.f32.mrf.mxu0  ;;  %v274_v43 = vpop.f32.mrf.mxu1 }
  0xec   :  { %v378_v44 = vsel %vm346_vm1, %v330_v34, %v362_v38  ;;  %v386_v45 = vsel %vm354_vm2, %v338_v35, %v370_v39 }
  0xed   :  { %394 = vst [vmem:[%s704_s4] sm:$0xff] %v378_v44  ;;  %402 = vst [vmem:[%s704_s4 + $0x40] sm:$0xff] %v386_v45  ;;  %v331_v46 = vadd.f32 %v618_v28, %v308_v40  ;;  %v339_v47 = vadd.f32 %v618_v28, %v316_v41  ;;  %v245_v48 = vpop.f32.mrf.mxu0  ;;  %v277_v49 = vpop.f32.mrf.mxu1 }
  0xee   :  { %v309_v50 = vmul.f32 %v613_v26, %v245_v48  ;;  %v317_v51 = vmul.f32 %v613_v26, %v277_v49 }
  0xef   :  { %vm347_vm3 = vcmp.ge.f32.partialorder %v331_v46, 0.0  ;;  %v363_v52 = vmul.f32 0.2, %v331_v46  ;;  %vm355_vm4 = vcmp.ge.f32.partialorder %v339_v47, 0.0  ;;  %v371_v53 = vmul.f32 0.2, %v339_v47  ;;  %v247_v54 = vpop.f32.mrf.mxu0  ;;  %v279_v55 = vpop.f32.mrf.mxu1 }
  0xf0   :  { %v332_v56 = vadd.f32 %v618_v28, %v309_v50  ;;  %v340_v57 = vadd.f32 %v618_v28, %v317_v51 }
  0xf1   :  { %v379_v58 = vsel %vm347_vm3, %v331_v46, %v363_v52  ;;  %v387_v59 = vsel %vm355_vm4, %v339_v47, %v371_v53  ;;  %v248_v60 = vpop.f32.mrf.mxu0  ;;  %v280_v61 = vpop.f32.mrf.mxu1 }
  0xf2   :  { %395 = vst [vmem:[%s704_s4 + $0x8] sm:$0xff] %v379_v58  ;;  %403 = vst [vmem:[%s704_s4 + $0x48] sm:$0xff] %v387_v59  ;;  %vm348_vm5 = vcmp.ge.f32.partialorder %v332_v56, 0.0  ;;  %v364_v62 = vmul.f32 0.2, %v332_v56  ;;  %vm356_vm6 = vcmp.ge.f32.partialorder %v340_v57, 0.0  ;;  %v310_v0 = vmul.f32 %v613_v26, %v248_v60 }
  0xf3   :  { %v372_v63 = vmul.f32 0.2, %v340_v57  ;;  %v318_v1 = vmul.f32 %v613_v26, %v280_v61  ;;  %v250_v2 = vpop.f32.mrf.mxu0  ;;  %v282_v3 = vpop.f32.mrf.mxu1 }
  0xf4   :  { %v380_v4 = vsel %vm348_vm5, %v332_v56, %v364_v62  ;;  %v333_v6 = vadd.f32 %v618_v28, %v310_v0 }
  0xf5   :  { %v388_v5 = vsel %vm356_vm6, %v340_v57, %v372_v63  ;;  %396 = vst [vmem:[%s704_s4 + $0x10] sm:$0xff] %v380_v4  ;;  %v341_v7 = vadd.f32 %v618_v28, %v318_v1  ;;  %v253_v8 = vpop.f32.mrf.mxu0  ;;  %v285_v9 = vpop.f32.mrf.mxu1 }
  0xf6   :  { %404 = vst [vmem:[%s704_s4 + $0x50] sm:$0xff] %v388_v5  ;;  %v311_v10 = vmul.f32 %v613_v26, %v253_v8  ;;  %v319_v11 = vmul.f32 %v613_v26, %v285_v9  ;;  %vm349_vm7 = vcmp.ge.f32.partialorder %v333_v6, 0.0  ;;  %v365_v12 = vmul.f32 0.2, %v333_v6 }
  0xf7   :  { %vm357_vm8 = vcmp.ge.f32.partialorder %v341_v7, 0.0  ;;  %v373_v13 = vmul.f32 0.2, %v341_v7  ;;  %v255_v14 = vpop.f32.mrf.mxu0  ;;  %v287_v15 = vpop.f32.mrf.mxu1 }
  0xf8   :  { %v334_v16 = vadd.f32 %v618_v28, %v311_v10  ;;  %v342_v17 = vadd.f32 %v618_v28, %v319_v11  ;;  %v381_v18 = vsel %vm349_vm7, %v333_v6, %v365_v12 }
  0xf9   :  { %v389_v19 = vsel %vm357_vm8, %v341_v7, %v373_v13  ;;  %v256_v20 = vpop.f32.mrf.mxu0  ;;  %v288_v21 = vpop.f32.mrf.mxu1  ;;  %397 = vst [vmem:[%s704_s4 + $0x18] sm:$0xff] %v381_v18 }
  0xfa   :  { %405 = vst [vmem:[%s704_s4 + $0x58] sm:$0xff] %v389_v19  ;;  %vm350_vm9 = vcmp.ge.f32.partialorder %v334_v16, 0.0  ;;  %v366_v22 = vmul.f32 0.2, %v334_v16  ;;  %vm358_vm10 = vcmp.ge.f32.partialorder %v342_v17, 0.0  ;;  %v312_v24 = vmul.f32 %v613_v26, %v256_v20 }
  0xfb   :  { %v374_v23 = vmul.f32 0.2, %v342_v17  ;;  %v320_v25 = vmul.f32 %v613_v26, %v288_v21  ;;  %v258_v27 = vpop.f32.mrf.mxu0  ;;  %v290_v29 = vpop.f32.mrf.mxu1 }
  0xfc   :  { %v382_v30 = vsel %vm350_vm9, %v334_v16, %v366_v22  ;;  %v335_v32 = vadd.f32 %v618_v28, %v312_v24 }
  0xfd   :  { %v390_v31 = vsel %vm358_vm10, %v342_v17, %v374_v23  ;;  %398 = vst [vmem:[%s704_s4 + $0x20] sm:$0xff] %v382_v30  ;;  %v343_v33 = vadd.f32 %v618_v28, %v320_v25  ;;  %v261_v34 = vpop.f32.mrf.mxu0  ;;  %v293_v35 = vpop.f32.mrf.mxu1 }
  0xfe   :  { %406 = vst [vmem:[%s704_s4 + $0x60] sm:$0xff] %v390_v31  ;;  %v313_v36 = vmul.f32 %v613_v26, %v261_v34  ;;  %v321_v37 = vmul.f32 %v613_v26, %v293_v35  ;;  %vm351_vm11 = vcmp.ge.f32.partialorder %v335_v32, 0.0  ;;  %v367_v38 = vmul.f32 0.2, %v335_v32 }
  0xff   :  { %vm359_vm12 = vcmp.ge.f32.partialorder %v343_v33, 0.0  ;;  %v375_v39 = vmul.f32 0.2, %v343_v33  ;;  %v263_v40 = vpop.f32.mrf.mxu0  ;;  %v295_v41 = vpop.f32.mrf.mxu1 }
 0x100   :  { %v336_v42 = vadd.f32 %v618_v28, %v313_v36  ;;  %v344_v43 = vadd.f32 %v618_v28, %v321_v37  ;;  %v383_v44 = vsel %vm351_vm11, %v335_v32, %v367_v38 }
 0x101   :  { %v391_v45 = vsel %vm359_vm12, %v343_v33, %v375_v39  ;;  %v264_v46 = vpop.f32.mrf.mxu0  ;;  %v296_v47 = vpop.f32.mrf.mxu1  ;;  %399 = vst [vmem:[%s704_s4 + $0x28] sm:$0xff] %v383_v44 }
 0x102   :  { %407 = vst [vmem:[%s704_s4 + $0x68] sm:$0xff] %v391_v45  ;;  %vm352_vm13 = vcmp.ge.f32.partialorder %v336_v42, 0.0  ;;  %v368_v48 = vmul.f32 0.2, %v336_v42  ;;  %vm360_vm14 = vcmp.ge.f32.partialorder %v344_v43, 0.0  ;;  %v314_v50 = vmul.f32 %v613_v26, %v264_v46 }
 0x103   :  { %v376_v49 = vmul.f32 0.2, %v344_v43  ;;  %v322_v51 = vmul.f32 %v613_v26, %v296_v47  ;;  %v266_v52 = vpop.f32.mrf.mxu0  ;;  %v298_v53 = vpop.f32.mrf.mxu1 }
 0x104   :  { %v384_v54 = vsel %vm352_vm13, %v336_v42, %v368_v48  ;;  %v337_v56 = vadd.f32 %v618_v28, %v314_v50 }
 0x105   :  { %v392_v55 = vsel %vm360_vm14, %v344_v43, %v376_v49  ;;  %400 = vst [vmem:[%s704_s4 + $0x30] sm:$0xff] %v384_v54  ;;  %v345_v57 = vadd.f32 %v618_v28, %v322_v51 }
 0x106   :  { %408 = vst [vmem:[%s704_s4 + $0x70] sm:$0xff] %v392_v55  ;;  %vm353_vm15 = vcmp.ge.f32.partialorder %v337_v56, 0.0  ;;  %v369_v58 = vmul.f32 0.2, %v337_v56 }
 0x107   :  { %vm361_vm0 = vcmp.ge.f32.partialorder %v345_v57, 0.0  ;;  %v377_v26 = vmul.f32 0.2, %v345_v57 }
 0x108   :  { %v385_v59 = vsel %vm353_vm15, %v337_v56, %v369_v58 }
 0x109   :  { %v393_v60 = vsel %vm361_vm0, %v345_v57, %v377_v26  ;;  %401 = vst [vmem:[%s704_s4 + $0x38] sm:$0xff] %v385_v59 }
 0x10a   :  { %409 = vst [vmem:[%s704_s4 + $0x78] sm:$0xff] %v393_v60 }

// kernel: tile.30
= control target key start
LH: loop header
LB: loop body
LE: loop exit
PB: predicated region body
PF: predicated region fallthrough
CT: control target
= control target key end

     0   :  { %s22_s0 = inlined_call_operand.vmem [shape: f32[16], index: 0, kind: input, shape index: {}]   ;;  %s23_s1 = inlined_call_operand.vmem [shape: f32[4,16], index: 1, kind: output, shape index: {}]  }
   0x1   :  { %v4_v0 = vld [vmem:[%s22_s0] ss:$0 sm:$0xff] }
   0x2   :  { %5 = vst [vmem:[%s23_s1] sm:$0xf] %v4_v0 }

// kernel: tile.31
= control target key start
LH: loop header
LB: loop body
LE: loop exit
PB: predicated region body
PF: predicated region fallthrough
CT: control target
= control target key end

     0   :  { %vm8_vm0 = vcmask 130048   ;;  %s40_s8 = smov 16   ;;  %s41_s9 = smov 32   ;;  %vm14_vm1 = vcmask 523648   ;;  %vm20_vm2 = vcmask 392448   ;;  %vm26_vm3 = vcmask 261248   ;;  %s58_s0 = inlined_call_operand.vmem [shape: f32[4,16], index: 0, kind: input, shape index: {}]   ;;  %s59_s1 = inlined_call_operand.vmem [shape: f32[64], index: 1, kind: output, shape index: {}]  }
   0x1   :  { %v5_v0 = vld [vmem:[%s58_s0] sm:$0xf]  ;;  %s39_s0 = smov 48  }
   0x2   :  { %6 = vst [vmem:[#allocation1] sm:$0xf] %v5_v0 }
   0x9   :  { %v11_v1 = vld [vmem:[#allocation1 + $0x3] sm:$0x1]   ;;  %v23_v2 = vld [vmem:[#allocation1 + $0x1] sm:$0x1]   ;;  %v7_v3 = vld [vmem:[#allocation1] sm:$0x1]  }
   0xa   :  { %12 = vrot.lane.b32.xlu0 %v11_v1, %s39_s0  ;;  %24 = vrot.lane.b32.xlu1 %v23_v2, %s40_s8  ;;  %v17_v4 = vld [vmem:[#allocation1 + $0x2] sm:$0x1]   ;;  %9 = vst.msk [vmem:[#allocation0] sm:$0x1] %vm8_vm0, %v7_v3  }
   0xe   :  { %18 = vrot.lane.b32.xlu0 %v17_v4, %s41_s9 }
  0x7c   :  { %v13_v5 = vpop.permute.xlu0 %12   ;;  %v25_v6 = vpop.permute.xlu1 %24  }
  0x7d   :  { %15 = vst.msk [vmem:[#allocation0] sm:$0x1] %vm14_vm1, %v13_v5  }
  0x80   :  { %v19_v7 = vpop.permute.xlu0 %18  }
  0x81   :  { %21 = vst.msk [vmem:[#allocation0] sm:$0x1] %vm20_vm2, %v19_v7  }
  0x82   :  { %27 = vst.msk [vmem:[#allocation0] sm:$0x1] %vm26_vm3, %v25_v6  }
  0x89   :  { %v32_v8 = vld [vmem:[#allocation0] sm:$0x1] }
  0x8a   :  { %35 = vst [vmem:[%s59_s1] sm:$0x1] %v32_v8 }

// kernel: _lambda_.11
= control target key start
LH: loop header
LB: loop body
LE: loop exit
PB: predicated region body
PF: predicated region fallthrough
CT: control target
= control target key end

     0   :  { %vm200_vm0 = vcmask 261120   ;;  %s556_s1 = inlined_call_operand.vmem [shape: bf16[288,128], index: 1, kind: input, shape index: {}]   ;;  %s557_s0 = inlined_call_operand.vmem [shape: bf16[32,288], index: 0, kind: input, shape index: {}]   ;;  %s558_s2 = inlined_call_operand.vmem [shape: f32[1,128], index: 2, kind: input, shape index: {}]   ;;  %s559_s3 = inlined_call_operand.vmem [shape: f32[1,128], index: 3, kind: input, shape index: {}]   ;;  %s560_s4 = inlined_call_operand.vmem [shape: f32[32,128], index: 4, kind: output, shape index: {}]  }
   0x1   :  { %v415_v0 = vld [vmem:[%s556_s1 + $0x78] sm:$0xff]   ;;  %v417_v2 = vld [vmem:[%s556_s1 + $0x70] sm:$0xff]   ;;  %v419_v4 = vld [vmem:[%s556_s1 + $0x68] sm:$0xff]  }
   0x2   :  { %v416_v1 = vld [vmem:[%s556_s1 + $0x38] sm:$0xff]   ;;  %375 = vmatprep.subr.bf16.mxu0 %v415_v0  ;;  %v418_v3 = vld [vmem:[%s556_s1 + $0x30] sm:$0xff]   ;;  %v420_v5 = vld [vmem:[%s556_s1 + $0x28] sm:$0xff]  }
   0x3   :  { %376 = vmatpush3.bf16.msra.mxu0 %v416_v1  ;;  %v421_v6 = vld [vmem:[%s556_s1 + $0x60] sm:$0xff]   ;;  %v423_v8 = vld [vmem:[%s556_s1 + $0x58] sm:$0xff]   ;;  %v429_v9 = vld [vmem:[%s556_s1 + $0x88] sm:$0xff]  }
   0x4   :  { %377 = vmatprep.subr.bf16.mxu0 %v417_v2  ;;  %v422_v7 = vld [vmem:[%s556_s1 + $0x20] sm:$0xff]   ;;  %v424_v10 = vld [vmem:[%s556_s1 + $0x18] sm:$0xff]   ;;  %v425_v11 = vld [vmem:[%s556_s1 + $0x50] sm:$0xff]   ;;  %407 = vmatprep.subr.bf16.mxu1 %v429_v9 }
   0x5   :  { %v426_v12 = vld [vmem:[%s556_s1 + $0x10] sm:$0xff]   ;;  %408 = vmatpush3.bf16.msra.mxu1 %v429_v9  ;;  %v432_v13 = vld [vmem:[%s556_s1 + $0x80] sm:$0xff]   ;;  %v427_v14 = vld [vmem:[%s556_s1 + $0x48] sm:$0xff]  }
   0x6   :  { %409 = vmatprep.subr.bf16.mxu1 %v432_v13  ;;  %v435_v15 = vld [vmem:[%s557_s0 + $0x4] ss:$12 sps:$4 sm:$0xff]   ;;  %v436_v16 = vld [vmem:[%s557_s0 + $0x8] ss:$12 sps:$4 sm:$0xff]   ;;  %v437_v17 = vld [vmem:[%s557_s0 + $0x20] ss:$12 sps:$4 sm:$0xff]  }
   0x7   :  { %378 = vmatpush3.bf16.msra.mxu0 %v418_v3  ;;  %239 = vmatprep.mubr.bf16.mxu0 %v435_v15  ;;  %v428_v18 = vld [vmem:[%s556_s1 + $0x8] sm:$0xff]   ;;  %v430_v19 = vld [vmem:[%s556_s1 + $0x40] sm:$0xff]  }
   0x8   :  { %379 = vmatprep.subr.bf16.mxu0 %v419_v4  ;;  %411 = vmatprep.mubr.msk.bf16.mxu1 %vm200_vm0, %v436_v16  ;;  %v431_v20 = vld [vmem:[%s556_s1] sm:$0xff]   ;;  %v438_v22 = vld [vmem:[%s557_s0 + $0x1c] ss:$12 sps:$4 sm:$0xff]  }
   0x9   :  { %410 = vmatpush3.bf16.msra.mxu1 %v432_v13  ;;  %v433_v21 = vld [vmem:[%s557_s0] ss:$12 sps:$4 sm:$0xff]   ;;  %v440_v23 = vld [vmem:[%s557_s0 + $0x18] ss:$12 sps:$4 sm:$0xff]  }
   0xa   :  { %v373_v31 = vld [vmem:[%s558_s2] ss:$0 sm:$0xff] }
   0xb   :  { %380 = vmatpush3.bf16.msra.mxu0 %v420_v5  ;;  %v374_v33 = vld [vmem:[%s559_s3] ss:$0 sm:$0xff] }
   0xc   :  { %381 = vmatprep.subr.bf16.mxu0 %v421_v6  ;;  %412 = vmatmul.mubr.msk.bf16.vlgmr.msra.gmra.mxu1 %vm200_vm0, %v437_v17 }
   0xf   :  { %382 = vmatpush3.bf16.msra.mxu0 %v422_v7 }
  0x10   :  { %383 = vmatprep.subr.bf16.mxu0 %v423_v8 }
  0x13   :  { %384 = vmatpush3.bf16.msra.mxu0 %v424_v10 }
  0x14   :  { %385 = vmatprep.subr.bf16.mxu0 %v425_v11 }
  0x17   :  { %386 = vmatpush3.bf16.msra.mxu0 %v426_v12 }
  0x18   :  { %387 = vmatprep.subr.bf16.mxu0 %v427_v14 }
  0x1b   :  { %388 = vmatpush3.bf16.msra.mxu0 %v428_v18 }
  0x1c   :  { %389 = vmatprep.subr.bf16.mxu0 %v430_v19 }
  0x1f   :  { %390 = vmatpush3.bf16.msra.mxu0 %v431_v20 }
  0x22   :  { %240 = vmatmul.mubr.bf16.vlgmr.msra.gmra.mxu0 %v433_v21 }
  0x23   :  { %247 = vmatprep.mubr.bf16.mxu0 %v438_v22 }
  0x2a   :  { %248 = vmatmul.mubr.bf16.gmra.mxu0 %v440_v23 }
  0xcc   :  { %v413_v24 = vpop.f32.mrf.mxu1 }
  0xce   :  { %v290_v25 = vpop.f32.mrf.mxu1 }
  0xd0   :  { %v414_v28 = vpop.f32.mrf.mxu1 }
  0xd2   :  { %v293_v35 = vpop.f32.mrf.mxu1 }
  0xe2   :  { %v391_v26 = vpop.f32.mrf.mxu0 }
  0xe4   :  { %v392_v27 = vpop.f32.mrf.mxu0 }
  0xe5   :  { %v393_v29 = vadd.f32 %v392_v27, %v391_v26 }
  0xe6   :  { %v394_v30 = vpop.f32.mrf.mxu0 }
  0xe7   :  { %v291_v32 = vadd.f32 %v393_v29, %v290_v25 }
  0xe8   :  { %v395_v34 = vpop.f32.mrf.mxu0 }
  0xe9   :  { %v312_v36 = vmul.f32 %v373_v31, %v291_v32  ;;  %v396_v37 = vadd.f32 %v395_v34, %v394_v30 }
  0xea   :  { %v397_v38 = vpop.f32.mrf.mxu0 }
  0xeb   :  { %v323_v39 = vadd.f32 %v374_v33, %v312_v36  ;;  %v294_v40 = vadd.f32 %v396_v37, %v293_v35 }
  0xec   :  { %v398_v41 = vpop.f32.mrf.mxu0 }
  0xed   :  { %vm327_vm1 = vcmp.ge.f32.partialorder %v323_v39, 0.0  ;;  %v331_v42 = vmul.f32 0.2, %v323_v39  ;;  %v313_v43 = vmul.f32 %v373_v31, %v294_v40  ;;  %v399_v44 = vadd.f32 %v398_v41, %v397_v38 }
  0xee   :  { %v400_v45 = vpop.f32.mrf.mxu0 }
  0xef   :  { %v335_v46 = vsel %vm327_vm1, %v323_v39, %v331_v42  ;;  %v324_v47 = vadd.f32 %v374_v33, %v313_v43  ;;  %v299_v48 = vadd.f32 %v413_v24, %v399_v44 }
  0xf0   :  { %339 = vst [vmem:[%s560_s4] sm:$0xff] %v335_v46  ;;  %v401_v49 = vpop.f32.mrf.mxu0 }
  0xf1   :  { %vm328_vm2 = vcmp.ge.f32.partialorder %v324_v47, 0.0  ;;  %v332_v50 = vmul.f32 0.2, %v324_v47  ;;  %v314_v51 = vmul.f32 %v373_v31, %v299_v48  ;;  %v402_v52 = vadd.f32 %v401_v49, %v400_v45 }
  0xf3   :  { %v336_v53 = vsel %vm328_vm2, %v324_v47, %v332_v50  ;;  %v325_v54 = vadd.f32 %v374_v33, %v314_v51  ;;  %v302_v55 = vadd.f32 %v414_v28, %v402_v52 }
  0xf4   :  { %340 = vst [vmem:[%s560_s4 + $0x8] sm:$0xff] %v336_v53 }
  0xf5   :  { %vm329_vm3 = vcmp.ge.f32.partialorder %v325_v54, 0.0  ;;  %v333_v56 = vmul.f32 0.2, %v325_v54  ;;  %v315_v57 = vmul.f32 %v373_v31, %v302_v55 }
  0xf7   :  { %v337_v58 = vsel %vm329_vm3, %v325_v54, %v333_v56  ;;  %v326_v59 = vadd.f32 %v374_v33, %v315_v57 }
  0xf8   :  { %341 = vst [vmem:[%s560_s4 + $0x10] sm:$0xff] %v337_v58 }
  0xf9   :  { %vm330_vm4 = vcmp.ge.f32.partialorder %v326_v59, 0.0  ;;  %v334_v60 = vmul.f32 0.2, %v326_v59 }
  0xfb   :  { %v338_v61 = vsel %vm330_vm4, %v326_v59, %v334_v60 }
  0xfc   :  { %342 = vst [vmem:[%s560_s4 + $0x18] sm:$0xff] %v338_v61 }

// kernel: tile.22
= control target key start
LH: loop header
LB: loop body
LE: loop exit
PB: predicated region body
PF: predicated region fallthrough
CT: control target
= control target key end

     0   :  { %s22_s0 = inlined_call_operand.vmem [shape: f32[64], index: 0, kind: input, shape index: {}]   ;;  %s23_s1 = inlined_call_operand.vmem [shape: f32[4,64], index: 1, kind: output, shape index: {}]  }
   0x1   :  { %v4_v0 = vld [vmem:[%s22_s0] ss:$0 sm:$0xff] }
   0x2   :  { %5 = vst [vmem:[%s23_s1] sm:$0xf] %v4_v0 }

// kernel: tile.23
= control target key start
LH: loop header
LB: loop body
LE: loop exit
PB: predicated region body
PF: predicated region fallthrough
CT: control target
= control target key end

     0   :  { %s7_s8 = smov 3  ;;  %vm9_vm0 = vcmask 523264   ;;  %s34_s9 = smov 64   ;;  %vm16_vm1 = vcmask 1048064   ;;  %s54_s0 = inlined_call_operand.vmem [shape: f32[4,64], index: 0, kind: input, shape index: {}]   ;;  %s55_s1 = inlined_call_operand.vmem [shape: f32[1,256], index: 1, kind: output, shape index: {}]  }
   0x1   :  { %v5_v0 = vld [vmem:[%s54_s0] sm:$0xf]  ;;  %s12_s0 = smov 3 }
   0x2   :  { %6 = vst [vmem:[#allocation1] sm:$0xf] %v5_v0 }
   0x9   :  { %v13_v1 = vld [vmem:[#allocation1 + $0x1] ss:$2 sm:%s12_s0]   ;;  %v8_v2 = vld [vmem:[#allocation1] ss:$2 sm:%s7_s8]  }
   0xa   :  { %14 = vrot.lane.b32.xlu0 %v13_v1, %s34_s9  ;;  %10 = vst.msk [vmem:[#allocation0] ss:$8 sm:$0x3] %vm9_vm0, %v8_v2  }
  0x7c   :  { %v15_v3 = vpop.permute.xlu0 %14  }
  0x7d   :  { %17 = vst.msk [vmem:[#allocation0] ss:$8 sm:$0x3] %vm16_vm1, %v15_v3  }
  0x84   :  { %v22_v4 = vld [vmem:[#allocation0] sm:$0x1]  ;;  %v27_v5 = vld [vmem:[#allocation0 + $0x8] sm:$0x1] }
  0x85   :  { %25 = vst [vmem:[%s55_s1] sm:$0x1] %v22_v4  ;;  %32 = vst [vmem:[%s55_s1 + $0x1] sm:$0x1] %v27_v5 }

// kernel: tile.19
= control target key start
LH: loop header
LB: loop body
LE: loop exit
PB: predicated region body
PF: predicated region fallthrough
CT: control target
= control target key end

     0   :  { %s26_s0 = inlined_call_operand.<no memory space> [shape: f32[], index: 0, kind: input, shape index: {}]   ;;  %s27_s1 = inlined_call_operand.vmem [shape: f32[1,256], index: 1, kind: output, shape index: {}]  }
   0x1   :  { %v2_v0 = vstv %s26_s0 }
   0x2   :  { %3 = vst [vmem:[%s27_s1] sm:$0x1] %v2_v0  ;;  %6 = vst [vmem:[%s27_s1 + $0x1] sm:$0x1] %v2_v0 }

// kernel: _lambda_.13
= control target key start
LH: loop header
LB: loop body
LE: loop exit
PB: predicated region body
PF: predicated region fallthrough
CT: control target
= control target key end

     0   :  { %vm35_vm0 = vcmask 523264   ;;  %v427_v0 = vmov 0.0   ;;  %vm428_vm1 = vmmov 0   ;;  %v167_v23 = vlaneseq  ;;  %s593_s1 = inlined_call_operand.vmem [shape: f32[128,64], index: 1, kind: input, shape index: {}]   ;;  %s594_s0 = inlined_call_operand.vmem [shape: f32[8,64], index: 0, kind: input, shape index: {}]   ;;  %s595_s2 = inlined_call_operand.vmem [shape: f32[1,128], index: 2, kind: input, shape index: {}]   ;;  %s596_s4 = inlined_call_operand.vmem [shape: f32[1,128], index: 4, kind: output, shape index: {1}]   ;;  %s597_s5 = inlined_call_operand.vmem [shape: f32[1,64], index: 5, kind: output, shape index: {2}]   ;;  %s598_s3 = inlined_call_operand.vmem [shape: f32[8,64], index: 3, kind: output, shape index: {0}]  }
   0x1   :  { %354 = vmatprep.subr.mxu0 %v427_v0  ;;  %v33_v1 = vld [vmem:[%s593_s1 + $0x78] sm:$0xff]  ;;  %386 = vmatprep.mubr.msk.f32.mxu0 %vm428_vm1, %v427_v0  ;;  %v32_v2 = vld [vmem:[%s593_s1 + $0x70] sm:$0xff]  ;;  %v31_v3 = vld [vmem:[%s593_s1 + $0x68] sm:$0xff]  ;;  %264 = vst [vmem:[%s596_s4] sm:$0x1] %v427_v0  ;;  %v429_v39 = vmov 1.0   ;;  %vm265_vm5 = vcmask 516096  }
   0x2   :  { %355 = vmatpush3.xpose.msk.msra.mxu0 %vm35_vm0, %v33_v1  ;;  %389 = vmatprep.subr.mxu1 %v427_v0  ;;  %v30_v4 = vld [vmem:[%s593_s1 + $0x60] sm:$0xff]  ;;  %v29_v5 = vld [vmem:[%s593_s1 + $0x58] sm:$0xff]  ;;  %v28_v6 = vld [vmem:[%s593_s1 + $0x50] sm:$0xff]  ;;  %v168_v24 = vand.u32 127, %v167_v23  ;;  %266 = vst.msk [vmem:[%s597_s5] sm:$0x1] %vm265_vm5, %v427_v0 }
   0x3   :  { %356 = vmatprep.subr.mxu0 %v427_v0  ;;  %390 = vmatpush3.msra.mxu1 %v33_v1  ;;  %v27_v7 = vld [vmem:[%s593_s1 + $0x48] sm:$0xff]  ;;  %v26_v8 = vld [vmem:[%s593_s1 + $0x40] sm:$0xff]  ;;  %v25_v9 = vld [vmem:[%s593_s1 + $0x38] sm:$0xff] }
   0x4   :  { %391 = vmatprep.subr.mxu1 %v427_v0  ;;  %421 = vmatprep.mubr.msk.f32.mxu1 %vm428_vm1, %v427_v0  ;;  %v24_v10 = vld [vmem:[%s593_s1 + $0x30] sm:$0xff]  ;;  %v23_v11 = vld [vmem:[%s593_s1 + $0x28] sm:$0xff]  ;;  %v22_v12 = vld [vmem:[%s593_s1 + $0x20] sm:$0xff] }
   0x5   :  { %392 = vmatpush3.msra.mxu1 %v32_v2  ;;  %v21_v13 = vld [vmem:[%s593_s1 + $0x18] sm:$0xff]  ;;  %v20_v14 = vld [vmem:[%s593_s1 + $0x10] sm:$0xff]  ;;  %v19_v15 = vld [vmem:[%s593_s1 + $0x8] sm:$0xff] }
   0x6   :  { %357 = vmatpush3.xpose.msk.msra.mxu0 %vm35_vm0, %v32_v2  ;;  %393 = vmatprep.subr.mxu1 %v427_v0  ;;  %v18_v16 = vld [vmem:[%s593_s1] sm:$0xff] }
   0x7   :  { %358 = vmatprep.subr.mxu0 %v427_v0  ;;  %394 = vmatpush3.msra.mxu1 %v31_v3  ;;  %v17_v17 = vld [vmem:[%s594_s0] sm:$0xff] }
   0x8   :  { %395 = vmatprep.subr.mxu1 %v427_v0  ;;  %v317_v19 = vld [vmem:[%s595_s2] ss:$0 sm:$0xff] }
   0x9   :  { %396 = vmatpush3.msra.mxu1 %v30_v4  ;;  %v267_v45 = vld [vmem:[%s596_s4] sm:$0x1] }
   0xa   :  { %359 = vmatpush3.xpose.msk.msra.mxu0 %vm35_vm0, %v31_v3  ;;  %397 = vmatprep.subr.mxu1 %v427_v0  ;;  %v276_v58 = vld [vmem:[%s597_s5] sm:$0x1] }
   0xb   :  { %360 = vmatprep.subr.mxu0 %v427_v0  ;;  %398 = vmatpush3.msra.mxu1 %v29_v5 }
   0xc   :  { %399 = vmatprep.subr.mxu1 %v427_v0 }
   0xd   :  { %400 = vmatpush3.msra.mxu1 %v28_v6 }
   0xe   :  { %361 = vmatpush3.xpose.msk.msra.mxu0 %vm35_vm0, %v30_v4  ;;  %401 = vmatprep.subr.mxu1 %v427_v0 }
   0xf   :  { %362 = vmatprep.subr.mxu0 %v427_v0  ;;  %402 = vmatpush3.msra.mxu1 %v27_v7 }
  0x10   :  { %403 = vmatprep.subr.mxu1 %v427_v0 }
  0x11   :  { %404 = vmatpush3.msra.mxu1 %v26_v8 }
  0x12   :  { %363 = vmatpush3.xpose.msk.msra.mxu0 %vm35_vm0, %v29_v5  ;;  %405 = vmatprep.subr.mxu1 %v427_v0 }
  0x13   :  { %364 = vmatprep.subr.mxu0 %v427_v0  ;;  %406 = vmatpush3.msra.mxu1 %v25_v9 }
  0x14   :  { %407 = vmatprep.subr.mxu1 %v427_v0 }
  0x15   :  { %408 = vmatpush3.msra.mxu1 %v24_v10 }
  0x16   :  { %365 = vmatpush3.xpose.msk.msra.mxu0 %vm35_vm0, %v28_v6  ;;  %409 = vmatprep.subr.mxu1 %v427_v0 }
  0x17   :  { %366 = vmatprep.subr.mxu0 %v427_v0  ;;  %410 = vmatpush3.msra.mxu1 %v23_v11 }
  0x18   :  { %411 = vmatprep.subr.mxu1 %v427_v0 }
  0x19   :  { %412 = vmatpush3.msra.mxu1 %v22_v12 }
  0x1a   :  { %367 = vmatpush3.xpose.msk.msra.mxu0 %vm35_vm0, %v27_v7  ;;  %413 = vmatprep.subr.mxu1 %v427_v0 }
  0x1b   :  { %368 = vmatprep.subr.mxu0 %v427_v0  ;;  %414 = vmatpush3.msra.mxu1 %v21_v13 }
  0x1c   :  { %415 = vmatprep.subr.mxu1 %v427_v0 }
  0x1d   :  { %416 = vmatpush3.msra.mxu1 %v20_v14 }
  0x1e   :  { %369 = vmatpush3.xpose.msk.msra.mxu0 %vm35_vm0, %v26_v8  ;;  %417 = vmatprep.subr.mxu1 %v427_v0 }
  0x1f   :  { %370 = vmatprep.subr.mxu0 %v427_v0  ;;  %418 = vmatpush3.msra.mxu1 %v19_v15 }
  0x20   :  { %419 = vmatprep.subr.mxu1 %v427_v0 }
  0x21   :  { %420 = vmatpush3.msra.mxu1 %v18_v16 }
  0x22   :  { %371 = vmatpush3.xpose.msk.msra.mxu0 %vm35_vm0, %v25_v9 }
  0x23   :  { %372 = vmatprep.subr.mxu0 %v427_v0 }
  0x26   :  { %373 = vmatpush3.xpose.msk.msra.mxu0 %vm35_vm0, %v24_v10 }
  0x27   :  { %374 = vmatprep.subr.mxu0 %v427_v0 }
  0x2a   :  { %375 = vmatpush3.xpose.msk.msra.mxu0 %vm35_vm0, %v23_v11 }
  0x2b   :  { %376 = vmatprep.subr.mxu0 %v427_v0 }
  0x2e   :  { %377 = vmatpush3.xpose.msk.msra.mxu0 %vm35_vm0, %v22_v12 }
  0x2f   :  { %378 = vmatprep.subr.mxu0 %v427_v0 }
  0x32   :  { %379 = vmatpush3.xpose.msk.msra.mxu0 %vm35_vm0, %v21_v13 }
  0x33   :  { %380 = vmatprep.subr.mxu0 %v427_v0 }
  0x36   :  { %381 = vmatpush3.xpose.msk.msra.mxu0 %vm35_vm0, %v20_v14 }
  0x37   :  { %382 = vmatprep.subr.mxu0 %v427_v0 }
  0x3a   :  { %383 = vmatpush3.xpose.msk.msra.mxu0 %vm35_vm0, %v19_v15 }
  0x3b   :  { %384 = vmatprep.subr.mxu0 %v427_v0 }
  0x3e   :  { %385 = vmatpush3.xpose.msk.msra.mxu0 %vm35_vm0, %v18_v16 }
  0x41   :  { %387 = vmatmul.mubr.msk.f32.vlgmr.msra.gmra.mxu0 %vm35_vm0, %v17_v17 }
 0x101   :  { %v153_v18 = vpop.f32.mrf.mxu0 }
 0x102   :  { %v157_v20 = vmul.f32 2.0, %v153_v18 }
 0x103   :  { %v388_v21 = vpop.f32.mrf.mxu0 }
 0x104   :  { %v164_v22 = vsub.f32 %v317_v19, %v157_v20 }
 0x106   :  { %165 = vmin.xlane.f32.xlu0 %v164_v22 }
 0x18f   :  { %v166_v25 = vpop.xlane.xlu0 %165 }
 0x190   :  { %vm169_vm2 = vcmp.le.f32.partialorder %v164_v22, %v166_v25 }
 0x191   :  { %v170_v26 = vsel %vm169_vm2, %v168_v24, 128 }
 0x192   :  { %v172_v27 = vshra.s32 %v170_v26, 16  ;;  %v171_v29 = vand.u32 65535, %v170_v26 }
 0x194   :  { %v174_v28 = vcvt.s32.f32 %v172_v27  ;;  %v173_v31 = vcvt.s32.f32 %v171_v29 }
 0x196   :  { %175 = vmin.xlane.f32.xlu0 %v174_v28 }
 0x21f   :  { %v176_v30 = vpop.xlane.xlu0 %175 }
 0x220   :  { %vm177_vm3 = vcmp.eq.f32.partialorder %v174_v28, %v176_v30  ;;  %v182_v33 = vcvt.f32.s32 %v176_v30 }
 0x221   :  { %v178_v32 = vsel %vm177_vm3, %v173_v31, inf }
 0x222   :  { %179 = vmin.xlane.f32.xlu1 %v178_v32  ;;  %v183_v35 = vshll.u32 %v182_v33, 16 }
 0x2ab   :  { %v180_v34 = vpop.xlane.xlu1 %179 }
 0x2ac   :  { %v181_v36 = vcvt.f32.s32 %v180_v34 }
 0x2ae   :  { %v184_v37 = vadd.s32 %v183_v35, %v181_v36 }
 0x2b0   :  { %vm185_vm4 = vcmp.eq.s32.totalorder %v168_v24, %v184_v37 }
 0x2b1   :  { %v318_v38 = vsel %vm185_vm4, 1.0, %v427_v0  ;;  %422 = vmatmul.mubr.msk.f32.vlgmr.msra.gmra.mxu1 %vm185_vm4, %v429_v39 }
 0x2b2   :  { %v268_v40 = vrot.slane %v318_v38, 4 }
 0x2b4   :  { %v269_v41 = vadd.f32 %v318_v38, %v268_v40 }
 0x2b6   :  { %v270_v42 = vrot.slane %v269_v41, 2 }
 0x2b8   :  { %v271_v43 = vadd.f32 %v270_v42, %v269_v41 }
 0x2ba   :  { %v272_v44 = vrot.slane %v271_v43, 1 }
 0x2bc   :  { %v273_v46 = vadd.f32 %v272_v44, %v271_v43 }
 0x2be   :  { %v274_v47 = vadd.f32 %v273_v46, %v267_v45 }
 0x2c0   :  { %275 = vst [vmem:[%s596_s4] sm:$0x1] %v274_v47 }
 0x371   :  { %v254_v48 = vpop.f32.mrf.mxu1 }
 0x372   :  { %258 = vst.msk [vmem:[%s598_s3] sm:$0xff] %vm35_vm0, %v254_v48  ;;  %v259_v49 = vsub.f32 %v17_v17, %v254_v48 }
 0x373   :  { %v423_v50 = vpop.f32.mrf.mxu1 }
 0x374   :  { %v277_v51 = vmul.f32 %v259_v49, %v259_v49 }
 0x376   :  { %v278_v52 = vsel %vm35_vm0, %v277_v51, 0.0 }
 0x377   :  { %v279_v53 = vrot.slane %v278_v52, 4 }
 0x379   :  { %v280_v54 = vadd.f32 %v279_v53, %v278_v52 }
 0x37b   :  { %v281_v55 = vrot.slane %v280_v54, 2 }
 0x37d   :  { %v282_v56 = vadd.f32 %v281_v55, %v280_v54 }
 0x37f   :  { %v283_v57 = vrot.slane %v282_v56, 1 }
 0x381   :  { %v284_v59 = vadd.f32 %v283_v57, %v282_v56 }
 0x383   :  { %v285_v60 = vadd.f32 %v284_v59, %v276_v58 }
 0x385   :  { %287 = vst.msk [vmem:[%s597_s5] sm:$0x1] %vm265_vm5, %v285_v60 }

// kernel: _lambda_.12
= control target key start
LH: loop header
LB: loop body
LE: loop exit
PB: predicated region body
PF: predicated region fallthrough
CT: control target
= control target key end

     0   :  { %v622_v36 = vmov 0.0   ;;  %vm623_vm0 = vmmov 0   ;;  %vm326_vm1 = vcmask 523264   ;;  %s775_s1 = inlined_call_operand.vmem [shape: bf16[576,128], index: 1, kind: input, shape index: {}]   ;;  %s776_s0 = inlined_call_operand.vmem [shape: bf16[8,576], index: 0, kind: input, shape index: {}]   ;;  %s777_s2 = inlined_call_operand.vmem [shape: f32[1,128], index: 2, kind: input, shape index: {}]   ;;  %s778_s3 = inlined_call_operand.vmem [shape: f32[1,128], index: 3, kind: input, shape index: {}]   ;;  %s779_s4 = inlined_call_operand.vmem [shape: f32[8,128], index: 4, kind: output, shape index: {}]  }
   0x1   :  { %v581_v0 = vld [vmem:[%s775_s1 + $0x78] sm:$0xff]   ;;  %v585_v4 = vld [vmem:[%s775_s1 + $0x70] sm:$0xff]   ;;  %v589_v8 = vld [vmem:[%s775_s1 + $0x68] sm:$0xff]  }
   0x2   :  { %v582_v1 = vld [vmem:[%s775_s1 + $0xf8] sm:$0xff]   ;;  %518 = vmatprep.subr.bf16.mxu0 %v581_v0  ;;  %v586_v5 = vld [vmem:[%s775_s1 + $0xf0] sm:$0xff]   ;;  %v590_v9 = vld [vmem:[%s775_s1 + $0xe8] sm:$0xff]  }
   0x3   :  { %v583_v2 = vld [vmem:[%s775_s1 + $0x38] sm:$0xff]   ;;  %540 = vmatprep.subr.bf16.mxu1 %v582_v1  ;;  %v587_v6 = vld [vmem:[%s775_s1 + $0x30] sm:$0xff]   ;;  %v591_v10 = vld [vmem:[%s775_s1 + $0x28] sm:$0xff]  }
   0x4   :  { %v584_v3 = vld [vmem:[%s775_s1 + $0xb8] sm:$0xff]   ;;  %519 = vmatpush3.bf16.msra.mxu0 %v583_v2  ;;  %v588_v7 = vld [vmem:[%s775_s1 + $0xb0] sm:$0xff]   ;;  %v592_v11 = vld [vmem:[%s775_s1 + $0xa8] sm:$0xff]  }
   0x5   :  { %541 = vmatpush3.bf16.msra.mxu1 %v584_v3  ;;  %520 = vmatprep.subr.bf16.mxu0 %v585_v4  ;;  %v593_v12 = vld [vmem:[%s775_s1 + $0x60] sm:$0xff]   ;;  %v597_v16 = vld [vmem:[%s775_s1 + $0x58] sm:$0xff]   ;;  %v601_v20 = vld [vmem:[%s775_s1 + $0x50] sm:$0xff]  }
   0x6   :  { %542 = vmatprep.subr.bf16.mxu1 %v586_v5  ;;  %v594_v13 = vld [vmem:[%s775_s1 + $0xe0] sm:$0xff]   ;;  %v598_v17 = vld [vmem:[%s775_s1 + $0xd8] sm:$0xff]   ;;  %v602_v21 = vld [vmem:[%s775_s1 + $0xd0] sm:$0xff]  }
   0x7   :  { %v595_v14 = vld [vmem:[%s775_s1 + $0x20] sm:$0xff]   ;;  %v599_v18 = vld [vmem:[%s775_s1 + $0x18] sm:$0xff]   ;;  %v603_v22 = vld [vmem:[%s775_s1 + $0x10] sm:$0xff]  }
   0x8   :  { %521 = vmatpush3.bf16.msra.mxu0 %v587_v6  ;;  %v596_v15 = vld [vmem:[%s775_s1 + $0xa0] sm:$0xff]   ;;  %v600_v19 = vld [vmem:[%s775_s1 + $0x98] sm:$0xff]   ;;  %v604_v23 = vld [vmem:[%s775_s1 + $0x90] sm:$0xff]  }
   0x9   :  { %543 = vmatpush3.bf16.msra.mxu1 %v588_v7  ;;  %522 = vmatprep.subr.bf16.mxu0 %v589_v8  ;;  %v605_v24 = vld [vmem:[%s775_s1 + $0x48] sm:$0xff]   ;;  %v609_v28 = vld [vmem:[%s775_s1 + $0x40] sm:$0xff]   ;;  %v618_v39 = vld [vmem:[%s775_s1 + $0x118] sm:$0xff]  }
   0xa   :  { %544 = vmatprep.subr.bf16.mxu1 %v590_v9  ;;  %v606_v25 = vld [vmem:[%s775_s1 + $0xc8] sm:$0xff]   ;;  %v610_v29 = vld [vmem:[%s775_s1 + $0xc0] sm:$0xff]   ;;  %v619_v40 = vld [vmem:[%s775_s1 + $0x110] sm:$0xff]  }
   0xb   :  { %v607_v26 = vld [vmem:[%s775_s1 + $0x8] sm:$0xff]   ;;  %v611_v30 = vld [vmem:[%s775_s1] sm:$0xff]   ;;  %v615_v43 = vld [vmem:[%s776_s0 + $0x10] ss:$0 sps:$4 sm:$0xff]  }
   0xc   :  { %523 = vmatpush3.bf16.msra.mxu0 %v591_v10  ;;  %v608_v27 = vld [vmem:[%s775_s1 + $0x88] sm:$0xff]   ;;  %v612_v31 = vld [vmem:[%s775_s1 + $0x80] sm:$0xff]  }
   0xd   :  { %545 = vmatpush3.bf16.msra.mxu1 %v592_v11  ;;  %524 = vmatprep.subr.bf16.mxu0 %v593_v12  ;;  %v18_v32 = vld [vmem:[%s776_s0] sm:$0xff]  ;;  %v19_v35 = vld [vmem:[%s776_s0 + $0x8] sm:$0xff] }
   0xe   :  { %546 = vmatprep.subr.bf16.mxu1 %v594_v13  ;;  %v474_v33 = vcombine.low %v18_v32, %v18_v32  ;;  %v475_v34 = vcombine.high %v18_v32, %v18_v32  ;;  %v476_v37 = vcombine.low %v19_v35, %v19_v35  ;;  %v477_v38 = vcombine.high %v19_v35, %v19_v35  ;;  %v620_v41 = vld [vmem:[%s775_s1 + $0x108] sm:$0xff]   ;;  %v621_v42 = vld [vmem:[%s775_s1 + $0x100] sm:$0xff]  }
   0xf   :  { %v516_v56 = vld [vmem:[%s777_s2] ss:$0 sm:$0xff] }
  0x10   :  { %525 = vmatpush3.bf16.msra.mxu0 %v595_v14  ;;  %362 = vmatprep.mubr.bf16.mxu0 %v475_v34  ;;  %v517_v58 = vld [vmem:[%s778_s3] ss:$0 sm:$0xff] }
  0x11   :  { %547 = vmatpush3.bf16.msra.mxu1 %v596_v15  ;;  %526 = vmatprep.subr.bf16.mxu0 %v597_v16 }
  0x12   :  { %548 = vmatprep.subr.bf16.mxu1 %v598_v17  ;;  %402 = vmatprep.mubr.bf16.mxu1 %v477_v38 }
  0x14   :  { %527 = vmatpush3.bf16.msra.mxu0 %v599_v18 }
  0x15   :  { %549 = vmatpush3.bf16.msra.mxu1 %v600_v19  ;;  %528 = vmatprep.subr.bf16.mxu0 %v601_v20 }
  0x16   :  { %550 = vmatprep.subr.bf16.mxu1 %v602_v21 }
  0x18   :  { %529 = vmatpush3.bf16.msra.mxu0 %v603_v22 }
  0x19   :  { %551 = vmatpush3.bf16.msra.mxu1 %v604_v23  ;;  %530 = vmatprep.subr.bf16.mxu0 %v605_v24 }
  0x1a   :  { %552 = vmatprep.subr.bf16.mxu1 %v606_v25 }
  0x1c   :  { %531 = vmatpush3.bf16.msra.mxu0 %v607_v26 }
  0x1d   :  { %553 = vmatpush3.bf16.msra.mxu1 %v608_v27  ;;  %532 = vmatprep.subr.bf16.mxu0 %v609_v28 }
  0x1e   :  { %554 = vmatprep.subr.bf16.mxu1 %v610_v29 }
  0x20   :  { %533 = vmatpush3.bf16.msra.mxu0 %v611_v30 }
  0x21   :  { %555 = vmatpush3.bf16.msra.mxu1 %v612_v31  ;;  %567 = vmatprep.subr.bf16.mxu0 %v622_v36 }
  0x23   :  { %363 = vmatmul.mubr.bf16.vlgmr.msra.gmra.mxu0 %v474_v33 }
  0x24   :  { %403 = vmatmul.mubr.bf16.vlgmr.msra.gmra.mxu1 %v476_v37  ;;  %568 = vmatpush3.bf16.msra.mxu0 %v618_v39 }
  0x25   :  { %569 = vmatprep.subr.bf16.mxu0 %v622_v36  ;;  %575 = vmatprep.mubr.msk.bf16.mxu0 %vm623_vm0, %v622_v36 }
  0x28   :  { %570 = vmatpush3.bf16.msra.mxu0 %v619_v40 }
  0x29   :  { %571 = vmatprep.subr.bf16.mxu0 %v622_v36 }
  0x2c   :  { %572 = vmatpush3.bf16.msra.mxu0 %v620_v41 }
  0x2d   :  { %573 = vmatprep.subr.bf16.mxu0 %v622_v36 }
  0x30   :  { %574 = vmatpush3.bf16.msra.mxu0 %v621_v42 }
  0x33   :  { %576 = vmatmul.mubr.msk.bf16.vlgmr.msra.gmra.mxu0 %vm326_vm1, %v615_v43 }
  0xe3   :  { %v534_v44 = vpop.f32.mrf.mxu0 }
  0xe4   :  { %v556_v45 = vpop.f32.mrf.mxu1 }
  0xe5   :  { %v535_v46 = vpop.f32.mrf.mxu0 }
  0xe6   :  { %v557_v47 = vpop.f32.mrf.mxu1  ;;  %v536_v52 = vadd.f32 %v535_v46, %v534_v44 }
  0xe7   :  { %v537_v48 = vpop.f32.mrf.mxu0  ;;  %v558_v53 = vadd.f32 %v557_v47, %v556_v45 }
  0xe8   :  { %v559_v49 = vpop.f32.mrf.mxu1 }
  0xe9   :  { %v538_v50 = vpop.f32.mrf.mxu0  ;;  %v405_v54 = vadd.f32 %v558_v53, %v536_v52 }
  0xea   :  { %v560_v51 = vpop.f32.mrf.mxu1 }
  0xf3   :  { %v444_v55 = vpop.f32.mrf.mxu0 }
  0xf4   :  { %v445_v57 = vadd.f32 %v444_v55, %v405_v54 }
  0xf5   :  { %v577_v59 = vpop.f32.mrf.mxu0 }
  0xf6   :  { %v457_v60 = vmul.f32 %v516_v56, %v445_v57 }
  0xf7   :  { %v447_v61 = vpop.f32.mrf.mxu0 }
  0xf8   :  { %v465_v62 = vadd.f32 %v517_v58, %v457_v60 }
  0xf9   :  { %v578_v63 = vpop.f32.mrf.mxu0 }
  0xfa   :  { %vm466_vm2 = vcmp.ge.f32.partialorder %v465_v62, 0.0  ;;  %v467_v0 = vmul.f32 0.2, %v465_v62 }
  0xfc   :  { %v468_v1 = vsel %vm466_vm2, %v465_v62, %v467_v0 }
  0xfd   :  { %469 = vst [vmem:[%s779_s4] sm:$0xff] %v468_v1 }

// kernel: tile.26
= control target key start
LH: loop header
LB: loop body
LE: loop exit
PB: predicated region body
PF: predicated region fallthrough
CT: control target
= control target key end

     0   :  { %s22_s0 = inlined_call_operand.vmem [shape: f32[32], index: 0, kind: input, shape index: {}]   ;;  %s23_s1 = inlined_call_operand.vmem [shape: f32[4,32], index: 1, kind: output, shape index: {}]  }
   0x1   :  { %v4_v0 = vld [vmem:[%s22_s0] ss:$0 sm:$0xff] }
   0x2   :  { %5 = vst [vmem:[%s23_s1] sm:$0xf] %v4_v0 }

// kernel: tile.27
= control target key start
LH: loop header
LB: loop body
LE: loop exit
PB: predicated region body
PF: predicated region fallthrough
CT: control target
= control target key end

     0   :  { %vm8_vm0 = vcmask 261120   ;;  %s40_s8 = smov 32   ;;  %s41_s9 = smov 64   ;;  %vm14_vm1 = vcmask 1048320   ;;  %vm20_vm2 = vcmask 785920   ;;  %vm26_vm3 = vcmask 523520   ;;  %s58_s0 = inlined_call_operand.vmem [shape: f32[4,32], index: 0, kind: input, shape index: {}]   ;;  %s59_s1 = inlined_call_operand.vmem [shape: f32[1,128], index: 1, kind: output, shape index: {}]  }
   0x1   :  { %v5_v0 = vld [vmem:[%s58_s0] sm:$0xf]  ;;  %s39_s0 = smov 96  }
   0x2   :  { %6 = vst [vmem:[#allocation1] sm:$0xf] %v5_v0 }
   0x9   :  { %v11_v1 = vld [vmem:[#allocation1 + $0x3] sm:$0x1]   ;;  %v23_v2 = vld [vmem:[#allocation1 + $0x1] sm:$0x1]   ;;  %v7_v3 = vld [vmem:[#allocation1] sm:$0x1]  }
   0xa   :  { %12 = vrot.lane.b32.xlu0 %v11_v1, %s39_s0  ;;  %24 = vrot.lane.b32.xlu1 %v23_v2, %s40_s8  ;;  %v17_v4 = vld [vmem:[#allocation1 + $0x2] sm:$0x1]   ;;  %9 = vst.msk [vmem:[#allocation0] sm:$0x1] %vm8_vm0, %v7_v3  }
   0xe   :  { %18 = vrot.lane.b32.xlu0 %v17_v4, %s41_s9 }
  0x7c   :  { %v13_v5 = vpop.permute.xlu0 %12   ;;  %v25_v6 = vpop.permute.xlu1 %24  }
  0x7d   :  { %15 = vst.msk [vmem:[#allocation0] sm:$0x1] %vm14_vm1, %v13_v5  }
  0x80   :  { %v19_v7 = vpop.permute.xlu0 %18  }
  0x81   :  { %21 = vst.msk [vmem:[#allocation0] sm:$0x1] %vm20_vm2, %v19_v7  }
  0x82   :  { %27 = vst.msk [vmem:[#allocation0] sm:$0x1] %vm26_vm3, %v25_v6  }
  0x89   :  { %v32_v8 = vld [vmem:[#allocation0] sm:$0x1] }
  0x8a   :  { %35 = vst [vmem:[%s59_s1] sm:$0x1] %v32_v8 }

// kernel: tile.18
= control target key start
LH: loop header
LB: loop body
LE: loop exit
PB: predicated region body
PF: predicated region fallthrough
CT: control target
= control target key end

     0   :  { %s20_s0 = inlined_call_operand.<no memory space> [shape: f32[], index: 0, kind: input, shape index: {}]   ;;  %s21_s1 = inlined_call_operand.vmem [shape: f32[1,128], index: 1, kind: output, shape index: {}]  }
   0x1   :  { %v2_v0 = vstv %s20_s0 }
   0x2   :  { %3 = vst [vmem:[%s21_s1] sm:$0x1] %v2_v0 }

// kernel: _lambda_.14
= control target key start
LH: loop header
LB: loop body
LE: loop exit
PB: predicated region body
PF: predicated region fallthrough
CT: control target
= control target key end

     0   :  { %v260_v35 = vlaneseq  ;;  %s518_s1 = inlined_call_operand.vmem [shape: bf16[256,256], index: 1, kind: input, shape index: {}]   ;;  %s519_s0 = inlined_call_operand.vmem [shape: bf16[8,256], index: 0, kind: input, shape index: {}]   ;;  %s520_s2 = inlined_call_operand.vmem [shape: f32[1,256], index: 2, kind: input, shape index: {}]   ;;  %s521_s3 = inlined_call_operand.vmem [shape: f32[1,256], index: 3, kind: input, shape index: {}]   ;;  %s522_s4 = inlined_call_operand.vmem [shape: f32[8,256], index: 4, kind: output, shape index: {}]  }
   0x1   :  { %v332_v0 = vld [vmem:[%s518_s1 + $0x74] ss:$8 sps:$4 sm:$0xff]   ;;  %v334_v1 = vld [vmem:[%s518_s1 + $0x70] ss:$8 sps:$4 sm:$0xff]   ;;  %v335_v2 = vld [vmem:[%s518_s1 + $0x64] ss:$8 sps:$4 sm:$0xff]  }
   0x2   :  { %217 = vmatprep.subr.bf16.mxu0 %v332_v0  ;;  %v337_v3 = vld [vmem:[%s518_s1 + $0x60] ss:$8 sps:$4 sm:$0xff]   ;;  %v338_v4 = vld [vmem:[%s518_s1 + $0x54] ss:$8 sps:$4 sm:$0xff]   ;;  %v340_v5 = vld [vmem:[%s518_s1 + $0x50] ss:$8 sps:$4 sm:$0xff]  }
   0x3   :  { %218 = vmatpush1.bf16.msra.mxu0 %v334_v1  ;;  %v341_v6 = vld [vmem:[%s518_s1 + $0x44] ss:$8 sps:$4 sm:$0xff]   ;;  %v343_v7 = vld [vmem:[%s518_s1 + $0x40] ss:$8 sps:$4 sm:$0xff]   ;;  %v344_v8 = vld [vmem:[%s518_s1 + $0x34] ss:$8 sps:$4 sm:$0xff]  }
   0x4   :  { %219 = vmatprep.subr.bf16.mxu0 %v335_v2  ;;  %v346_v9 = vld [vmem:[%s518_s1 + $0x30] ss:$8 sps:$4 sm:$0xff]   ;;  %v347_v10 = vld [vmem:[%s518_s1 + $0x24] ss:$8 sps:$4 sm:$0xff]   ;;  %v349_v11 = vld [vmem:[%s518_s1 + $0x20] ss:$8 sps:$4 sm:$0xff]  }
   0x5   :  { %v350_v12 = vld [vmem:[%s518_s1 + $0x14] ss:$8 sps:$4 sm:$0xff]   ;;  %v17_v13 = vld [vmem:[%s519_s0] sm:$0xff]  ;;  %v352_v15 = vld [vmem:[%s518_s1 + $0x10] ss:$8 sps:$4 sm:$0xff]   ;;  %v261_v36 = vshrl.u32 %v260_v35, 7 }
   0x6   :  { %v299_v14 = vcombine.high %v17_v13, %v17_v13  ;;  %v353_v16 = vld [vmem:[%s518_s1 + $0x4] ss:$8 sps:$4 sm:$0xff]   ;;  %v355_v17 = vld [vmem:[%s518_s1] ss:$8 sps:$4 sm:$0xff]   ;;  %v356_v18 = vld [vmem:[%s518_s1 + $0xf4] ss:$8 sps:$4 sm:$0xff]   ;;  %v298_v34 = vcombine.low %v17_v13, %v17_v13 }
   0x7   :  { %220 = vmatpush1.bf16.msra.mxu0 %v337_v3  ;;  %v358_v19 = vld [vmem:[%s518_s1 + $0xf0] ss:$8 sps:$4 sm:$0xff]   ;;  %v359_v20 = vld [vmem:[%s518_s1 + $0xe4] ss:$8 sps:$4 sm:$0xff]   ;;  %v361_v21 = vld [vmem:[%s518_s1 + $0xe0] ss:$8 sps:$4 sm:$0xff]  }
   0x8   :  { %221 = vmatprep.subr.bf16.mxu0 %v338_v4  ;;  %249 = vmatprep.mubr.bf16.mxu0 %v299_v14  ;;  %v362_v22 = vld [vmem:[%s518_s1 + $0xd4] ss:$8 sps:$4 sm:$0xff]   ;;  %v364_v23 = vld [vmem:[%s518_s1 + $0xd0] ss:$8 sps:$4 sm:$0xff]   ;;  %v365_v24 = vld [vmem:[%s518_s1 + $0xc4] ss:$8 sps:$4 sm:$0xff]  }
   0x9   :  { %v367_v25 = vld [vmem:[%s518_s1 + $0xc0] ss:$8 sps:$4 sm:$0xff]   ;;  %v368_v26 = vld [vmem:[%s518_s1 + $0xb4] ss:$8 sps:$4 sm:$0xff]   ;;  %v370_v27 = vld [vmem:[%s518_s1 + $0xb0] ss:$8 sps:$4 sm:$0xff]  }
   0xa   :  { %v371_v28 = vld [vmem:[%s518_s1 + $0xa4] ss:$8 sps:$4 sm:$0xff]   ;;  %v373_v29 = vld [vmem:[%s518_s1 + $0xa0] ss:$8 sps:$4 sm:$0xff]   ;;  %v374_v30 = vld [vmem:[%s518_s1 + $0x94] ss:$8 sps:$4 sm:$0xff]  }
   0xb   :  { %222 = vmatpush1.bf16.msra.mxu0 %v340_v5  ;;  %v376_v31 = vld [vmem:[%s518_s1 + $0x90] ss:$8 sps:$4 sm:$0xff]   ;;  %v377_v32 = vld [vmem:[%s518_s1 + $0x84] ss:$8 sps:$4 sm:$0xff]   ;;  %v379_v33 = vld [vmem:[%s518_s1 + $0x80] ss:$8 sps:$4 sm:$0xff]  }
   0xc   :  { %223 = vmatprep.subr.bf16.mxu0 %v341_v6  ;;  %v262_v37 = vsub.s32 0, %v261_v36  ;;  %v258_v38 = vld [vmem:[%s520_s2] sm:$0x3]  ;;  %v266_v39 = vsub.s32 1, %v261_v36 }
   0xd   :  { %v272_v40 = vld [vmem:[%s521_s3] sm:$0x3] }
   0xe   :  { %v263_v41 = vrot.slane %v258_v38, %v262_v37  ;;  %v277_v42 = vrot.slane %v272_v40, %v262_v37  ;;  %v267_v43 = vrot.slane %v258_v38, %v266_v39  ;;  %v281_v46 = vrot.slane %v272_v40, %v266_v39 }
   0xf   :  { %224 = vmatpush1.bf16.msra.mxu0 %v343_v7 }
  0x10   :  { %225 = vmatprep.subr.bf16.mxu0 %v344_v8 }
  0x13   :  { %226 = vmatpush1.bf16.msra.mxu0 %v346_v9 }
  0x14   :  { %227 = vmatprep.subr.bf16.mxu0 %v347_v10 }
  0x17   :  { %228 = vmatpush1.bf16.msra.mxu0 %v349_v11 }
  0x18   :  { %229 = vmatprep.subr.bf16.mxu0 %v350_v12 }
  0x1b   :  { %230 = vmatpush1.bf16.msra.mxu0 %v352_v15 }
  0x1c   :  { %231 = vmatprep.subr.bf16.mxu0 %v353_v16 }
  0x1f   :  { %232 = vmatpush1.bf16.msra.mxu0 %v355_v17 }
  0x20   :  { %233 = vmatprep.subr.bf16.mxu0 %v356_v18 }
  0x23   :  { %234 = vmatpush2.bf16.msra.mxu0 %v358_v19 }
  0x24   :  { %235 = vmatprep.subr.bf16.mxu0 %v359_v20 }
  0x27   :  { %236 = vmatpush2.bf16.msra.mxu0 %v361_v21 }
  0x28   :  { %237 = vmatprep.subr.bf16.mxu0 %v362_v22 }
  0x2b   :  { %238 = vmatpush2.bf16.msra.mxu0 %v364_v23 }
  0x2c   :  { %239 = vmatprep.subr.bf16.mxu0 %v365_v24 }
  0x2f   :  { %240 = vmatpush2.bf16.msra.mxu0 %v367_v25 }
  0x30   :  { %241 = vmatprep.subr.bf16.mxu0 %v368_v26 }
  0x33   :  { %242 = vmatpush2.bf16.msra.mxu0 %v370_v27 }
  0x34   :  { %243 = vmatprep.subr.bf16.mxu0 %v371_v28 }
  0x37   :  { %244 = vmatpush2.bf16.msra.mxu0 %v373_v29 }
  0x38   :  { %245 = vmatprep.subr.bf16.mxu0 %v374_v30 }
  0x3b   :  { %246 = vmatpush2.bf16.msra.mxu0 %v376_v31 }
  0x3c   :  { %247 = vmatprep.subr.bf16.mxu0 %v377_v32 }
  0x3f   :  { %248 = vmatpush2.bf16.msra.mxu0 %v379_v33 }
  0x42   :  { %250 = vmatmul.mubr.bf16.vlgmr.msra.gmra.mxu0 %v298_v34 }
 0x102   :  { %v251_v44 = vpop.f32.mrf.mxu0 }
 0x103   :  { %v270_v45 = vmul.f32 %v263_v41, %v251_v44 }
 0x104   :  { %v253_v47 = vpop.f32.mrf.mxu0 }
 0x105   :  { %v284_v48 = vadd.f32 %v277_v42, %v270_v45  ;;  %v271_v49 = vmul.f32 %v267_v43, %v253_v47 }
 0x106   :  { %v255_v50 = vpop.f32.mrf.mxu0 }
 0x107   :  { %vm286_vm0 = vcmp.ge.f32.partialorder %v284_v48, 0.0  ;;  %v288_v51 = vmul.f32 0.2, %v284_v48  ;;  %v285_v52 = vadd.f32 %v281_v46, %v271_v49 }
 0x108   :  { %v256_v53 = vpop.f32.mrf.mxu0 }
 0x109   :  { %v290_v54 = vsel %vm286_vm0, %v284_v48, %v288_v51  ;;  %vm287_vm1 = vcmp.ge.f32.partialorder %v285_v52, 0.0  ;;  %v289_v55 = vmul.f32 0.2, %v285_v52 }
 0x10a   :  { %292 = vst [vmem:[%s522_s4] sm:$0xff] %v290_v54 }
 0x10b   :  { %v291_v56 = vsel %vm287_vm1, %v285_v52, %v289_v55 }
 0x10c   :  { %293 = vst [vmem:[%s522_s4 + $0x8] sm:$0xff] %v291_v56 }

// kernel: _lambda_.15
= control target key start
LH: loop header
LB: loop body
LE: loop exit
PB: predicated region body
PF: predicated region fallthrough
CT: control target
= control target key end

     0   :  { %s452_s1 = inlined_call_operand.vmem [shape: bf16[256,128], index: 1, kind: input, shape index: {}]   ;;  %s453_s0 = inlined_call_operand.vmem [shape: bf16[32,256], index: 0, kind: input, shape index: {}]   ;;  %s454_s2 = inlined_call_operand.vmem [shape: f32[1,128], index: 2, kind: input, shape index: {}]   ;;  %s455_s3 = inlined_call_operand.vmem [shape: f32[1,128], index: 3, kind: input, shape index: {}]   ;;  %s456_s4 = inlined_call_operand.vmem [shape: f32[32,128], index: 4, kind: output, shape index: {}]  }
   0x1   :  { %v327_v0 = vld [vmem:[%s452_s1 + $0x78] sm:$0xff]   ;;  %v329_v2 = vld [vmem:[%s452_s1 + $0x70] sm:$0xff]   ;;  %v331_v4 = vld [vmem:[%s452_s1 + $0x68] sm:$0xff]  }
   0x2   :  { %v328_v1 = vld [vmem:[%s452_s1 + $0x38] sm:$0xff]   ;;  %283 = vmatprep.subr.bf16.mxu0 %v327_v0  ;;  %311 = vmatprep.subr.bf16.mxu1 %v327_v0  ;;  %v330_v3 = vld [vmem:[%s452_s1 + $0x30] sm:$0xff]   ;;  %v332_v5 = vld [vmem:[%s452_s1 + $0x28] sm:$0xff]  }
   0x3   :  { %284 = vmatpush3.bf16.msra.mxu0 %v328_v1  ;;  %319 = vmatpush3.bf16.msra.mxu1 %v328_v1  ;;  %v333_v6 = vld [vmem:[%s452_s1 + $0x60] sm:$0xff]   ;;  %v335_v8 = vld [vmem:[%s452_s1 + $0x58] sm:$0xff]   ;;  %v337_v10 = vld [vmem:[%s452_s1 + $0x50] sm:$0xff]  }
   0x4   :  { %285 = vmatprep.subr.bf16.mxu0 %v329_v2  ;;  %312 = vmatprep.subr.bf16.mxu1 %v329_v2  ;;  %v334_v7 = vld [vmem:[%s452_s1 + $0x20] sm:$0xff]   ;;  %v336_v9 = vld [vmem:[%s452_s1 + $0x18] sm:$0xff]   ;;  %v338_v13 = vld [vmem:[%s452_s1 + $0x10] sm:$0xff]  }
   0x5   :  { %v345_v11 = vld [vmem:[%s453_s0 + $0x4] ss:$8 sps:$4 sm:$0xff]   ;;  %v348_v12 = vld [vmem:[%s453_s0 + $0x14] ss:$8 sps:$4 sm:$0xff]   ;;  %v343_v18 = vld [vmem:[%s453_s0] ss:$8 sps:$4 sm:$0xff]  }
   0x6   :  { %v339_v14 = vld [vmem:[%s452_s1 + $0x48] sm:$0xff]   ;;  %202 = vmatprep.mubr.bf16.mxu0 %v345_v11  ;;  %210 = vmatprep.mubr.bf16.mxu1 %v348_v12  ;;  %v341_v16 = vld [vmem:[%s452_s1 + $0x40] sm:$0xff]   ;;  %v346_v19 = vld [vmem:[%s453_s0 + $0x10] ss:$8 sps:$4 sm:$0xff]  }
   0x7   :  { %286 = vmatpush3.bf16.msra.mxu0 %v330_v3  ;;  %320 = vmatpush3.bf16.msra.mxu1 %v330_v3  ;;  %v340_v15 = vld [vmem:[%s452_s1 + $0x8] sm:$0xff]   ;;  %v342_v17 = vld [vmem:[%s452_s1] sm:$0xff]  }
   0x8   :  { %287 = vmatprep.subr.bf16.mxu0 %v331_v4  ;;  %313 = vmatprep.subr.bf16.mxu1 %v331_v4  ;;  %v281_v23 = vld [vmem:[%s454_s2] ss:$0 sm:$0xff] }
   0x9   :  { %v282_v27 = vld [vmem:[%s455_s3] ss:$0 sm:$0xff] }
   0xb   :  { %288 = vmatpush3.bf16.msra.mxu0 %v332_v5  ;;  %321 = vmatpush3.bf16.msra.mxu1 %v332_v5 }
   0xc   :  { %289 = vmatprep.subr.bf16.mxu0 %v333_v6  ;;  %314 = vmatprep.subr.bf16.mxu1 %v333_v6 }
   0xf   :  { %290 = vmatpush3.bf16.msra.mxu0 %v334_v7  ;;  %322 = vmatpush3.bf16.msra.mxu1 %v334_v7 }
  0x10   :  { %291 = vmatprep.subr.bf16.mxu0 %v335_v8  ;;  %315 = vmatprep.subr.bf16.mxu1 %v335_v8 }
  0x13   :  { %292 = vmatpush3.bf16.msra.mxu0 %v336_v9  ;;  %323 = vmatpush3.bf16.msra.mxu1 %v336_v9 }
  0x14   :  { %293 = vmatprep.subr.bf16.mxu0 %v337_v10  ;;  %316 = vmatprep.subr.bf16.mxu1 %v337_v10 }
  0x17   :  { %294 = vmatpush3.bf16.msra.mxu0 %v338_v13  ;;  %324 = vmatpush3.bf16.msra.mxu1 %v338_v13 }
  0x18   :  { %295 = vmatprep.subr.bf16.mxu0 %v339_v14  ;;  %317 = vmatprep.subr.bf16.mxu1 %v339_v14 }
  0x1b   :  { %296 = vmatpush3.bf16.msra.mxu0 %v340_v15  ;;  %325 = vmatpush3.bf16.msra.mxu1 %v340_v15 }
  0x1c   :  { %297 = vmatprep.subr.bf16.mxu0 %v341_v16  ;;  %318 = vmatprep.subr.bf16.mxu1 %v341_v16 }
  0x1f   :  { %298 = vmatpush3.bf16.msra.mxu0 %v342_v17  ;;  %326 = vmatpush3.bf16.msra.mxu1 %v342_v17 }
  0x22   :  { %203 = vmatmul.mubr.bf16.vlgmr.msra.gmra.mxu0 %v343_v18  ;;  %211 = vmatmul.mubr.bf16.vlgmr.msra.gmra.mxu1 %v346_v19 }
  0xe2   :  { %v299_v20 = vpop.f32.mrf.mxu0  ;;  %v305_v21 = vpop.f32.mrf.mxu1 }
  0xe4   :  { %v300_v22 = vpop.f32.mrf.mxu0  ;;  %v306_v24 = vpop.f32.mrf.mxu1 }
  0xe5   :  { %v301_v25 = vadd.f32 %v300_v22, %v299_v20  ;;  %v307_v26 = vadd.f32 %v306_v24, %v305_v21 }
  0xe6   :  { %v302_v28 = vpop.f32.mrf.mxu0  ;;  %v308_v29 = vpop.f32.mrf.mxu1 }
  0xe7   :  { %v226_v30 = vmul.f32 %v301_v25, %v281_v23  ;;  %v228_v31 = vmul.f32 %v307_v26, %v281_v23 }
  0xe8   :  { %v303_v32 = vpop.f32.mrf.mxu0  ;;  %v309_v33 = vpop.f32.mrf.mxu1 }
  0xe9   :  { %v237_v34 = vadd.f32 %v282_v27, %v226_v30  ;;  %v239_v35 = vadd.f32 %v282_v27, %v228_v31  ;;  %v304_v36 = vadd.f32 %v303_v32, %v302_v28  ;;  %v310_v37 = vadd.f32 %v309_v33, %v308_v29 }
  0xeb   :  { %vm241_vm0 = vcmp.ge.f32.partialorder %v237_v34, 0.0  ;;  %v245_v38 = vmul.f32 0.2, %v237_v34  ;;  %vm243_vm1 = vcmp.ge.f32.partialorder %v239_v35, 0.0  ;;  %v247_v39 = vmul.f32 0.2, %v239_v35 }
  0xec   :  { %v227_v40 = vmul.f32 %v304_v36, %v281_v23  ;;  %v229_v41 = vmul.f32 %v310_v37, %v281_v23 }
  0xed   :  { %v249_v42 = vsel %vm241_vm0, %v237_v34, %v245_v38  ;;  %v251_v43 = vsel %vm243_vm1, %v239_v35, %v247_v39 }
  0xee   :  { %253 = vst [vmem:[%s456_s4] sm:$0xff] %v249_v42  ;;  %255 = vst [vmem:[%s456_s4 + $0x10] sm:$0xff] %v251_v43  ;;  %v238_v44 = vadd.f32 %v282_v27, %v227_v40  ;;  %v240_v45 = vadd.f32 %v282_v27, %v229_v41 }
  0xf0   :  { %vm242_vm2 = vcmp.ge.f32.partialorder %v238_v44, 0.0  ;;  %v246_v46 = vmul.f32 0.2, %v238_v44  ;;  %vm244_vm3 = vcmp.ge.f32.partialorder %v240_v45, 0.0  ;;  %v248_v47 = vmul.f32 0.2, %v240_v45 }
  0xf2   :  { %v250_v48 = vsel %vm242_vm2, %v238_v44, %v246_v46  ;;  %v252_v49 = vsel %vm244_vm3, %v240_v45, %v248_v47 }
  0xf3   :  { %254 = vst [vmem:[%s456_s4 + $0x8] sm:$0xff] %v250_v48  ;;  %256 = vst [vmem:[%s456_s4 + $0x18] sm:$0xff] %v252_v49 }

// kernel: _lambda_.16
= control target key start
LH: loop header
LB: loop body
LE: loop exit
PB: predicated region body
PF: predicated region fallthrough
CT: control target
= control target key end

     0   :  { %s618_s1 = inlined_call_operand.vmem [shape: bf16[128,128], index: 1, kind: input, shape index: {}]   ;;  %s619_s0 = inlined_call_operand.vmem [shape: bf16[128,128], index: 0, kind: input, shape index: {}]   ;;  %s620_s2 = inlined_call_operand.vmem [shape: f32[1,128], index: 2, kind: input, shape index: {}]   ;;  %s621_s3 = inlined_call_operand.vmem [shape: f32[1,128], index: 3, kind: input, shape index: {}]   ;;  %s622_s4 = inlined_call_operand.vmem [shape: f32[128,128], index: 4, kind: output, shape index: {}]  }
   0x1   :  { %v439_v0 = vld [vmem:[%s618_s1 + $0x38] sm:$0xff]   ;;  %v440_v1 = vld [vmem:[%s618_s1 + $0x30] sm:$0xff]   ;;  %v441_v2 = vld [vmem:[%s618_s1 + $0x28] sm:$0xff]  }
   0x2   :  { %391 = vmatprep.subr.bf16.mxu0 %v439_v0  ;;  %423 = vmatprep.subr.bf16.mxu1 %v439_v0  ;;  %v442_v3 = vld [vmem:[%s618_s1 + $0x20] sm:$0xff]   ;;  %v443_v6 = vld [vmem:[%s618_s1 + $0x18] sm:$0xff]   ;;  %v444_v7 = vld [vmem:[%s618_s1 + $0x10] sm:$0xff]  }
   0x3   :  { %392 = vmatpush3.bf16.msra.mxu0 %v439_v0  ;;  %431 = vmatpush3.bf16.msra.mxu1 %v439_v0  ;;  %v447_v4 = vld [vmem:[%s619_s0] sm:$0xff]   ;;  %v445_v8 = vld [vmem:[%s618_s1 + $0x8] sm:$0xff]   ;;  %v451_v12 = vld [vmem:[%s619_s0 + $0x10] sm:$0xff]  }
   0x4   :  { %393 = vmatprep.subr.bf16.mxu0 %v440_v1  ;;  %424 = vmatprep.subr.bf16.mxu1 %v440_v1  ;;  %v448_v5 = vld [vmem:[%s619_s0 + $0x20] sm:$0xff]   ;;  %v449_v10 = vld [vmem:[%s619_s0 + $0x8] sm:$0xff]   ;;  %v452_v13 = vld [vmem:[%s619_s0 + $0x30] sm:$0xff]  }
   0x5   :  { %407 = vmatprep.mubr.bf16.mxu0 %v447_v4  ;;  %415 = vmatprep.mubr.bf16.mxu1 %v448_v5  ;;  %v446_v9 = vld [vmem:[%s618_s1] sm:$0xff]   ;;  %v450_v11 = vld [vmem:[%s619_s0 + $0x28] sm:$0xff]   ;;  %v453_v14 = vld [vmem:[%s619_s0 + $0x18] sm:$0xff]  }
   0x6   :  { %v454_v15 = vld [vmem:[%s619_s0 + $0x38] sm:$0xff]   ;;  %v531_v16 = vld [vmem:[%s620_s2] ss:$0 sm:$0xff] }
   0x7   :  { %394 = vmatpush3.bf16.msra.mxu0 %v440_v1  ;;  %432 = vmatpush3.bf16.msra.mxu1 %v440_v1  ;;  %v536_v18 = vld [vmem:[%s621_s3] ss:$0 sm:$0xff] }
   0x8   :  { %395 = vmatprep.subr.bf16.mxu0 %v441_v2  ;;  %425 = vmatprep.subr.bf16.mxu1 %v441_v2 }
   0xb   :  { %396 = vmatpush3.bf16.msra.mxu0 %v441_v2  ;;  %433 = vmatpush3.bf16.msra.mxu1 %v441_v2 }
   0xc   :  { %397 = vmatprep.subr.bf16.mxu0 %v442_v3  ;;  %426 = vmatprep.subr.bf16.mxu1 %v442_v3 }
   0xf   :  { %398 = vmatpush3.bf16.msra.mxu0 %v442_v3  ;;  %434 = vmatpush3.bf16.msra.mxu1 %v442_v3 }
  0x10   :  { %399 = vmatprep.subr.bf16.mxu0 %v443_v6  ;;  %427 = vmatprep.subr.bf16.mxu1 %v443_v6 }
  0x13   :  { %400 = vmatpush3.bf16.msra.mxu0 %v443_v6  ;;  %435 = vmatpush3.bf16.msra.mxu1 %v443_v6 }
  0x14   :  { %401 = vmatprep.subr.bf16.mxu0 %v444_v7  ;;  %428 = vmatprep.subr.bf16.mxu1 %v444_v7 }
  0x17   :  { %402 = vmatpush3.bf16.msra.mxu0 %v444_v7  ;;  %436 = vmatpush3.bf16.msra.mxu1 %v444_v7 }
  0x18   :  { %403 = vmatprep.subr.bf16.mxu0 %v445_v8  ;;  %429 = vmatprep.subr.bf16.mxu1 %v445_v8 }
  0x1b   :  { %404 = vmatpush3.bf16.msra.mxu0 %v445_v8  ;;  %437 = vmatpush3.bf16.msra.mxu1 %v445_v8 }
  0x1c   :  { %405 = vmatprep.subr.bf16.mxu0 %v446_v9  ;;  %430 = vmatprep.subr.bf16.mxu1 %v446_v9 }
  0x1f   :  { %406 = vmatpush3.bf16.msra.mxu0 %v446_v9  ;;  %438 = vmatpush3.bf16.msra.mxu1 %v446_v9 }
  0x22   :  { %408 = vmatmul.mubr.bf16.vlgmr.msra.gmra.mxu0 %v449_v10  ;;  %416 = vmatmul.mubr.bf16.vlgmr.msra.gmra.mxu1 %v450_v11 }
  0x23   :  { %411 = vmatprep.mubr.bf16.mxu0 %v451_v12  ;;  %419 = vmatprep.mubr.bf16.mxu1 %v452_v13 }
  0x2a   :  { %412 = vmatmul.mubr.bf16.gmra.mxu0 %v453_v14  ;;  %420 = vmatmul.mubr.bf16.gmra.mxu1 %v454_v15 }
  0xe2   :  { %v409_v17 = vpop.f32.mrf.mxu0  ;;  %v417_v19 = vpop.f32.mrf.mxu1 }
  0xe3   :  { %v252_v20 = vmul.f32 %v409_v17, %v531_v16  ;;  %v260_v21 = vmul.f32 %v417_v19, %v531_v16 }
  0xe4   :  { %v180_v22 = vpop.f32.mrf.mxu0  ;;  %v212_v23 = vpop.f32.mrf.mxu1 }
  0xe5   :  { %v275_v24 = vadd.f32 %v536_v18, %v252_v20  ;;  %v283_v25 = vadd.f32 %v536_v18, %v260_v21  ;;  %v250_v26 = vmul.f32 %v531_v16, %v180_v22  ;;  %v258_v27 = vmul.f32 %v531_v16, %v212_v23 }
  0xe6   :  { %v410_v28 = vpop.f32.mrf.mxu0  ;;  %v418_v29 = vpop.f32.mrf.mxu1 }
  0xe7   :  { %vm291_vm0 = vcmp.ge.f32.partialorder %v275_v24, 0.0  ;;  %v307_v30 = vmul.f32 0.2, %v275_v24  ;;  %vm299_vm1 = vcmp.ge.f32.partialorder %v283_v25, 0.0  ;;  %v315_v31 = vmul.f32 0.2, %v283_v25 }
  0xe8   :  { %v273_v32 = vadd.f32 %v536_v18, %v250_v26  ;;  %v281_v33 = vadd.f32 %v536_v18, %v258_v27  ;;  %v253_v34 = vmul.f32 %v410_v28, %v531_v16  ;;  %v261_v35 = vmul.f32 %v418_v29, %v531_v16  ;;  %v183_v36 = vpop.f32.mrf.mxu0  ;;  %v215_v37 = vpop.f32.mrf.mxu1 }
  0xe9   :  { %v323_v38 = vsel %vm291_vm0, %v275_v24, %v307_v30  ;;  %v331_v39 = vsel %vm299_vm1, %v283_v25, %v315_v31  ;;  %v251_v40 = vmul.f32 %v531_v16, %v183_v36  ;;  %v259_v41 = vmul.f32 %v531_v16, %v215_v37 }
  0xea   :  { %339 = vst [vmem:[%s622_s4 + $0x10] sm:$0xff] %v323_v38  ;;  %347 = vst [vmem:[%s622_s4 + $0x50] sm:$0xff] %v331_v39  ;;  %vm289_vm2 = vcmp.ge.f32.partialorder %v273_v32, 0.0  ;;  %v305_v42 = vmul.f32 0.2, %v273_v32  ;;  %vm297_vm3 = vcmp.ge.f32.partialorder %v281_v33, 0.0  ;;  %v413_v44 = vpop.f32.mrf.mxu0  ;;  %v421_v45 = vpop.f32.mrf.mxu1  ;;  %v276_v46 = vadd.f32 %v536_v18, %v253_v34 }
  0xeb   :  { %v313_v43 = vmul.f32 0.2, %v281_v33  ;;  %v284_v47 = vadd.f32 %v536_v18, %v261_v35  ;;  %v274_v48 = vadd.f32 %v536_v18, %v251_v40  ;;  %v282_v49 = vadd.f32 %v536_v18, %v259_v41 }
  0xec   :  { %v321_v50 = vsel %vm289_vm2, %v273_v32, %v305_v42  ;;  %v256_v52 = vmul.f32 %v413_v44, %v531_v16  ;;  %v264_v53 = vmul.f32 %v421_v45, %v531_v16  ;;  %v196_v54 = vpop.f32.mrf.mxu0  ;;  %v228_v55 = vpop.f32.mrf.mxu1  ;;  %vm292_vm4 = vcmp.ge.f32.partialorder %v276_v46, 0.0 }
  0xed   :  { %v329_v51 = vsel %vm297_vm3, %v281_v33, %v313_v43  ;;  %337 = vst [vmem:[%s622_s4] sm:$0xff] %v321_v50  ;;  %v308_v56 = vmul.f32 0.2, %v276_v46  ;;  %vm300_vm5 = vcmp.ge.f32.partialorder %v284_v47, 0.0  ;;  %v316_v57 = vmul.f32 0.2, %v284_v47 }
  0xee   :  { %345 = vst [vmem:[%s622_s4 + $0x40] sm:$0xff] %v329_v51  ;;  %vm290_vm6 = vcmp.ge.f32.partialorder %v274_v48, 0.0  ;;  %v306_v58 = vmul.f32 0.2, %v274_v48  ;;  %vm298_vm7 = vcmp.ge.f32.partialorder %v282_v49, 0.0  ;;  %v414_v60 = vpop.f32.mrf.mxu0  ;;  %v422_v61 = vpop.f32.mrf.mxu1  ;;  %v279_v0 = vadd.f32 %v536_v18, %v256_v52 }
  0xef   :  { %v314_v59 = vmul.f32 0.2, %v282_v49  ;;  %v324_v62 = vsel %vm292_vm4, %v276_v46, %v308_v56  ;;  %v332_v63 = vsel %vm300_vm5, %v284_v47, %v316_v57  ;;  %v287_v1 = vadd.f32 %v536_v18, %v264_v53 }
  0xf0   :  { %340 = vst [vmem:[%s622_s4 + $0x18] sm:$0xff] %v324_v62  ;;  %348 = vst [vmem:[%s622_s4 + $0x58] sm:$0xff] %v332_v63  ;;  %v322_v2 = vsel %vm290_vm6, %v274_v48, %v306_v58  ;;  %v254_v4 = vmul.f32 %v531_v16, %v196_v54  ;;  %v262_v5 = vmul.f32 %v531_v16, %v228_v55  ;;  %v199_v6 = vpop.f32.mrf.mxu0  ;;  %v231_v7 = vpop.f32.mrf.mxu1  ;;  %vm295_vm8 = vcmp.ge.f32.partialorder %v279_v0, 0.0 }
  0xf1   :  { %v330_v3 = vsel %vm298_vm7, %v282_v49, %v314_v59  ;;  %338 = vst [vmem:[%s622_s4 + $0x8] sm:$0xff] %v322_v2  ;;  %v311_v8 = vmul.f32 0.2, %v279_v0  ;;  %vm303_vm9 = vcmp.ge.f32.partialorder %v287_v1, 0.0  ;;  %v319_v9 = vmul.f32 0.2, %v287_v1 }
  0xf2   :  { %346 = vst [vmem:[%s622_s4 + $0x48] sm:$0xff] %v330_v3  ;;  %v277_v10 = vadd.f32 %v536_v18, %v254_v4  ;;  %v285_v11 = vadd.f32 %v536_v18, %v262_v5  ;;  %v257_v12 = vmul.f32 %v414_v60, %v531_v16  ;;  %v265_v13 = vmul.f32 %v422_v61, %v531_v16 }
  0xf3   :  { %v327_v14 = vsel %vm295_vm8, %v279_v0, %v311_v8  ;;  %v335_v15 = vsel %vm303_vm9, %v287_v1, %v319_v9  ;;  %v255_v17 = vmul.f32 %v531_v16, %v199_v6  ;;  %v263_v19 = vmul.f32 %v531_v16, %v231_v7 }
  0xf4   :  { %343 = vst [vmem:[%s622_s4 + $0x30] sm:$0xff] %v327_v14  ;;  %351 = vst [vmem:[%s622_s4 + $0x70] sm:$0xff] %v335_v15  ;;  %vm293_vm10 = vcmp.ge.f32.partialorder %v277_v10, 0.0  ;;  %v309_v20 = vmul.f32 0.2, %v277_v10  ;;  %vm301_vm11 = vcmp.ge.f32.partialorder %v285_v11, 0.0  ;;  %v280_v22 = vadd.f32 %v536_v18, %v257_v12 }
  0xf5   :  { %v317_v21 = vmul.f32 0.2, %v285_v11  ;;  %v288_v23 = vadd.f32 %v536_v18, %v265_v13  ;;  %v278_v24 = vadd.f32 %v536_v18, %v255_v17  ;;  %v286_v16 = vadd.f32 %v536_v18, %v263_v19 }
  0xf6   :  { %v325_v25 = vsel %vm293_vm10, %v277_v10, %v309_v20  ;;  %vm296_vm12 = vcmp.ge.f32.partialorder %v280_v22, 0.0  ;;  %v312_v27 = vmul.f32 0.2, %v280_v22 }
  0xf7   :  { %v333_v26 = vsel %vm301_vm11, %v285_v11, %v317_v21  ;;  %341 = vst [vmem:[%s622_s4 + $0x20] sm:$0xff] %v325_v25  ;;  %vm304_vm13 = vcmp.ge.f32.partialorder %v288_v23, 0.0  ;;  %v320_v28 = vmul.f32 0.2, %v288_v23  ;;  %vm294_vm14 = vcmp.ge.f32.partialorder %v278_v24, 0.0 }
  0xf8   :  { %349 = vst [vmem:[%s622_s4 + $0x60] sm:$0xff] %v333_v26  ;;  %v310_v29 = vmul.f32 0.2, %v278_v24  ;;  %vm302_vm15 = vcmp.ge.f32.partialorder %v286_v16, 0.0  ;;  %v318_v30 = vmul.f32 0.2, %v286_v16  ;;  %v328_v31 = vsel %vm296_vm12, %v280_v22, %v312_v27 }
  0xf9   :  { %v336_v18 = vsel %vm304_vm13, %v288_v23, %v320_v28  ;;  %344 = vst [vmem:[%s622_s4 + $0x38] sm:$0xff] %v328_v31 }
  0xfa   :  { %352 = vst [vmem:[%s622_s4 + $0x78] sm:$0xff] %v336_v18  ;;  %v326_v32 = vsel %vm294_vm14, %v278_v24, %v310_v29  ;;  %v334_v33 = vsel %vm302_vm15, %v286_v16, %v318_v30 }
  0xfb   :  { %342 = vst [vmem:[%s622_s4 + $0x28] sm:$0xff] %v326_v32  ;;  %350 = vst [vmem:[%s622_s4 + $0x68] sm:$0xff] %v334_v33 }

// kernel: tile.34
= control target key start
LH: loop header
LB: loop body
LE: loop exit
PB: predicated region body
PF: predicated region fallthrough
CT: control target
= control target key end

     0   :  { %s22_s0 = inlined_call_operand.vmem [shape: f32[3], index: 0, kind: input, shape index: {}]   ;;  %s23_s1 = inlined_call_operand.vmem [shape: f32[4,3], index: 1, kind: output, shape index: {}]  }
   0x1   :  { %v4_v0 = vld [vmem:[%s22_s0] ss:$0 sm:$0xff] }
   0x2   :  { %5 = vst [vmem:[%s23_s1] sm:$0xf] %v4_v0 }

// kernel: tile.35
= control target key start
LH: loop header
LB: loop body
LE: loop exit
PB: predicated region body
PF: predicated region fallthrough
CT: control target
= control target key end

     0   :  { %vm8_vm0 = vcmask 23552   ;;  %s40_s8 = smov 3   ;;  %s41_s9 = smov 6   ;;  %vm14_vm1 = vcmask 97352   ;;  %vm20_vm2 = vcmask 72752   ;;  %vm26_vm3 = vcmask 48152   ;;  %s58_s0 = inlined_call_operand.vmem [shape: f32[4,3], index: 0, kind: input, shape index: {}]   ;;  %s59_s1 = inlined_call_operand.vmem [shape: f32[12], index: 1, kind: output, shape index: {}]  }
   0x1   :  { %v5_v0 = vld [vmem:[%s58_s0] sm:$0xf]  ;;  %s39_s0 = smov 9  }
   0x2   :  { %6 = vst [vmem:[#allocation1] sm:$0xf] %v5_v0 }
   0x9   :  { %v11_v1 = vld [vmem:[#allocation1 + $0x3] sm:$0x1]   ;;  %v23_v2 = vld [vmem:[#allocation1 + $0x1] sm:$0x1]   ;;  %v7_v3 = vld [vmem:[#allocation1] sm:$0x1]  }
   0xa   :  { %12 = vrot.lane.b32.xlu0 %v11_v1, %s39_s0  ;;  %24 = vrot.lane.b32.xlu1 %v23_v2, %s40_s8  ;;  %v17_v4 = vld [vmem:[#allocation1 + $0x2] sm:$0x1]   ;;  %9 = vst.msk [vmem:[#allocation0] sm:$0x1] %vm8_vm0, %v7_v3  }
   0xe   :  { %18 = vrot.lane.b32.xlu0 %v17_v4, %s41_s9 }
  0x7c   :  { %v13_v5 = vpop.permute.xlu0 %12   ;;  %v25_v6 = vpop.permute.xlu1 %24  }
  0x7d   :  { %15 = vst.msk [vmem:[#allocation0] sm:$0x1] %vm14_vm1, %v13_v5  }
  0x80   :  { %v19_v7 = vpop.permute.xlu0 %18  }
  0x81   :  { %21 = vst.msk [vmem:[#allocation0] sm:$0x1] %vm20_vm2, %v19_v7  }
  0x82   :  { %27 = vst.msk [vmem:[#allocation0] sm:$0x1] %vm26_vm3, %v25_v6  }
  0x89   :  { %v32_v8 = vld [vmem:[#allocation0] sm:$0x1] }
  0x8a   :  { %35 = vst [vmem:[%s59_s1] sm:$0x1] %v32_v8 }

// kernel: _lambda_.17
= control target key start
LH: loop header
LB: loop body
LE: loop exit
PB: predicated region body
PF: predicated region fallthrough
CT: control target
= control target key end

     0   :  { %vm280_vm0 = vcmask 523264   ;;  %s2076_s0 = inlined_call_operand.vmem [shape: bf16[512,64], index: 0, kind: input, shape index: {}]   ;;  %s2077_s1 = inlined_call_operand.vmem [shape: bf16[64,128], index: 1, kind: input, shape index: {}]   ;;  %s2078_s2 = inlined_call_operand.vmem [shape: f32[1,128], index: 2, kind: input, shape index: {}]   ;;  %s2079_s3 = inlined_call_operand.vmem [shape: f32[1,128], index: 3, kind: input, shape index: {}]   ;;  %s2080_s4 = inlined_call_operand.vmem [shape: f32[512,128], index: 4, kind: input, shape index: {}]   ;;  %s2081_s5 = inlined_call_operand.hbm [shape: f32[512,128], index: 5, kind: output, shape index: {0}]   ;;  %s2082_s6 = inlined_call_operand.vmem [shape: f32[1,128], index: 6, kind: output, shape index: {1}]  }
   0x1   :  { %v1351_v0 = vld [vmem:[%s2077_s1 + $0x18] sm:$0xff]   ;;  %v1352_v1 = vld [vmem:[%s2077_s1 + $0x10] sm:$0xff]   ;;  %v1353_v2 = vld [vmem:[%s2077_s1 + $0x8] sm:$0xff]  }
   0x2   :  { %1267 = vmatprep.subr.bf16.mxu0 %v1351_v0  ;;  %1339 = vmatprep.subr.bf16.mxu1 %v1351_v0  ;;  %v1355_v3 = vld [vmem:[%s2076_s0] sm:$0xff]   ;;  %v1356_v5 = vld [vmem:[%s2076_s0 + $0x8] sm:$0xff]   ;;  %v1357_v6 = vld [vmem:[%s2076_s0 + $0x10] sm:$0xff]  }
   0x3   :  { %1268 = vmatpush3.bf16.msra.mxu0 %v1351_v0  ;;  %1343 = vmatpush3.bf16.msra.mxu1 %v1351_v0  ;;  %v1354_v4 = vld [vmem:[%s2077_s1] sm:$0xff]   ;;  %v1358_v7 = vld [vmem:[%s2076_s0 + $0x18] sm:$0xff]   ;;  %v1372_v9 = vld [vmem:[%s2076_s0 + $0x88] sm:$0xff]  }
   0x4   :  { %1269 = vmatprep.subr.bf16.mxu0 %v1352_v1  ;;  %1340 = vmatprep.subr.bf16.mxu1 %v1352_v1  ;;  %v1371_v8 = vld [vmem:[%s2076_s0 + $0x80] sm:$0xff]   ;;  %v1373_v10 = vld [vmem:[%s2076_s0 + $0x90] sm:$0xff]   ;;  %v1374_v12 = vld [vmem:[%s2076_s0 + $0x98] sm:$0xff]  }
   0x5   :  { %1275 = vmatprep.mubr.msk.bf16.mxu0 %vm280_vm0, %v1355_v3  ;;  %1307 = vmatprep.mubr.msk.bf16.mxu1 %vm280_vm0, %v1371_v8  ;;  %v1359_v11 = vld [vmem:[%s2076_s0 + $0x20] sm:$0xff]   ;;  %v1360_v14 = vld [vmem:[%s2076_s0 + $0x28] sm:$0xff]   ;;  %v1361_v15 = vld [vmem:[%s2076_s0 + $0x30] sm:$0xff]  }
   0x6   :  { %v1375_v13 = vld [vmem:[%s2076_s0 + $0xa0] sm:$0xff]   ;;  %v1376_v16 = vld [vmem:[%s2076_s0 + $0xa8] sm:$0xff]   ;;  %v1377_v17 = vld [vmem:[%s2076_s0 + $0xb0] sm:$0xff]  }
   0x7   :  { %1270 = vmatpush3.bf16.msra.mxu0 %v1352_v1  ;;  %1344 = vmatpush3.bf16.msra.mxu1 %v1352_v1 }
   0x8   :  { %1271 = vmatprep.subr.bf16.mxu0 %v1353_v2  ;;  %1341 = vmatprep.subr.bf16.mxu1 %v1353_v2 }
   0xb   :  { %1272 = vmatpush3.bf16.msra.mxu0 %v1353_v2  ;;  %1345 = vmatpush3.bf16.msra.mxu1 %v1353_v2 }
   0xc   :  { %1273 = vmatprep.subr.bf16.mxu0 %v1354_v4  ;;  %1342 = vmatprep.subr.bf16.mxu1 %v1354_v4 }
   0xf   :  { %1274 = vmatpush3.bf16.msra.mxu0 %v1354_v4  ;;  %1346 = vmatpush3.bf16.msra.mxu1 %v1354_v4 }
  0x12   :  { %1276 = vmatmul.mubr.msk.bf16.vlgmr.msra.gmra.mxu0 %vm280_vm0, %v1356_v5  ;;  %1308 = vmatmul.mubr.msk.bf16.vlgmr.msra.gmra.mxu1 %vm280_vm0, %v1372_v9 }
  0x13   :  { %1279 = vmatprep.mubr.msk.bf16.mxu0 %vm280_vm0, %v1357_v6  ;;  %1311 = vmatprep.mubr.msk.bf16.mxu1 %vm280_vm0, %v1373_v10 }
  0x1a   :  { %1280 = vmatmul.mubr.msk.bf16.gmra.mxu0 %vm280_vm0, %v1358_v7  ;;  %1312 = vmatmul.mubr.msk.bf16.gmra.mxu1 %vm280_vm0, %v1374_v12 }
  0x1b   :  { %1283 = vmatprep.mubr.msk.bf16.mxu0 %vm280_vm0, %v1359_v11  ;;  %1315 = vmatprep.mubr.msk.bf16.mxu1 %vm280_vm0, %v1375_v13 }
  0x22   :  { %1284 = vmatmul.mubr.msk.bf16.gmra.mxu0 %vm280_vm0, %v1360_v14 }
  0x23   :  { %1287 = vmatprep.mubr.msk.bf16.mxu0 %vm280_vm0, %v1361_v15 }
  0x24   :  { %12 = vsyncpa [#allocation3], 0  ;;  %v1362_v18 = vld [vmem:[%s2076_s0 + $0x38] sm:$0xff]   ;;  %v1363_v19 = vld [vmem:[%s2076_s0 + $0x40] sm:$0xff]   ;;  %1316 = vmatmul.mubr.msk.bf16.gmra.mxu1 %vm280_vm0, %v1376_v16  ;;  %v1409_v53 = vmov 0.0   ;;  %s1410_s9 = smov [#allocation2]  }
  0x25   :  { %1319 = vmatprep.mubr.msk.bf16.mxu1 %vm280_vm0, %v1377_v17  ;;  %v1378_v20 = vld [vmem:[%s2076_s0 + $0xb8] sm:$0xff]   ;;  %v1379_v21 = vld [vmem:[%s2076_s0 + $0xc0] sm:$0xff]   ;;  %v1364_v22 = vld [vmem:[%s2076_s0 + $0x48] sm:$0xff]   ;;  %1004 = vst [vmem:[%s2082_s6] sm:$0x1] %v1409_v53  ;;  %s1146_s10 = sshll.u32 %s1410_s9, 4  ;;  %s1147_s10 = int_to_ptr.vmem [resolvable:$true] %s1146_s10 }
  0x26   :  { %v1365_v23 = vld [vmem:[%s2076_s0 + $0x50] sm:$0xff]   ;;  %v1380_v24 = vld [vmem:[%s2076_s0 + $0xc8] sm:$0xff]   ;;  %v1366_v26 = vld [vmem:[%s2076_s0 + $0x58] sm:$0xff]   ;;  %s1387_s18 = scalar_lea.vmem %s1147_s10, 8192  ;;  %p1392_p1 = scmp.lt.s32.totalorder %s1147_s10, %s1147_s10 }
  0x27   :  { %v1381_v25 = vld [vmem:[%s2076_s0 + $0xd0] sm:$0xff]   ;;  %v1367_v27 = vld [vmem:[%s2076_s0 + $0x60] sm:$0xff]   ;;  %v1382_v28 = vld [vmem:[%s2076_s0 + $0xd8] sm:$0xff]   ;;  %p1388_p0 = scmp.ne.s32.totalorder %s1147_s10, %s1387_s18  ;;  %p1393_p2 = scmp.lt.s32.totalorder %s1387_s18, %s1387_s18 }
  0x28   :  { %v1383_v29 = vld [vmem:[%s2076_s0 + $0xe0] sm:$0xff]   ;;  %v1368_v30 = vld [vmem:[%s2076_s0 + $0x68] sm:$0xff]   ;;  %v1369_v31 = vld [vmem:[%s2076_s0 + $0x70] sm:$0xff]  }
  0x29   :  { %v1384_v32 = vld [vmem:[%s2076_s0 + $0xe8] sm:$0xff]   ;;  %v1385_v33 = vld [vmem:[%s2076_s0 + $0xf0] sm:$0xff]   ;;  %v1370_v34 = vld [vmem:[%s2076_s0 + $0x78] sm:$0xff]   ;;  %p1394_p3 = por %p1393_p2, %p1392_p1 }
  0x2a   :  { %1288 = vmatmul.mubr.msk.bf16.gmra.mxu0 %vm280_vm0, %v1362_v18  ;;  %v1386_v35 = vld [vmem:[%s2076_s0 + $0xf8] sm:$0xff]   ;;  %v1591_v36 = vld [vmem:[%s2078_s2] ss:$0 sm:$0xff]  ;;  %v874_v54 = vld [vmem:[%s2080_s4 + $0x10] sm:$0xff] }
  0x2b   :  { %1291 = vmatprep.mubr.msk.bf16.mxu0 %vm280_vm0, %v1363_v19  ;;  %v1596_v38 = vld [vmem:[%s2079_s3] ss:$0 sm:$0xff]  ;;  %v873_v56 = vld [vmem:[%s2080_s4 + $0x8] sm:$0xff]  ;;  %v875_v63 = vld [vmem:[%s2080_s4 + $0x18] sm:$0xff]  ;;  %p1395_p4 = pnand %p1394_p3, %p1388_p0 }
  0x2c   :  { %1320 = vmatmul.mubr.msk.bf16.gmra.mxu1 %vm280_vm0, %v1378_v20  ;;  %v872_v45 = vld [vmem:[%s2080_s4] sm:$0xff] }
  0x2d   :  { %1323 = vmatprep.mubr.msk.bf16.mxu1 %vm280_vm0, %v1379_v21  ;;  %v876_v9 = vld [vmem:[%s2080_s4 + $0x20] sm:$0xff] }
  0x2e   :  { %v880_v53 = vld [vmem:[%s2080_s4 + $0x40] sm:$0xff] }
  0x32   :  { %1292 = vmatmul.mubr.msk.bf16.gmra.mxu0 %vm280_vm0, %v1364_v22 }
  0x33   :  { %1295 = vmatprep.mubr.msk.bf16.mxu0 %vm280_vm0, %v1365_v23 }
  0x34   :  { %1324 = vmatmul.mubr.msk.bf16.gmra.mxu1 %vm280_vm0, %v1380_v24 }
  0x35   :  { %1327 = vmatprep.mubr.msk.bf16.mxu1 %vm280_vm0, %v1381_v25 }
  0x3a   :  { %1296 = vmatmul.mubr.msk.bf16.gmra.mxu0 %vm280_vm0, %v1366_v26 }
  0x3b   :  { %1299 = vmatprep.mubr.msk.bf16.mxu0 %vm280_vm0, %v1367_v27 }
  0x3c   :  { %1328 = vmatmul.mubr.msk.bf16.gmra.mxu1 %vm280_vm0, %v1382_v28 }
  0x3d   :  { %1331 = vmatprep.mubr.msk.bf16.mxu1 %vm280_vm0, %v1383_v29 }
  0x42   :  { %1300 = vmatmul.mubr.msk.bf16.gmra.mxu0 %vm280_vm0, %v1368_v30 }
  0x43   :  { %1303 = vmatprep.mubr.msk.bf16.mxu0 %vm280_vm0, %v1369_v31  ;;  %v878_v31 = vld [vmem:[%s2080_s4 + $0x30] sm:$0xff] }
  0x44   :  { %1332 = vmatmul.mubr.msk.bf16.gmra.mxu1 %vm280_vm0, %v1384_v32  ;;  %v877_v32 = vld [vmem:[%s2080_s4 + $0x28] sm:$0xff] }
  0x45   :  { %1335 = vmatprep.mubr.msk.bf16.mxu1 %vm280_vm0, %v1385_v33 }
  0x4a   :  { %1304 = vmatmul.mubr.msk.bf16.gmra.mxu0 %vm280_vm0, %v1370_v34 }
  0x4c   :  { %1336 = vmatmul.mubr.msk.bf16.gmra.mxu1 %vm280_vm0, %v1386_v35 }
  0xd2   :  { %v1277_v37 = vpop.f32.mrf.mxu0  ;;  %v1309_v47 = vpop.f32.mrf.mxu1 }
  0xd3   :  { %v675_v39 = vmul.f32 %v1277_v37, %v1591_v36  ;;  %v707_v49 = vmul.f32 %v1309_v47, %v1591_v36 }
  0xd4   :  { %v411_v40 = vpop.f32.mrf.mxu0  ;;  %v539_v52 = vpop.f32.mrf.mxu1 }
  0xd5   :  { %v746_v41 = vadd.f32 %v1596_v38, %v675_v39  ;;  %v673_v42 = vmul.f32 %v1591_v36, %v411_v40  ;;  %v1619_v58 = vadd.f32 %v1596_v38, %v707_v49  ;;  %v705_v59 = vmul.f32 %v1591_v36, %v539_v52 }
  0xd6   :  { %v1278_v43 = vpop.f32.mrf.mxu0  ;;  %v1310_v62 = vpop.f32.mrf.mxu1 }
  0xd7   :  { %810 = vst [vmem:[#allocation2 + $0x10] sm:$0xff] %v746_v41  ;;  %v744_v44 = vadd.f32 %v1596_v38, %v673_v42  ;;  %v676_v46 = vmul.f32 %v1278_v43, %v1591_v36  ;;  %842 = vst [vmem:[#allocation2 + $0x110] sm:$0xff] %v1619_v58  ;;  %v1629_v1 = vadd.f32 %v1596_v38, %v705_v59  ;;  %v879_v42 = vld [vmem:[%s2080_s4 + $0x38] sm:$0xff] }
  0xd8   :  { %v414_v48 = vpop.f32.mrf.mxu0  ;;  %v708_v2 = vmul.f32 %v1310_v62, %v1591_v36  ;;  %v938_v3 = vsub.f32 %v746_v41, %v874_v54  ;;  %v542_v7 = vpop.f32.mrf.mxu1 }
  0xd9   :  { %808 = vst [vmem:[#allocation2] sm:$0xff] %v744_v44  ;;  %v747_v50 = vadd.f32 %v1596_v38, %v676_v46  ;;  %v674_v51 = vmul.f32 %v1591_v36, %v414_v48  ;;  %v936_v55 = vsub.f32 %v744_v44, %v872_v45  ;;  %840 = vst [vmem:[#allocation2 + $0x100] sm:$0xff] %v1629_v1 }
  0xda   :  { %v1281_v57 = vpop.f32.mrf.mxu0  ;;  %v1639_v11 = vadd.f32 %v1596_v38, %v708_v2  ;;  %v706_v12 = vmul.f32 %v1591_v36, %v542_v7  ;;  %v1313_v17 = vpop.f32.mrf.mxu1  ;;  %v1008_v21 = vmul.f32 %v938_v3, %v938_v3 }
  0xdb   :  { %811 = vst [vmem:[#allocation2 + $0x18] sm:$0xff] %v747_v50  ;;  %v745_v60 = vadd.f32 %v1596_v38, %v674_v51  ;;  %v679_v61 = vmul.f32 %v1281_v57, %v1591_v36  ;;  %v1006_v8 = vmul.f32 %v936_v55, %v936_v55  ;;  %v939_v13 = vsub.f32 %v747_v50, %v875_v63 }
  0xdc   :  { %v427_v0 = vpop.f32.mrf.mxu0  ;;  %843 = vst [vmem:[#allocation2 + $0x118] sm:$0xff] %v1639_v11  ;;  %v1646_v19 = vadd.f32 %v1596_v38, %v706_v12  ;;  %v711_v20 = vmul.f32 %v1313_v17, %v1591_v36  ;;  %v555_v25 = vpop.f32.mrf.mxu1 }
  0xdd   :  { %809 = vst [vmem:[#allocation2 + $0x8] sm:$0xff] %v745_v60  ;;  %v937_v4 = vsub.f32 %v745_v60, %v873_v56  ;;  %v750_v5 = vadd.f32 %v1596_v38, %v679_v61  ;;  %v677_v6 = vmul.f32 %v1591_v36, %v427_v0  ;;  %v1009_v29 = vmul.f32 %v939_v13, %v939_v13 }
  0xde   :  { %v1282_v10 = vpop.f32.mrf.mxu0  ;;  %841 = vst [vmem:[#allocation2 + $0x108] sm:$0xff] %v1646_v19  ;;  %v1653_v28 = vadd.f32 %v1596_v38, %v711_v20  ;;  %v1314_v34 = vpop.f32.mrf.mxu1  ;;  %v709_v39 = vmul.f32 %v1591_v36, %v555_v25 }
  0xdf   :  { %v1007_v14 = vmul.f32 %v937_v4, %v937_v4  ;;  %814 = vst [vmem:[#allocation2 + $0x30] sm:$0xff] %v750_v5  ;;  %v748_v15 = vadd.f32 %v1596_v38, %v677_v6  ;;  %v680_v16 = vmul.f32 %v1282_v10, %v1591_v36  ;;  %v942_v46 = vsub.f32 %v750_v5, %v878_v31  ;;  %v882_v4 = vld [vmem:[%s2080_s4 + $0x50] sm:$0xff]  ;;  %v881_v6 = vld [vmem:[%s2080_s4 + $0x48] sm:$0xff] }
  0xe0   :  { %v430_v18 = vpop.f32.mrf.mxu0  ;;  %846 = vst [vmem:[#allocation2 + $0x130] sm:$0xff] %v1653_v28  ;;  %v558_v45 = vpop.f32.mrf.mxu1  ;;  %v1671_v49 = vadd.f32 %v1596_v38, %v709_v39  ;;  %v712_v50 = vmul.f32 %v1314_v34, %v1591_v36 }
  0xe1   :  { %v1070_v22 = vadd.f32 %v1007_v14, %v1006_v8  ;;  %812 = vst [vmem:[#allocation2 + $0x20] sm:$0xff] %v748_v15  ;;  %v940_v23 = vsub.f32 %v748_v15, %v876_v9  ;;  %v751_v24 = vadd.f32 %v1596_v38, %v680_v16  ;;  %v678_v26 = vmul.f32 %v1591_v36, %v430_v18  ;;  %v883_v18 = vld [vmem:[%s2080_s4 + $0x58] sm:$0xff] }
  0xe2   :  { %v1285_v27 = vpop.f32.mrf.mxu0  ;;  %844 = vst [vmem:[#allocation2 + $0x120] sm:$0xff] %v1671_v49  ;;  %v1681_v60 = vadd.f32 %v1596_v38, %v712_v50  ;;  %v710_v61 = vmul.f32 %v1591_v36, %v558_v45  ;;  %v1012_v2 = vmul.f32 %v942_v46, %v942_v46  ;;  %v885_v50 = vld [vmem:[%s2080_s4 + $0x68] sm:$0xff] }
  0xe3   :  { %v1071_v30 = vadd.f32 %v1070_v22, %v1008_v21  ;;  %815 = vst [vmem:[#allocation2 + $0x38] sm:$0xff] %v751_v24  ;;  %v683_v33 = vmul.f32 %v1285_v27, %v1591_v36  ;;  %v749_v35 = vadd.f32 %v1596_v38, %v678_v26  ;;  %v1010_v40 = vmul.f32 %v940_v23, %v940_v23 }
  0xe4   :  { %v443_v37 = vpop.f32.mrf.mxu0  ;;  %v1317_v55 = vpop.f32.mrf.mxu1  ;;  %v943_v56 = vsub.f32 %v751_v24, %v879_v42  ;;  %847 = vst [vmem:[#allocation2 + $0x138] sm:$0xff] %v1681_v60  ;;  %v1694_v8 = vadd.f32 %v1596_v38, %v710_v61 }
  0xe5   :  { %v1072_v41 = vadd.f32 %v1071_v30, %v1009_v29  ;;  %v754_v43 = vadd.f32 %v1596_v38, %v683_v33  ;;  %v681_v44 = vmul.f32 %v1591_v36, %v443_v37  ;;  %813 = vst [vmem:[#allocation2 + $0x28] sm:$0xff] %v749_v35  ;;  %v941_v47 = vsub.f32 %v749_v35, %v877_v32  ;;  %v884_v32 = vld [vmem:[%s2080_s4 + $0x60] sm:$0xff] }
  0xe6   :  { %v1286_v48 = vpop.f32.mrf.mxu0  ;;  %v571_v0 = vpop.f32.mrf.mxu1  ;;  %v1013_v13 = vmul.f32 %v943_v56, %v943_v56  ;;  %845 = vst [vmem:[#allocation2 + $0x128] sm:$0xff] %v1694_v8  ;;  %v715_v16 = vmul.f32 %v1317_v55, %v1591_v36 }
  0xe7   :  { %v1073_v51 = vadd.f32 %v1072_v41, %v1010_v40  ;;  %818 = vst [vmem:[#allocation2 + $0x50] sm:$0xff] %v754_v43  ;;  %v752_v52 = vadd.f32 %v1596_v38, %v681_v44  ;;  %v684_v54 = vmul.f32 %v1286_v48, %v1591_v36  ;;  %v1011_v57 = vmul.f32 %v941_v47, %v941_v47  ;;  %v886_v47 = vld [vmem:[%s2080_s4 + $0x70] sm:$0xff] }
  0xe8   :  { %v446_v59 = vpop.f32.mrf.mxu0  ;;  %v1318_v12 = vpop.f32.mrf.mxu1  ;;  %v946_v17 = vsub.f32 %v754_v43, %v882_v4  ;;  %v1706_v27 = vadd.f32 %v1596_v38, %v715_v16  ;;  %v713_v29 = vmul.f32 %v1591_v36, %v571_v0 }
  0xe9   :  { %816 = vst [vmem:[#allocation2 + $0x40] sm:$0xff] %v752_v52  ;;  %v755_v62 = vadd.f32 %v1596_v38, %v684_v54  ;;  %v682_v63 = vmul.f32 %v1591_v36, %v446_v59  ;;  %v1074_v3 = vadd.f32 %v1073_v51, %v1011_v57  ;;  %v944_v5 = vsub.f32 %v752_v52, %v880_v53 }
  0xea   :  { %v1289_v7 = vpop.f32.mrf.mxu0  ;;  %v574_v23 = vpop.f32.mrf.mxu1  ;;  %850 = vst [vmem:[#allocation2 + $0x150] sm:$0xff] %v1706_v27  ;;  %v1716_v40 = vadd.f32 %v1596_v38, %v713_v29  ;;  %v716_v41 = vmul.f32 %v1318_v12, %v1591_v36  ;;  %v1016_v45 = vmul.f32 %v946_v17, %v946_v17 }
  0xeb   :  { %819 = vst [vmem:[#allocation2 + $0x58] sm:$0xff] %v755_v62  ;;  %v753_v9 = vadd.f32 %v1596_v38, %v682_v63  ;;  %v687_v10 = vmul.f32 %v1289_v7, %v1591_v36  ;;  %v1075_v14 = vadd.f32 %v1074_v3, %v1012_v2  ;;  %v1014_v24 = vmul.f32 %v944_v5, %v944_v5  ;;  %v887_v63 = vld [vmem:[%s2080_s4 + $0x78] sm:$0xff] }
  0xec   :  { %v459_v15 = vpop.f32.mrf.mxu0  ;;  %v1321_v34 = vpop.f32.mrf.mxu1  ;;  %v947_v37 = vsub.f32 %v755_v62, %v883_v18  ;;  %848 = vst [vmem:[#allocation2 + $0x140] sm:$0xff] %v1716_v40  ;;  %v1729_v52 = vadd.f32 %v1596_v38, %v716_v41  ;;  %v714_v61 = vmul.f32 %v1591_v36, %v574_v23 }
  0xed   :  { %817 = vst [vmem:[#allocation2 + $0x48] sm:$0xff] %v753_v9  ;;  %v945_v20 = vsub.f32 %v753_v9, %v881_v6  ;;  %v758_v21 = vadd.f32 %v1596_v38, %v687_v10  ;;  %v685_v22 = vmul.f32 %v1591_v36, %v459_v15  ;;  %v1076_v25 = vadd.f32 %v1075_v14, %v1013_v13  ;;  %v888_v14 = vld [vmem:[%s2080_s4 + $0x80] sm:$0xff] }
  0xee   :  { %v1290_v26 = vpop.f32.mrf.mxu0  ;;  %v587_v44 = vpop.f32.mrf.mxu1  ;;  %v1017_v56 = vmul.f32 %v947_v37, %v947_v37  ;;  %851 = vst [vmem:[#allocation2 + $0x158] sm:$0xff] %v1729_v52  ;;  %v1741_v9 = vadd.f32 %v1596_v38, %v714_v61  ;;  %v719_v10 = vmul.f32 %v1321_v34, %v1591_v36 }
  0xef   :  { %v1015_v30 = vmul.f32 %v945_v20, %v945_v20  ;;  %822 = vst [vmem:[#allocation2 + $0x70] sm:$0xff] %v758_v21  ;;  %v756_v31 = vadd.f32 %v1596_v38, %v685_v22  ;;  %v688_v33 = vmul.f32 %v1290_v26, %v1591_v36  ;;  %v1077_v35 = vadd.f32 %v1076_v25, %v1014_v24 }
  0xf0   :  { %v462_v39 = vpop.f32.mrf.mxu0  ;;  %v1322_v55 = vpop.f32.mrf.mxu1  ;;  %v950_v62 = vsub.f32 %v758_v21, %v886_v47  ;;  %849 = vst [vmem:[#allocation2 + $0x148] sm:$0xff] %v1741_v9  ;;  %v1751_v21 = vadd.f32 %v1596_v38, %v719_v10  ;;  %v717_v22 = vmul.f32 %v1591_v36, %v587_v44 }
  0xf1   :  { %820 = vst [vmem:[#allocation2 + $0x60] sm:$0xff] %v756_v31  ;;  %v759_v42 = vadd.f32 %v1596_v38, %v688_v33  ;;  %v686_v43 = vmul.f32 %v1591_v36, %v462_v39  ;;  %v1078_v46 = vadd.f32 %v1077_v35, %v1015_v30  ;;  %v948_v48 = vsub.f32 %v756_v31, %v884_v32  ;;  %v890_v30 = vld [vmem:[%s2080_s4 + $0x90] sm:$0xff]  ;;  %v889_v32 = vld [vmem:[%s2080_s4 + $0x88] sm:$0xff] }
  0xf2   :  { %v1293_v51 = vpop.f32.mrf.mxu0  ;;  %v590_v4 = vpop.f32.mrf.mxu1  ;;  %v1020_v26 = vmul.f32 %v950_v62, %v950_v62  ;;  %854 = vst [vmem:[#allocation2 + $0x170] sm:$0xff] %v1751_v21  ;;  %v1764_v34 = vadd.f32 %v1596_v38, %v717_v22  ;;  %v720_v44 = vmul.f32 %v1322_v55, %v1591_v36  ;;  %v892_v62 = vld [vmem:[%s2080_s4 + $0xa0] sm:$0xff] }
  0xf3   :  { %823 = vst [vmem:[#allocation2 + $0x78] sm:$0xff] %v759_v42  ;;  %v757_v53 = vadd.f32 %v1596_v38, %v686_v43  ;;  %v691_v54 = vmul.f32 %v1293_v51, %v1591_v36  ;;  %v1079_v57 = vadd.f32 %v1078_v46, %v1016_v45  ;;  %v1018_v5 = vmul.f32 %v948_v48, %v948_v48  ;;  %v891_v46 = vld [vmem:[%s2080_s4 + $0x98] sm:$0xff] }
  0xf4   :  { %v475_v59 = vpop.f32.mrf.mxu0  ;;  %v1325_v16 = vpop.f32.mrf.mxu1  ;;  %v951_v18 = vsub.f32 %v759_v42, %v887_v63  ;;  %852 = vst [vmem:[#allocation2 + $0x160] sm:$0xff] %v1764_v34  ;;  %v718_v55 = vmul.f32 %v1591_v36, %v590_v4 }
  0xf5   :  { %821 = vst [vmem:[#allocation2 + $0x68] sm:$0xff] %v757_v53  ;;  %v949_v0 = vsub.f32 %v757_v53, %v885_v50  ;;  %v762_v2 = vadd.f32 %v1596_v38, %v691_v54  ;;  %v689_v3 = vmul.f32 %v1591_v36, %v475_v59  ;;  %v1080_v6 = vadd.f32 %v1079_v57, %v1017_v56 }
  0xf6   :  { %v1294_v7 = vpop.f32.mrf.mxu0  ;;  %v603_v25 = vpop.f32.mrf.mxu1  ;;  %v1021_v41 = vmul.f32 %v951_v18, %v951_v18  ;;  %v1776_v57 = vadd.f32 %v1596_v38, %v720_v44  ;;  %v723_v4 = vmul.f32 %v1325_v16, %v1591_v36  ;;  %v893_v18 = vld [vmem:[%s2080_s4 + $0xa8] sm:$0xff] }
  0xf7   :  { %v1019_v12 = vmul.f32 %v949_v0, %v949_v0  ;;  %826 = vst [vmem:[#allocation2 + $0x90] sm:$0xff] %v762_v2  ;;  %v760_v13 = vadd.f32 %v1596_v38, %v689_v3  ;;  %v692_v15 = vmul.f32 %v1294_v7, %v1591_v36  ;;  %v1081_v17 = vadd.f32 %v1080_v6, %v1018_v5 }
  0xf8   :  { %v478_v20 = vpop.f32.mrf.mxu0  ;;  %v1326_v39 = vpop.f32.mrf.mxu1  ;;  %v954_v45 = vsub.f32 %v762_v2, %v890_v30  ;;  %855 = vst [vmem:[#allocation2 + $0x178] sm:$0xff] %v1776_v57  ;;  %v1788_v6 = vadd.f32 %v1596_v38, %v718_v55  ;;  %v1803_v16 = vadd.f32 %v1596_v38, %v723_v4  ;;  %v898_v4 = vld [vmem:[%s2080_s4 + $0xd0] sm:$0xff] }
  0xf9   :  { %824 = vst [vmem:[#allocation2 + $0x80] sm:$0xff] %v760_v13  ;;  %v763_v23 = vadd.f32 %v1596_v38, %v692_v15  ;;  %v690_v24 = vmul.f32 %v1591_v36, %v478_v20  ;;  %v1082_v29 = vadd.f32 %v1081_v17, %v1019_v12  ;;  %v952_v31 = vsub.f32 %v760_v13, %v888_v14  ;;  %v894_v15 = vld [vmem:[%s2080_s4 + $0xb0] sm:$0xff] }
  0xfa   :  { %v1297_v33 = vpop.f32.mrf.mxu0  ;;  %v606_v51 = vpop.f32.mrf.mxu1  ;;  %v1024_v13 = vmul.f32 %v954_v45, %v954_v45  ;;  %853 = vst [vmem:[#allocation2 + $0x168] sm:$0xff] %v1788_v6  ;;  %858 = vst [vmem:[#allocation2 + $0x190] sm:$0xff] %v1803_v16 }
  0xfb   :  { %827 = vst [vmem:[#allocation2 + $0x98] sm:$0xff] %v763_v23  ;;  %v761_v35 = vadd.f32 %v1596_v38, %v690_v24  ;;  %v695_v37 = vmul.f32 %v1297_v33, %v1591_v36  ;;  %v1083_v42 = vadd.f32 %v1082_v29, %v1020_v26  ;;  %v1022_v53 = vmul.f32 %v952_v31, %v952_v31  ;;  %v895_v33 = vld [vmem:[%s2080_s4 + $0xb8] sm:$0xff] }
  0xfc   :  { %v491_v43 = vpop.f32.mrf.mxu0  ;;  %v1784_v0 = vpop.f32.mrf.mxu1  ;;  %v955_v3 = vsub.f32 %v763_v23, %v891_v46  ;;  %v721_v31 = vmul.f32 %v1591_v36, %v603_v25  ;;  %v724_v25 = vmul.f32 %v1326_v39, %v1591_v36  ;;  %v722_v39 = vmul.f32 %v1591_v36, %v606_v51 }
  0xfd   :  { %825 = vst [vmem:[#allocation2 + $0x88] sm:$0xff] %v761_v35  ;;  %v953_v47 = vsub.f32 %v761_v35, %v889_v32  ;;  %v766_v48 = vadd.f32 %v1596_v38, %v695_v37  ;;  %v693_v50 = vmul.f32 %v1591_v36, %v491_v43  ;;  %v1084_v54 = vadd.f32 %v1083_v42, %v1021_v41 }
  0xfe   :  { %v1298_v56 = vpop.f32.mrf.mxu0  ;;  %v1793_v12 = vpop.f32.mrf.mxu1  ;;  %v1025_v26 = vmul.f32 %v955_v3, %v955_v3  ;;  %v1819_v46 = vadd.f32 %v1596_v38, %v721_v31  ;;  %v1846_v51 = vadd.f32 %v1596_v38, %v722_v39 }
  0xff   :  { %v1023_v59 = vmul.f32 %v953_v47, %v953_v47  ;;  %830 = vst [vmem:[#allocation2 + $0xb0] sm:$0xff] %v766_v48  ;;  %v764_v61 = vadd.f32 %v1596_v38, %v693_v50  ;;  %v696_v63 = vmul.f32 %v1298_v56, %v1591_v36  ;;  %v1085_v2 = vadd.f32 %v1084_v54, %v1022_v53  ;;  %v896_v50 = vld [vmem:[%s2080_s4 + $0xc0] sm:$0xff] }
 0x100   :  { %v494_v5 = vpop.f32.mrf.mxu0  ;;  %v1807_v24 = vpop.f32.mrf.mxu1  ;;  %v958_v32 = vsub.f32 %v766_v48, %v894_v15  ;;  %856 = vst [vmem:[#allocation2 + $0x180] sm:$0xff] %v1819_v46  ;;  %857 = vst [vmem:[#allocation2 + $0x188] sm:$0xff] %v1846_v51 }
 0x101   :  { %828 = vst [vmem:[#allocation2 + $0xa0] sm:$0xff] %v764_v61  ;;  %v767_v7 = vadd.f32 %v1596_v38, %v696_v63  ;;  %v694_v10 = vmul.f32 %v1591_v36, %v494_v5  ;;  %v1086_v14 = vadd.f32 %v1085_v2, %v1023_v59  ;;  %v956_v17 = vsub.f32 %v764_v61, %v892_v62 }
 0x102   :  { %v1301_v20 = vpop.f32.mrf.mxu0  ;;  %v1816_v42 = vpop.f32.mrf.mxu1  ;;  %v1831_v61 = vadd.f32 %v1596_v38, %v724_v25  ;;  %v1028_v3 = vmul.f32 %v958_v32, %v958_v32  ;;  %v900_v25 = vld [vmem:[%s2080_s4 + $0xe0] sm:$0xff] }
 0x103   :  { %831 = vst [vmem:[#allocation2 + $0xb8] sm:$0xff] %v767_v7  ;;  %v765_v22 = vadd.f32 %v1596_v38, %v694_v10  ;;  %v699_v23 = vmul.f32 %v1301_v20, %v1591_v36  ;;  %v1087_v29 = vadd.f32 %v1086_v14, %v1024_v13  ;;  %v1026_v43 = vmul.f32 %v956_v17, %v956_v17  ;;  %v897_v10 = vld [vmem:[%s2080_s4 + $0xc8] sm:$0xff] }
 0x104   :  { %v507_v30 = vpop.f32.mrf.mxu0  ;;  %v1827_v54 = vpop.f32.mrf.mxu1  ;;  %v959_v55 = vsub.f32 %v767_v7, %v895_v33  ;;  %859 = vst [vmem:[#allocation2 + $0x198] sm:$0xff] %v1831_v61 }
 0x105   :  { %829 = vst [vmem:[#allocation2 + $0xa8] sm:$0xff] %v765_v22  ;;  %v957_v35 = vsub.f32 %v765_v22, %v893_v18  ;;  %v770_v37 = vadd.f32 %v1596_v38, %v699_v23  ;;  %v697_v41 = vmul.f32 %v1591_v36, %v507_v30  ;;  %v1088_v44 = vadd.f32 %v1087_v29, %v1025_v26  ;;  %v899_v29 = vld [vmem:[%s2080_s4 + $0xd8] sm:$0xff] }
 0x106   :  { %v1302_v45 = vpop.f32.mrf.mxu0  ;;  %v1836_v2 = vpop.f32.mrf.mxu1  ;;  %v1029_v18 = vmul.f32 %v959_v55, %v959_v55  ;;  %v727_v23 = vmul.f32 %v1784_v0, %v1591_v36  ;;  %v725_v0 = vmul.f32 %v1591_v36, %v1793_v12  ;;  %v728_v12 = vmul.f32 %v1807_v24, %v1591_v36 }
 0x107   :  { %v1027_v47 = vmul.f32 %v957_v35, %v957_v35  ;;  %834 = vst [vmem:[#allocation2 + $0xd0] sm:$0xff] %v770_v37  ;;  %v768_v48 = vadd.f32 %v1596_v38, %v697_v41  ;;  %v700_v53 = vmul.f32 %v1302_v45, %v1591_v36  ;;  %v1089_v56 = vadd.f32 %v1088_v44, %v1026_v43 }
 0x108   :  { %v510_v59 = vpop.f32.mrf.mxu0  ;;  %v1334_v17 = vpop.f32.mrf.mxu1  ;;  %v962_v26 = vsub.f32 %v770_v37, %v898_v4  ;;  %v1859_v44 = vadd.f32 %v1596_v38, %v727_v23  ;;  %v1870_v55 = vadd.f32 %v1596_v38, %v725_v0  ;;  %v1884_v24 = vadd.f32 %v1596_v38, %v728_v12 }
 0x109   :  { %832 = vst [vmem:[#allocation2 + $0xc0] sm:$0xff] %v768_v48  ;;  %v771_v62 = vadd.f32 %v1596_v38, %v700_v53  ;;  %v698_v63 = vmul.f32 %v1591_v36, %v510_v59  ;;  %v1090_v5 = vadd.f32 %v1089_v56, %v1027_v47  ;;  %v960_v7 = vsub.f32 %v768_v48, %v896_v50 }
 0x10a   :  { %v1305_v13 = vpop.f32.mrf.mxu0  ;;  %v638_v33 = vpop.f32.mrf.mxu1  ;;  %862 = vst [vmem:[#allocation2 + $0x1b0] sm:$0xff] %v1859_v44  ;;  %860 = vst [vmem:[#allocation2 + $0x1a0] sm:$0xff] %v1870_v55 }
 0x10b   :  { %835 = vst [vmem:[#allocation2 + $0xd8] sm:$0xff] %v771_v62  ;;  %v769_v14 = vadd.f32 %v1596_v38, %v698_v63  ;;  %v703_v15 = vmul.f32 %v1305_v13, %v1591_v36  ;;  %v1091_v20 = vadd.f32 %v1090_v5, %v1028_v3  ;;  %v1030_v35 = vmul.f32 %v960_v7, %v960_v7  ;;  %v901_v7 = vld [vmem:[%s2080_s4 + $0xe8] sm:$0xff] }
 0x10c   :  { %v523_v22 = vpop.f32.mrf.mxu0  ;;  %v1337_v48 = vpop.f32.mrf.mxu1  ;;  %v963_v53 = vsub.f32 %v771_v62, %v899_v29  ;;  %v1032_v3 = vmul.f32 %v962_v26, %v962_v26  ;;  %v902_v62 = vld [vmem:[%s2080_s4 + $0xf0] sm:$0xff]  ;;  %v726_v13 = vmul.f32 %v1591_v36, %v1816_v42  ;;  %863 = vst [vmem:[#allocation2 + $0x1b8] sm:$0xff] %v1884_v24  ;;  %v729_v42 = vmul.f32 %v1591_v36, %v1836_v2 }
 0x10d   :  { %833 = vst [vmem:[#allocation2 + $0xc8] sm:$0xff] %v769_v14  ;;  %v961_v30 = vsub.f32 %v769_v14, %v897_v10  ;;  %v774_v31 = vadd.f32 %v1596_v38, %v703_v15  ;;  %v701_v32 = vmul.f32 %v1591_v36, %v523_v22  ;;  %v1092_v41 = vadd.f32 %v1091_v20, %v1029_v18  ;;  %v903_v22 = vld [vmem:[%s2080_s4 + $0xf8] sm:$0xff] }
 0x10e   :  { %v1306_v43 = vpop.f32.mrf.mxu0  ;;  %v651_v63 = vpop.f32.mrf.mxu1  ;;  %v1033_v14 = vmul.f32 %v963_v53, %v963_v53  ;;  %v731_v18 = vmul.f32 %v1827_v54, %v1591_v36  ;;  %v1896_v26 = vadd.f32 %v1596_v38, %v726_v13  ;;  %v732_v54 = vmul.f32 %v1334_v17, %v1591_v36 }
 0x10f   :  { %v1031_v37 = vmul.f32 %v961_v30, %v961_v30  ;;  %838 = vst [vmem:[#allocation2 + $0xf0] sm:$0xff] %v774_v31  ;;  %v772_v45 = vadd.f32 %v1596_v38, %v701_v32  ;;  %v704_v47 = vmul.f32 %v1306_v43, %v1591_v36  ;;  %v1093_v50 = vadd.f32 %v1092_v41, %v1030_v35 }
 0x110   :  { %v526_v56 = vpop.f32.mrf.mxu0  ;;  %v966_v20 = vsub.f32 %v774_v31, %v902_v62  ;;  %v1338_v29 = vpop.f32.mrf.mxu1  ;;  %v1901_v35 = vadd.f32 %v1596_v38, %v731_v18  ;;  %v904_v31 = vld [vmem:[%s2080_s4 + $0x100] sm:$0xff]  ;;  %861 = vst [vmem:[#allocation2 + $0x1a8] sm:$0xff] %v1896_v26  ;;  %v1909_v43 = vadd.f32 %v1596_v38, %v729_v42  ;;  %v730_v2 = vmul.f32 %v1591_v36, %v638_v33 }
 0x111   :  { %836 = vst [vmem:[#allocation2 + $0xe0] sm:$0xff] %v772_v45  ;;  %v775_v59 = vadd.f32 %v1596_v38, %v704_v47  ;;  %v702_v39 = vmul.f32 %v1591_v36, %v526_v56  ;;  %v1094_v5 = vadd.f32 %v1093_v50, %v1031_v37  ;;  %v964_v4 = vsub.f32 %v772_v45, %v900_v25  ;;  %v905_v25 = vld [vmem:[%s2080_s4 + $0x108] sm:$0xff] }
 0x112   :  { %866 = vst [vmem:[#allocation2 + $0x1d0] sm:$0xff] %v1901_v35  ;;  %v1914_v45 = vadd.f32 %v1596_v38, %v732_v54  ;;  %v735_v17 = vmul.f32 %v1337_v48, %v1591_v36  ;;  %864 = vst [vmem:[#allocation2 + $0x1c0] sm:$0xff] %v1909_v43  ;;  %v1922_v47 = vadd.f32 %v1596_v38, %v730_v2  ;;  %v654_v50 = vpop.f32.mrf.mxu1 }
 0x113   :  { %839 = vst [vmem:[#allocation2 + $0xf8] sm:$0xff] %v775_v59  ;;  %v773_v10 = vadd.f32 %v1596_v38, %v702_v39  ;;  %v1095_v15 = vadd.f32 %v1094_v5, %v1032_v3  ;;  %v1034_v30 = vmul.f32 %v964_v4, %v964_v4  ;;  %v967_v37 = vsub.f32 %v775_v59, %v903_v22  ;;  %v906_v59 = vld [vmem:[%s2080_s4 + $0x110] sm:$0xff]  ;;  %v907_v4 = vld [vmem:[%s2080_s4 + $0x118] sm:$0xff]  ;;  %v909_v22 = vld [vmem:[%s2080_s4 + $0x128] sm:$0xff] }
 0x114   :  { %v733_v33 = vmul.f32 %v1591_v36, %v651_v63  ;;  %v1036_v53 = vmul.f32 %v966_v20, %v966_v20  ;;  %v968_v56 = vsub.f32 %v1629_v1, %v904_v31  ;;  %867 = vst [vmem:[#allocation2 + $0x1d8] sm:$0xff] %v1914_v45  ;;  %v1928_v48 = vadd.f32 %v1596_v38, %v735_v17 }
 0x115   :  { %837 = vst [vmem:[#allocation2 + $0xe8] sm:$0xff] %v773_v10  ;;  %v965_v23 = vsub.f32 %v773_v10, %v901_v7  ;;  %v1096_v32 = vadd.f32 %v1095_v15, %v1033_v14  ;;  %865 = vst [vmem:[#allocation2 + $0x1c8] sm:$0xff] %v1922_v47  ;;  %v736_v63 = vmul.f32 %v1338_v29, %v1591_v36 }
 0x116   :  { %v1935_v39 = vadd.f32 %v1596_v38, %v733_v33  ;;  %v1037_v1 = vmul.f32 %v967_v37, %v967_v37  ;;  %v969_v5 = vsub.f32 %v1646_v19, %v905_v25  ;;  %870 = vst [vmem:[#allocation2 + $0x1f0] sm:$0xff] %v1928_v48  ;;  %v734_v62 = vmul.f32 %v1591_v36, %v654_v50  ;;  %v908_v36 = vld [vmem:[%s2080_s4 + $0x120] sm:$0xff] }
 0x117   :  { %v1035_v41 = vmul.f32 %v965_v23, %v965_v23  ;;  %v1097_v0 = vadd.f32 %v1096_v32, %v1034_v30  ;;  %v1946_v7 = vadd.f32 %v1596_v38, %v736_v63  ;;  %v970_v10 = vsub.f32 %v1619_v58, %v906_v59 }
 0x118   :  { %868 = vst [vmem:[#allocation2 + $0x1e0] sm:$0xff] %v1935_v39  ;;  %v1038_v13 = vmul.f32 %v968_v56, %v968_v56  ;;  %v1950_v19 = vadd.f32 %v1596_v38, %v734_v62  ;;  %v971_v15 = vsub.f32 %v1639_v11, %v907_v4  ;;  %v1039_v18 = vmul.f32 %v969_v5, %v969_v5 }
 0x119   :  { %v1098_v12 = vadd.f32 %v1097_v0, %v1035_v41  ;;  %871 = vst [vmem:[#allocation2 + $0x1f8] sm:$0xff] %v1946_v7 }
 0x11a   :  { %869 = vst [vmem:[#allocation2 + $0x1e8] sm:$0xff] %v1950_v19 }
 0x11b   :  { %v1099_v3 = vadd.f32 %v1098_v12, %v1036_v53 }
 0x11d   :  { %v1100_v14 = vadd.f32 %v1099_v3, %v1037_v1 }
 0x11f   :  { %v1101_v20 = vadd.f32 %v1100_v14, %v1038_v13 }
 0x120   :  { %1398 = shalt.err (!%p1395_p4)
}
 0x121   :  { %s1411_s19 = smov 128   ;;  %s1412_s20 = smov 8   ;;  %v1040_v38 = vmul.f32 %v970_v10, %v970_v10  ;;  %v1102_v58 = vadd.f32 %v1101_v20, %v1039_v18  ;;  %v972_v11 = vsub.f32 %v1671_v49, %v908_v36  ;;  %v910_v23 = vld [vmem:[%s2080_s4 + $0x130] sm:$0xff]  ;;  %v1041_v42 = vmul.f32 %v971_v15, %v971_v15  ;;  %v911_v32 = vld [vmem:[%s2080_s4 + $0x138] sm:$0xff]  ;;  %v912_v49 = vld [vmem:[%s2080_s4 + $0x140] sm:$0xff] }
 0x122   :  { %1152 = dma.vmem_to_hbm [thread:$0]  %s1147_s10, 8192, %s2081_s5, [#allocation3], %s1411_s19, %s1411_s19, %s1412_s20   ;;  %v973_v30 = vsub.f32 %v1694_v8, %v909_v22  ;;  %v974_v54 = vsub.f32 %v1653_v28, %v910_v23  ;;  %v975_v0 = vsub.f32 %v1681_v60, %v911_v32  ;;  %v976_v33 = vsub.f32 %v1716_v40, %v912_v49 }
 0x123   :  { %v1103_v29 = vadd.f32 %v1102_v58, %v1040_v38  ;;  %v1042_v31 = vmul.f32 %v972_v11, %v972_v11  ;;  %v913_v8 = vld [vmem:[%s2080_s4 + $0x148] sm:$0xff]  ;;  %v914_v28 = vld [vmem:[%s2080_s4 + $0x150] sm:$0xff]  ;;  %v915_v60 = vld [vmem:[%s2080_s4 + $0x158] sm:$0xff] }
 0x124   :  { %v1043_v37 = vmul.f32 %v973_v30, %v973_v30  ;;  %v1044_v17 = vmul.f32 %v974_v54, %v974_v54  ;;  %v1045_v50 = vmul.f32 %v975_v0, %v975_v0  ;;  %v977_v56 = vsub.f32 %v1741_v9, %v913_v8  ;;  %v916_v40 = vld [vmem:[%s2080_s4 + $0x160] sm:$0xff]  ;;  %v917_v9 = vld [vmem:[%s2080_s4 + $0x168] sm:$0xff] }
 0x125   :  { %v1104_v41 = vadd.f32 %v1103_v29, %v1041_v42  ;;  %v978_v12 = vsub.f32 %v1706_v27, %v914_v28  ;;  %v1046_v59 = vmul.f32 %v976_v33, %v976_v33  ;;  %v979_v3 = vsub.f32 %v1729_v52, %v915_v60  ;;  %v918_v27 = vld [vmem:[%s2080_s4 + $0x170] sm:$0xff]  ;;  %v919_v52 = vld [vmem:[%s2080_s4 + $0x178] sm:$0xff] }
 0x126   :  { %v1047_v5 = vmul.f32 %v977_v56, %v977_v56  ;;  %v980_v10 = vsub.f32 %v1764_v34, %v916_v40  ;;  %v981_v36 = vsub.f32 %v1788_v6, %v917_v9  ;;  %v982_v15 = vsub.f32 %v1751_v21, %v918_v27  ;;  %v920_v34 = vld [vmem:[%s2080_s4 + $0x180] sm:$0xff]  ;;  %v921_v6 = vld [vmem:[%s2080_s4 + $0x188] sm:$0xff]  ;;  %v922_v21 = vld [vmem:[%s2080_s4 + $0x190] sm:$0xff] }
 0x127   :  { %v1105_v2 = vadd.f32 %v1104_v41, %v1042_v31  ;;  %v1048_v62 = vmul.f32 %v978_v12, %v978_v12  ;;  %v1049_v13 = vmul.f32 %v979_v3, %v979_v3  ;;  %v983_v38 = vsub.f32 %v1776_v57, %v919_v52  ;;  %v923_v57 = vld [vmem:[%s2080_s4 + $0x198] sm:$0xff] }
 0x128   :  { %v1050_v18 = vmul.f32 %v980_v10, %v980_v10  ;;  %v1051_v58 = vmul.f32 %v981_v36, %v981_v36  ;;  %v1052_v11 = vmul.f32 %v982_v15, %v982_v15  ;;  %v984_v42 = vsub.f32 %v1819_v46, %v920_v34  ;;  %v924_v46 = vld [vmem:[%s2080_s4 + $0x1a0] sm:$0xff] }
 0x129   :  { %v1106_v25 = vadd.f32 %v1105_v2, %v1043_v37  ;;  %v1053_v29 = vmul.f32 %v983_v38, %v983_v38  ;;  %v985_v32 = vsub.f32 %v1846_v51, %v921_v6  ;;  %v986_v54 = vsub.f32 %v1803_v16, %v922_v21  ;;  %v925_v51 = vld [vmem:[%s2080_s4 + $0x1a8] sm:$0xff]  ;;  %v926_v16 = vld [vmem:[%s2080_s4 + $0x1b0] sm:$0xff] }
 0x12a   :  { %v1054_v31 = vmul.f32 %v984_v42, %v984_v42  ;;  %v987_v2 = vsub.f32 %v1831_v61, %v923_v57  ;;  %v989_v28 = vsub.f32 %v1896_v26, %v925_v51  ;;  %v927_v61 = vld [vmem:[%s2080_s4 + $0x1b8] sm:$0xff]  ;;  %v929_v26 = vld [vmem:[%s2080_s4 + $0x1c8] sm:$0xff] }
 0x12b   :  { %v1107_v53 = vadd.f32 %v1106_v25, %v1044_v17  ;;  %v1055_v0 = vmul.f32 %v985_v32, %v985_v32  ;;  %v1056_v37 = vmul.f32 %v986_v54, %v986_v54  ;;  %v988_v17 = vsub.f32 %v1870_v55, %v924_v46  ;;  %v928_v55 = vld [vmem:[%s2080_s4 + $0x1c0] sm:$0xff] }
 0x12c   :  { %v1057_v25 = vmul.f32 %v987_v2, %v987_v2  ;;  %v991_v12 = vsub.f32 %v1884_v24, %v927_v61  ;;  %v993_v9 = vsub.f32 %v1922_v47, %v929_v26  ;;  %v931_v24 = vld [vmem:[%s2080_s4 + $0x1d8] sm:$0xff]  ;;  %v933_v47 = vld [vmem:[%s2080_s4 + $0x1e8] sm:$0xff] }
 0x12d   :  { %v1108_v63 = vadd.f32 %v1107_v53, %v1045_v50  ;;  %v990_v50 = vsub.f32 %v1859_v44, %v926_v16  ;;  %v1058_v53 = vmul.f32 %v988_v17, %v988_v17  ;;  %v930_v44 = vld [vmem:[%s2080_s4 + $0x1d0] sm:$0xff]  ;;  %v997_v34 = vsub.f32 %v1950_v19, %v933_v47 }
 0x12e   :  { %v1061_v3 = vmul.f32 %v991_v12, %v991_v12 }
 0x12f   :  { %v1109_v1 = vadd.f32 %v1108_v63, %v1046_v59  ;;  %v1059_v59 = vmul.f32 %v989_v28, %v989_v28  ;;  %v1060_v63 = vmul.f32 %v990_v50, %v990_v50 }
 0x131   :  { %v1110_v4 = vadd.f32 %v1109_v1, %v1047_v5  ;;  %v992_v1 = vsub.f32 %v1909_v43, %v928_v55  ;;  %v932_v43 = vld [vmem:[%s2080_s4 + $0x1e0] sm:$0xff] }
 0x132   :  { %v996_v15 = vsub.f32 %v1935_v39, %v932_v43  ;;  %v1067_v39 = vmul.f32 %v997_v34, %v997_v34 }
 0x133   :  { %v1111_v14 = vadd.f32 %v1110_v4, %v1048_v62  ;;  %v994_v62 = vsub.f32 %v1901_v35, %v930_v44  ;;  %v1062_v4 = vmul.f32 %v992_v1, %v992_v1  ;;  %v934_v35 = vld [vmem:[%s2080_s4 + $0x1f0] sm:$0xff] }
 0x134   :  { %v1066_v38 = vmul.f32 %v996_v15, %v996_v15 }
 0x135   :  { %v1112_v20 = vadd.f32 %v1111_v14, %v1049_v13  ;;  %v995_v13 = vsub.f32 %v1914_v45, %v931_v24  ;;  %v1063_v14 = vmul.f32 %v993_v9, %v993_v9  ;;  %v1064_v36 = vmul.f32 %v994_v62, %v994_v62  ;;  %v935_v45 = vld [vmem:[%s2080_s4 + $0x1f8] sm:$0xff] }
 0x137   :  { %v1113_v22 = vadd.f32 %v1112_v20, %v1050_v18  ;;  %v1065_v18 = vmul.f32 %v995_v13, %v995_v13 }
 0x139   :  { %v1114_v23 = vadd.f32 %v1113_v22, %v1051_v58  ;;  %v998_v22 = vsub.f32 %v1928_v48, %v934_v35  ;;  %v1005_v48 = vld [vmem:[%s2082_s6] sm:$0x1] }
 0x13b   :  { %v1115_v30 = vadd.f32 %v1114_v23, %v1052_v11  ;;  %v999_v11 = vsub.f32 %v1946_v7, %v935_v45  ;;  %v1068_v23 = vmul.f32 %v998_v22, %v998_v22 }
 0x13d   :  { %v1116_v41 = vadd.f32 %v1115_v30, %v1053_v29  ;;  %v1069_v21 = vmul.f32 %v999_v11, %v999_v11 }
 0x13f   :  { %v1117_v49 = vadd.f32 %v1116_v41, %v1054_v31 }
 0x141   :  { %v1118_v8 = vadd.f32 %v1117_v49, %v1055_v0 }
 0x143   :  { %v1119_v33 = vadd.f32 %v1118_v8, %v1056_v37 }
 0x145   :  { %v1120_v56 = vadd.f32 %v1119_v33, %v1057_v25 }
 0x147   :  { %v1121_v60 = vadd.f32 %v1120_v56, %v1058_v53 }
 0x149   :  { %v1122_v40 = vadd.f32 %v1121_v60, %v1059_v59 }
 0x14b   :  { %v1123_v5 = vadd.f32 %v1122_v40, %v1060_v63 }
 0x14d   :  { %v1124_v10 = vadd.f32 %v1123_v5, %v1061_v3 }
 0x14f   :  { %v1125_v27 = vadd.f32 %v1124_v10, %v1062_v4 }
 0x151   :  { %v1126_v52 = vadd.f32 %v1125_v27, %v1063_v14 }
 0x153   :  { %v1127_v20 = vadd.f32 %v1126_v52, %v1064_v36 }
 0x155   :  { %v1128_v58 = vadd.f32 %v1127_v20, %v1065_v18 }
 0x157   :  { %v1129_v6 = vadd.f32 %v1128_v58, %v1066_v38 }
 0x159   :  { %v1130_v42 = vadd.f32 %v1129_v6, %v1067_v39 }
 0x15b   :  { %v1131_v29 = vadd.f32 %v1130_v42, %v1068_v23 }
 0x15d   :  { %v1132_v30 = vadd.f32 %v1131_v29, %v1069_v21 }
 0x15f   :  { %v1133_v32 = vrot.slane %v1132_v30, 4 }
 0x161   :  { %v1134_v57 = vadd.f32 %v1133_v32, %v1132_v30 }
 0x163   :  { %v1135_v19 = vrot.slane %v1134_v57, 2 }
 0x165   :  { %v1136_v54 = vadd.f32 %v1135_v19, %v1134_v57 }
 0x167   :  { %v1137_v31 = vrot.slane %v1136_v54, 1 }
 0x169   :  { %v1138_v41 = vadd.f32 %v1137_v31, %v1136_v54 }
 0x16b   :  { %v1139_v46 = vadd.f32 %v1138_v41, %v1005_v48 }
 0x16d   :  { %1140 = vst [vmem:[%s2082_s6] sm:$0x1] %v1139_v46 }
 0x16e   :  { %1407 = dma.done.wait [#allocation3], 8192  }
 0x16f   :  { %1408 = vsyncadd [#allocation3], 4294959104 }
 0x170   :  { %1160 = vsyncpa [#allocation3], 1 }

</bundles_post_ra>
